<compile_context>
chip_gen: v6e
topology: v6e:2x2x1
jax: 0.10.0
libtpu: 0.0.40
codegen_flags: <defaults>
</compile_context>

<pallas_src>
import functools
import math

import jax
import jax.numpy as jnp
import numpy as np
from jax.experimental import pallas as pl
from jax.experimental.pallas import tpu as pltpu

# High precision only where it can flip the discrete top-k delay selection.
_SELECTION_PRECISION = jax.lax.Precision.HIGHEST
# Explicit scoped-VMEM budget (v7x has only 64 MiB physical / 32 MiB default).
_VMEM_LIMIT = 32 * 1024 * 1024


def _next_pow2(n):
    return 1 << max(0, (n - 1).bit_length())


# --------------------- Fused AutoCorrelationLayer kernel (hot path) -----------------

def _fused_layer_kernel(q_ref, k_ref, v_ref,
                        wq_ref, bq_ref, wk_ref, bk_ref, wv_ref, bv_ref,
                        wo_ref, bo_ref, o_ref, *, top_k):
    L, G, DM = q_ref.shape
    S = k_ref.shape[0]
    HE = wq_ref.shape[1]
    Lp = _next_pow2(L)
    lane = jax.lax.broadcasted_iota(jnp.int32, (1, L), 1)
    NEG = jnp.float32(-1e30)
    inv_he = jnp.float32(1.0 / HE)

    qb = q_ref[...]                    # (L, G, DM) - whole VMEM block, loaded once
    kb = k_ref[...]                    # (S, G, DM)
    vb = v_ref[...]
    wq = wq_ref[...]; bq = bq_ref[...]
    wk = wk_ref[...]; bk = bk_ref[...]
    wv = wv_ref[...]; bv = bv_ref[...]
    wo = wo_ref[...]; bo = bo_ref[...]

    for g in range(G):                 # G is small (VMEM-bounded): unrolled
        # ---- fused Q/K/V projections (MXU) ----
        q = jnp.dot(qb[:, g, :], wq, preferred_element_type=jnp.float32,
                    precision=_SELECTION_PRECISION) + bq            # (L, HE)
        k = jnp.dot(kb[:, g, :], wk, preferred_element_type=jnp.float32,
                    precision=_SELECTION_PRECISION) + bk            # (S, HE)
        v = jnp.dot(vb[:, g, :], wv,
                    preferred_element_type=jnp.float32) + bv        # (S, HE)
        if S < L:                      # reference pads the *projected* k/v with zeros
            pad = jnp.zeros((L - S, HE), jnp.float32)
            k = jnp.concatenate([k, pad], axis=0)
            v = jnp.concatenate([v, pad], axis=0)

        # ---- circular cross-correlation averaged over head*channel (MXU) ----
        # M[i, j] = <q[i], k[j]>
        m = jnp.dot(q, k.T, preferred_element_type=jnp.float32,
                    precision=_SELECTION_PRECISION)                 # (L, L)
        # Circular-diagonal sums via a log2(L) roll/add butterfly:
        #   s[0, j] = sum_i M[i, (j + i) % L]  ==  HE * corr[(L - j) % L]
        x = m
        if Lp != L:
            x = jnp.concatenate(
                [x, jnp.zeros((Lp - L, L), jnp.float32)], axis=0)
        r = Lp
        while r > 1:
            r //= 2
            x = x[:r, :] + jnp.roll(x[r:, :], -r, axis=1)
        s = x * inv_he                                              # (1, L)

        # ---- top-k delay selection (first index on ties) + softmax ----
        # Scatter the selected values into *delay* space (d = (L - j) % L).
        work = s
        sel_mask = jnp.zeros((1, L), jnp.bool_)
        sel_vals = jnp.zeros((1, L), jnp.float32)
        for _ in range(top_k):                                      # k ~ log(L)
            mx = jnp.max(work, axis=1, keepdims=True)
            is_max = work == mx
            jidx = jnp.min(jnp.where(is_max, lane, L), axis=1, keepdims=True)
            first = lane == jidx
            didx = jnp.where(jidx == 0, 0, L - jidx)                # delay index
            dhot = lane == didx
            sel_mask = jnp.logical_or(sel_mask, dhot)
            sel_vals = sel_vals + jnp.where(dhot, mx, 0.0)
            work = jnp.where(first, NEG, work)

        sel = jnp.where(sel_mask, sel_vals, NEG)
        smax = jnp.max(sel, axis=1, keepdims=True)
        ew = jnp.where(sel_mask, jnp.exp(sel - smax), 0.0)
        wts = ew / jnp.sum(ew, axis=1, keepdims=True)               # (1, L) by delay

        # ---- time-delay aggregation: agg[t] = sum_d wts[d] * v[(t + d) % L] ----
        # Circulant E[t, u] = wts[(u - t) % L] built with log2(L) doublings,
        # then one MXU matmul (value path -> default fast precision).
        E = wts
        rows = 1
        while rows < L:
            E = jnp.concatenate([E, jnp.roll(E, rows, axis=1)], axis=0)
            rows *= 2
        if E.shape[0] != L:
            E = E[:L, :]
        agg = jnp.dot(E, v, preferred_element_type=jnp.float32)     # (L, HE)

        # ---- fused output projection (MXU), lane-dense over d_model ----
        y = jnp.dot(agg, wo, preferred_element_type=jnp.float32) + bo  # (L, DM)
        o_ref[:, g, :] = y.astype(o_ref.dtype)


def _choose_group_size(V, L, S, DM, max_block_bytes=2 * 1024 * 1024):
    """Vertices per grid step.

    Must divide V and be either V itself or a multiple of 8 (Mosaic's
    second-minor block constraint).  If V has no multiple-of-8 divisor and is
    too large for VMEM, pad V to a multiple of 8 at the call site.
    """
    per_vertex = (2 * L + 2 * S) * DM * 4       # q + k + v + out blocks
    if V * per_vertex <= max_block_bytes:
        return V
    fitting = [g for g in range(8, V, 8)
               if V % g == 0 and g * per_vertex <= max_block_bytes]
    return max(fitting) if fitting else V


# ------------------------------- Full layer (wrapper) -------------------------------

def auto_correlation_layer(queries, keys, values, params, n_heads, factor=1):
    """queries: (B, L, V, d_model), keys/values: (B, S, V, d_model)."""
    # n_heads only affects parameter shapes: the correlation math averages over
    # heads*channels, so the head split never needs to be materialized.
    B, L, V, d_model = queries.shape
    S = keys.shape[1]
    if S > L:                          # reference truncates; row-wise ops commute
        keys = keys[:, :L]
        values = values[:, :L]
        S = L
    # (If S < L the *projected* k/v are zero-padded inside the kernel, matching
    #  the reference, since projecting zero rows would otherwise add the bias.)
    HE = params["wq"].shape[1]

    G = _choose_group_size(V, L, S, max(d_model, HE))
    num_vg = V // G
    top_k = max(1, min(L, int(factor * math.log(L))))

    q_spec = pl.BlockSpec((None, L, G, d_model), lambda b, vg: (b, 0, vg, 0))
    kv_spec = pl.BlockSpec((None, S, G, d_model), lambda b, vg: (b, 0, vg, 0))
    o_spec = pl.BlockSpec((None, L, G, d_model), lambda b, vg: (b, 0, vg, 0))

    def wspec(shape):
        # Constant index map -> the weight tile is DMA'd into VMEM once and
        # stays resident across the whole grid.
        return pl.BlockSpec(shape, lambda b, vg: (0, 0))

    out = pl.pallas_call(
        functools.partial(_fused_layer_kernel, top_k=top_k),
        out_shape=jax.ShapeDtypeStruct((B, L, V, d_model), jnp.float32),
        grid=(B, num_vg),
        in_specs=[q_spec, kv_spec, kv_spec,
                  wspec((d_model, HE)), wspec((1, HE)),
                  wspec((d_model, HE)), wspec((1, HE)),
                  wspec((d_model, HE)), wspec((1, HE)),
                  wspec((HE, d_model)), wspec((1, d_model))],
        out_specs=o_spec,
        compiler_params=pltpu.CompilerParams(
            dimension_semantics=("parallel", "parallel"),
            vmem_limit_bytes=_VMEM_LIMIT),
    )(queries, keys, values,
      params["wq"], params["bq"].reshape(1, -1),
      params["wk"], params["bk"].reshape(1, -1),
      params["wv"], params["bv"].reshape(1, -1),
      params["wo"], params["bo"].reshape(1, -1))
    return out


def init_params(key, d_model, n_heads):
    d_keys = d_model // n_heads
    d_values = d_model // n_heads

    def init_linear(k, din, dout):
        kw, kb = jax.random.split(k)
        bound = 1.0 / math.sqrt(din)
        w = jax.random.uniform(kw, (din, dout), jnp.float32, -bound, bound)
        b = jax.random.uniform(kb, (dout,), jnp.float32, -bound, bound)
        return w, b

    kq, kk, kv, ko = jax.random.split(key, 4)
    wq, bq = init_linear(kq, d_model, d_keys * n_heads)
    wk, bk = init_linear(kk, d_model, d_keys * n_heads)
    wv, bv = init_linear(kv, d_model, d_values * n_heads)
    wo, bo = init_linear(ko, d_values * n_heads, d_model)
    return dict(wq=wq, bq=bq, wk=wk, bk=bk, wv=wv, bv=bv, wo=wo, bo=bo)


# --------------------------- Pure-JAX reference (checking) --------------------------

def ref_layer(queries, keys, values, params, n_heads, factor=1):
    B, L, V, dm = queries.shape
    S = keys.shape[1]
    H = n_heads
    hp = jax.lax.Precision.HIGHEST

    def proj(x, w, b):
        y = jnp.dot(x.reshape(-1, x.shape[-1]), w, precision=hp) + b
        return y.reshape(x.shape[0], x.shape[1], V, H, -1)

    q = proj(queries, params["wq"], params["bq"])
    k = proj(keys, params["wk"], params["bk"])
    v = proj(values, params["wv"], params["bv"])
    E = q.shape[-1]
    if L > S:
        pad = jnp.zeros((B, L - S, V, H, E), q.dtype)
        k = jnp.concatenate([k, pad], axis=1)
        v = jnp.concatenate([v, pad], axis=1)
    else:
        k = k[:, :L]
        v = v[:, :L]

    corr = jnp.stack(
        [jnp.mean(jnp.sum(jnp.roll(q, -tau, axis=1) * k, axis=1), axis=(-2, -1))
         for tau in range(L)], axis=-1)                              # (B, V, L)
    top_k = max(1, min(L, int(factor * math.log(L))))
    weights, delay = jax.lax.top_k(corr, top_k)                      # (B, V, k)
    tmp = jax.nn.softmax(weights, axis=-1)

    t_idx = jnp.arange(L)
    agg = jnp.zeros_like(v)
    for i in range(top_k):
        idx = (t_idx[None, :, None] + delay[:, None, :, i]) % L      # (B, L, V)
        idx_full = jnp.broadcast_to(idx[..., None, None], v.shape)
        gathered = jnp.take_along_axis(v, idx_full, axis=1)
        agg = agg + gathered * tmp[:, None, :, None, None, i]

    out = agg.reshape(B, L, V, H * E)
    out = (jnp.dot(out.reshape(-1, H * E), params["wo"], precision=hp)
           + params["bo"]).reshape(B, L, V, dm)
    return out


# ----------------------------------------- main -------------------------------------

if __name__ == "__main__":
    B, L, S, V, d_model, n_heads = 2, 8, 8, 4, 32, 4

    key = jax.random.PRNGKey(0)
    kq, kk, kv, kp = jax.random.split(key, 4)
    queries = jax.random.normal(kq, (B, L, V, d_model), jnp.float32)
    keys_in = jax.random.normal(kk, (B, S, V, d_model), jnp.float32)
    values_in = jax.random.normal(kv, (B, S, V, d_model), jnp.float32)
    params = init_params(kp, d_model, n_heads)

    out = auto_correlation_layer(queries, keys_in, values_in, params, n_heads)
    out = jax.block_until_ready(out)
    assert out.shape == (B, L, V, d_model)

    ref = jax.block_until_ready(ref_layer(queries, keys_in, values_in, params, n_heads))
    # Value-path matmuls run at default (fast) MXU precision -> allow ~1e-3 abs error.
    np.testing.assert_allclose(np.asarray(out), np.asarray(ref), rtol=2e-2, atol=1e-2)

    print("KERNEL_OK")
</pallas_src>

<mosaic_0001>
module attributes {stable_mosaic.version = 11 : i64} {
  func.func @_fused_layer_kernel(%arg0: i32, %arg1: i32, %arg2: memref<1x8x4x32xf32, #tpu.memory_space<vmem>>, %arg3: memref<1x8x4x32xf32, #tpu.memory_space<vmem>>, %arg4: memref<1x8x4x32xf32, #tpu.memory_space<vmem>>, %arg5: memref<32x32xf32, #tpu.memory_space<vmem>>, %arg6: memref<1x32xf32, #tpu.memory_space<vmem>>, %arg7: memref<32x32xf32, #tpu.memory_space<vmem>>, %arg8: memref<1x32xf32, #tpu.memory_space<vmem>>, %arg9: memref<32x32xf32, #tpu.memory_space<vmem>>, %arg10: memref<1x32xf32, #tpu.memory_space<vmem>>, %arg11: memref<32x32xf32, #tpu.memory_space<vmem>>, %arg12: memref<1x32xf32, #tpu.memory_space<vmem>>, %arg13: memref<1x8x4x32xf32, #tpu.memory_space<vmem>>) attributes {dimension_semantics = [#tpu.dimension_semantics<parallel>, #tpu.dimension_semantics<parallel>], iteration_bounds = array<i64: 2, 1>, scalar_prefetch = 0 : i64, scratch_operands = 0 : i64, tpu.core_type = #tpu.core_type<tc>, window_params = [{transform_indices = @transform_0, window_bounds = array<i64: 1, 8, 4, 32>}, {transform_indices = @transform_1, window_bounds = array<i64: 1, 8, 4, 32>}, {transform_indices = @transform_2, window_bounds = array<i64: 1, 8, 4, 32>}, {pipeline_mode = #tpu.pipeline_mode<synchronous>, transform_indices = @transform_3, window_bounds = array<i64: 32, 32>}, {pipeline_mode = #tpu.pipeline_mode<synchronous>, transform_indices = @transform_4, window_bounds = array<i64: 1, 32>}, {pipeline_mode = #tpu.pipeline_mode<synchronous>, transform_indices = @transform_5, window_bounds = array<i64: 32, 32>}, {pipeline_mode = #tpu.pipeline_mode<synchronous>, transform_indices = @transform_6, window_bounds = array<i64: 1, 32>}, {pipeline_mode = #tpu.pipeline_mode<synchronous>, transform_indices = @transform_7, window_bounds = array<i64: 32, 32>}, {pipeline_mode = #tpu.pipeline_mode<synchronous>, transform_indices = @transform_8, window_bounds = array<i64: 1, 32>}, {pipeline_mode = #tpu.pipeline_mode<synchronous>, transform_indices = @transform_9, window_bounds = array<i64: 32, 32>}, {pipeline_mode = #tpu.pipeline_mode<synchronous>, transform_indices = @transform_10, window_bounds = array<i64: 1, 32>}, {transform_indices = @transform_11, window_bounds = array<i64: 1, 8, 4, 32>}]} {
    %0 = tpu.iota {dimensions = array<i32: 1>} : vector<1x8xi32>
    %c0 = arith.constant 0 : index
    %c0_0 = arith.constant 0 : index
    %c0_1 = arith.constant 0 : index
    %c0_2 = arith.constant 0 : index
    %1 = vector.load %arg2[%c0, %c0_0, %c0_1, %c0_2] : memref<1x8x4x32xf32, #tpu.memory_space<vmem>>, vector<1x8x4x32xf32>
    %2 = vector.shape_cast %1 : vector<1x8x4x32xf32> to vector<8x4x32xf32>
    %c0_3 = arith.constant 0 : index
    %c0_4 = arith.constant 0 : index
    %c0_5 = arith.constant 0 : index
    %c0_6 = arith.constant 0 : index
    %3 = vector.load %arg3[%c0_3, %c0_4, %c0_5, %c0_6] : memref<1x8x4x32xf32, #tpu.memory_space<vmem>>, vector<1x8x4x32xf32>
    %4 = vector.shape_cast %3 : vector<1x8x4x32xf32> to vector<8x4x32xf32>
    %c0_7 = arith.constant 0 : index
    %c0_8 = arith.constant 0 : index
    %c0_9 = arith.constant 0 : index
    %c0_10 = arith.constant 0 : index
    %5 = vector.load %arg4[%c0_7, %c0_8, %c0_9, %c0_10] : memref<1x8x4x32xf32, #tpu.memory_space<vmem>>, vector<1x8x4x32xf32>
    %6 = vector.shape_cast %5 : vector<1x8x4x32xf32> to vector<8x4x32xf32>
    %c0_11 = arith.constant 0 : index
    %c0_12 = arith.constant 0 : index
    %7 = vector.load %arg5[%c0_11, %c0_12] : memref<32x32xf32, #tpu.memory_space<vmem>>, vector<32x32xf32>
    %c0_13 = arith.constant 0 : index
    %c0_14 = arith.constant 0 : index
    %8 = vector.load %arg6[%c0_13, %c0_14] : memref<1x32xf32, #tpu.memory_space<vmem>>, vector<1x32xf32>
    %c0_15 = arith.constant 0 : index
    %c0_16 = arith.constant 0 : index
    %9 = vector.load %arg7[%c0_15, %c0_16] : memref<32x32xf32, #tpu.memory_space<vmem>>, vector<32x32xf32>
    %c0_17 = arith.constant 0 : index
    %c0_18 = arith.constant 0 : index
    %10 = vector.load %arg8[%c0_17, %c0_18] : memref<1x32xf32, #tpu.memory_space<vmem>>, vector<1x32xf32>
    %c0_19 = arith.constant 0 : index
    %c0_20 = arith.constant 0 : index
    %11 = vector.load %arg9[%c0_19, %c0_20] : memref<32x32xf32, #tpu.memory_space<vmem>>, vector<32x32xf32>
    %c0_21 = arith.constant 0 : index
    %c0_22 = arith.constant 0 : index
    %12 = vector.load %arg10[%c0_21, %c0_22] : memref<1x32xf32, #tpu.memory_space<vmem>>, vector<1x32xf32>
    %c0_23 = arith.constant 0 : index
    %c0_24 = arith.constant 0 : index
    %13 = vector.load %arg11[%c0_23, %c0_24] : memref<32x32xf32, #tpu.memory_space<vmem>>, vector<32x32xf32>
    %c0_25 = arith.constant 0 : index
    %c0_26 = arith.constant 0 : index
    %14 = vector.load %arg12[%c0_25, %c0_26] : memref<1x32xf32, #tpu.memory_space<vmem>>, vector<1x32xf32>
    %15 = vector.extract_strided_slice %2 {offsets = [0, 0, 0], sizes = [8, 1, 32], strides = [1, 1, 1]} : vector<8x4x32xf32> to vector<8x1x32xf32>
    %16 = vector.shape_cast %15 : vector<8x1x32xf32> to vector<8x32xf32>
    %cst = arith.constant dense<0.000000e+00> : vector<8x32xf32>
    %17 = tpu.matmul %16, %7, %cst {dimension_numbers = #tpu.dot_dimension_numbers<[1], [0], [0], [1], [0, 0, 1, 1], [], []>, precision = #tpu.contract_precision<fp32>} : vector<8x32xf32>, vector<32x32xf32>, vector<8x32xf32> -> vector<8x32xf32>
    %18 = vector.broadcast %8 : vector<1x32xf32> to vector<8x32xf32>
    %19 = arith.addf %17, %18 : vector<8x32xf32>
    %20 = vector.extract_strided_slice %4 {offsets = [0, 0, 0], sizes = [8, 1, 32], strides = [1, 1, 1]} : vector<8x4x32xf32> to vector<8x1x32xf32>
    %21 = vector.shape_cast %20 : vector<8x1x32xf32> to vector<8x32xf32>
    %cst_27 = arith.constant dense<0.000000e+00> : vector<8x32xf32>
    %22 = tpu.matmul %21, %9, %cst_27 {dimension_numbers = #tpu.dot_dimension_numbers<[1], [0], [0], [1], [0, 0, 1, 1], [], []>, precision = #tpu.contract_precision<fp32>} : vector<8x32xf32>, vector<32x32xf32>, vector<8x32xf32> -> vector<8x32xf32>
    %23 = vector.broadcast %10 : vector<1x32xf32> to vector<8x32xf32>
    %24 = arith.addf %22, %23 : vector<8x32xf32>
    %25 = vector.extract_strided_slice %6 {offsets = [0, 0, 0], sizes = [8, 1, 32], strides = [1, 1, 1]} : vector<8x4x32xf32> to vector<8x1x32xf32>
    %26 = vector.shape_cast %25 : vector<8x1x32xf32> to vector<8x32xf32>
    %cst_28 = arith.constant dense<0.000000e+00> : vector<8x32xf32>
    %27 = tpu.matmul %26, %11, %cst_28 {dimension_numbers = #tpu.dot_dimension_numbers<[1], [0], [0], [1], [0, 0, 1, 1], [], []>} : vector<8x32xf32>, vector<32x32xf32>, vector<8x32xf32> -> vector<8x32xf32>
    %28 = vector.broadcast %12 : vector<1x32xf32> to vector<8x32xf32>
    %29 = arith.addf %27, %28 : vector<8x32xf32>
    %30 = tpu.transpose %24, [1, 0] : vector<8x32xf32> -> vector<32x8xf32>
    %cst_29 = arith.constant dense<0.000000e+00> : vector<8x8xf32>
    %31 = tpu.matmul %19, %30, %cst_29 {dimension_numbers = #tpu.dot_dimension_numbers<[1], [0], [0], [1], [0, 0, 1, 1], [], []>, precision = #tpu.contract_precision<fp32>} : vector<8x32xf32>, vector<32x8xf32>, vector<8x8xf32> -> vector<8x8xf32>
    %32 = vector.extract_strided_slice %31 {offsets = [0, 0], sizes = [4, 8], strides = [1, 1]} : vector<8x8xf32> to vector<4x8xf32>
    %33 = vector.extract_strided_slice %31 {offsets = [4, 0], sizes = [4, 8], strides = [1, 1]} : vector<8x8xf32> to vector<4x8xf32>
    %34 = vector.extract_strided_slice %33 {offsets = [0, 4], sizes = [4, 4], strides = [1, 1]} : vector<4x8xf32> to vector<4x4xf32>
    %35 = vector.extract_strided_slice %33 {offsets = [0, 0], sizes = [4, 4], strides = [1, 1]} : vector<4x8xf32> to vector<4x4xf32>
    %36 = tpu.concatenate %34, %35 in 1 : vector<4x4xf32>, vector<4x4xf32> -> vector<4x8xf32>
    %37 = arith.addf %32, %36 : vector<4x8xf32>
    %38 = vector.extract_strided_slice %37 {offsets = [0, 0], sizes = [2, 8], strides = [1, 1]} : vector<4x8xf32> to vector<2x8xf32>
    %39 = vector.extract_strided_slice %37 {offsets = [2, 0], sizes = [2, 8], strides = [1, 1]} : vector<4x8xf32> to vector<2x8xf32>
    %40 = vector.extract_strided_slice %39 {offsets = [0, 2], sizes = [2, 6], strides = [1, 1]} : vector<2x8xf32> to vector<2x6xf32>
    %41 = vector.extract_strided_slice %39 {offsets = [0, 0], sizes = [2, 2], strides = [1, 1]} : vector<2x8xf32> to vector<2x2xf32>
    %42 = tpu.concatenate %40, %41 in 1 : vector<2x6xf32>, vector<2x2xf32> -> vector<2x8xf32>
    %43 = arith.addf %38, %42 : vector<2x8xf32>
    %44 = vector.extract_strided_slice %43 {offsets = [0, 0], sizes = [1, 8], strides = [1, 1]} : vector<2x8xf32> to vector<1x8xf32>
    %45 = vector.extract_strided_slice %43 {offsets = [1, 0], sizes = [1, 8], strides = [1, 1]} : vector<2x8xf32> to vector<1x8xf32>
    %46 = vector.extract_strided_slice %45 {offsets = [0, 1], sizes = [1, 7], strides = [1, 1]} : vector<1x8xf32> to vector<1x7xf32>
    %47 = vector.extract_strided_slice %45 {offsets = [0, 0], sizes = [1, 1], strides = [1, 1]} : vector<1x8xf32> to vector<1x1xf32>
    %48 = tpu.concatenate %46, %47 in 1 : vector<1x7xf32>, vector<1x1xf32> -> vector<1x8xf32>
    %49 = arith.addf %44, %48 : vector<1x8xf32>
    %cst_30 = arith.constant 3.125000e-02 : f32
    %50 = vector.broadcast %cst_30 : f32 to vector<1x8xf32>
    %51 = arith.mulf %49, %50 : vector<1x8xf32>
    %false = arith.constant false
    %52 = vector.broadcast %false : i1 to vector<1x8xi1>
    %cst_31 = arith.constant 0.000000e+00 : f32
    %53 = vector.broadcast %cst_31 : f32 to vector<1x8xf32>
    %cst_32 = arith.constant dense<0xFF800000> : vector<1xf32>
    %54 = vector.multi_reduction <maximumf>, %51, %cst_32 [1] : vector<1x8xf32> to vector<1xf32>
    %55 = vector.shape_cast %54 : vector<1xf32> to vector<1x1xf32>
    %56 = vector.broadcast %55 : vector<1x1xf32> to vector<1x8xf32>
    %57 = arith.cmpf oeq, %51, %56 : vector<1x8xf32>
    %c8_i32 = arith.constant 8 : i32
    %58 = vector.broadcast %c8_i32 : i32 to vector<1x8xi32>
    %59 = arith.select %57, %0, %58 : vector<1x8xi1>, vector<1x8xi32>
    %cst_33 = arith.constant dense<2147483647> : vector<1xi32>
    %60 = vector.multi_reduction <minsi>, %59, %cst_33 [1] : vector<1x8xi32> to vector<1xi32>
    %61 = vector.shape_cast %60 : vector<1xi32> to vector<1x1xi32>
    %62 = vector.broadcast %61 : vector<1x1xi32> to vector<1x8xi32>
    %63 = arith.cmpi eq, %0, %62 : vector<1x8xi32>
    %c0_i32 = arith.constant 0 : i32
    %64 = vector.broadcast %c0_i32 : i32 to vector<1x1xi32>
    %65 = arith.cmpi eq, %61, %64 : vector<1x1xi32>
    %c8_i32_34 = arith.constant 8 : i32
    %66 = vector.broadcast %c8_i32_34 : i32 to vector<1x1xi32>
    %67 = arith.subi %66, %61 : vector<1x1xi32>
    %c0_i32_35 = arith.constant 0 : i32
    %68 = vector.broadcast %c0_i32_35 : i32 to vector<1x1xi32>
    %69 = arith.select %65, %68, %67 : vector<1x1xi1>, vector<1x1xi32>
    %70 = vector.broadcast %69 : vector<1x1xi32> to vector<1x8xi32>
    %71 = arith.cmpi eq, %0, %70 : vector<1x8xi32>
    %72 = arith.ori %52, %71 : vector<1x8xi1>
    %cst_36 = arith.constant 0.000000e+00 : f32
    %73 = vector.shape_cast %55 : vector<1x1xf32> to vector<1x1xf32>
    %74 = vector.broadcast %73 : vector<1x1xf32> to vector<1x8xf32>
    %75 = vector.broadcast %cst_36 : f32 to vector<1x8xf32>
    %76 = arith.select %71, %74, %75 : vector<1x8xi1>, vector<1x8xf32>
    %77 = arith.addf %53, %76 : vector<1x8xf32>
    %cst_37 = arith.constant -1.000000e+30 : f32
    %78 = vector.broadcast %cst_37 : f32 to vector<1x8xf32>
    %79 = arith.select %63, %78, %51 : vector<1x8xi1>, vector<1x8xf32>
    %cst_38 = arith.constant dense<0xFF800000> : vector<1xf32>
    %80 = vector.multi_reduction <maximumf>, %79, %cst_38 [1] : vector<1x8xf32> to vector<1xf32>
    %81 = vector.shape_cast %80 : vector<1xf32> to vector<1x1xf32>
    %82 = vector.broadcast %81 : vector<1x1xf32> to vector<1x8xf32>
    %83 = arith.cmpf oeq, %79, %82 : vector<1x8xf32>
    %c8_i32_39 = arith.constant 8 : i32
    %84 = vector.broadcast %c8_i32_39 : i32 to vector<1x8xi32>
    %85 = arith.select %83, %0, %84 : vector<1x8xi1>, vector<1x8xi32>
    %cst_40 = arith.constant dense<2147483647> : vector<1xi32>
    %86 = vector.multi_reduction <minsi>, %85, %cst_40 [1] : vector<1x8xi32> to vector<1xi32>
    %87 = vector.shape_cast %86 : vector<1xi32> to vector<1x1xi32>
    %c0_i32_41 = arith.constant 0 : i32
    %88 = vector.broadcast %c0_i32_41 : i32 to vector<1x1xi32>
    %89 = arith.cmpi eq, %87, %88 : vector<1x1xi32>
    %c8_i32_42 = arith.constant 8 : i32
    %90 = vector.broadcast %c8_i32_42 : i32 to vector<1x1xi32>
    %91 = arith.subi %90, %87 : vector<1x1xi32>
    %c0_i32_43 = arith.constant 0 : i32
    %92 = vector.broadcast %c0_i32_43 : i32 to vector<1x1xi32>
    %93 = arith.select %89, %92, %91 : vector<1x1xi1>, vector<1x1xi32>
    %94 = vector.broadcast %93 : vector<1x1xi32> to vector<1x8xi32>
    %95 = arith.cmpi eq, %0, %94 : vector<1x8xi32>
    %96 = arith.ori %72, %95 : vector<1x8xi1>
    %cst_44 = arith.constant 0.000000e+00 : f32
    %97 = vector.shape_cast %81 : vector<1x1xf32> to vector<1x1xf32>
    %98 = vector.broadcast %97 : vector<1x1xf32> to vector<1x8xf32>
    %99 = vector.broadcast %cst_44 : f32 to vector<1x8xf32>
    %100 = arith.select %95, %98, %99 : vector<1x8xi1>, vector<1x8xf32>
    %101 = arith.addf %77, %100 : vector<1x8xf32>
    %cst_45 = arith.constant -1.000000e+30 : f32
    %102 = vector.broadcast %cst_45 : f32 to vector<1x8xf32>
    %103 = arith.select %96, %101, %102 : vector<1x8xi1>, vector<1x8xf32>
    %cst_46 = arith.constant dense<0xFF800000> : vector<1xf32>
    %104 = vector.multi_reduction <maximumf>, %103, %cst_46 [1] : vector<1x8xf32> to vector<1xf32>
    %105 = vector.shape_cast %104 : vector<1xf32> to vector<1x1xf32>
    %106 = vector.broadcast %105 : vector<1x1xf32> to vector<1x8xf32>
    %107 = arith.subf %103, %106 : vector<1x8xf32>
    %108 = math.exp %107 : vector<1x8xf32>
    %cst_47 = arith.constant 0.000000e+00 : f32
    %109 = vector.broadcast %cst_47 : f32 to vector<1x8xf32>
    %110 = arith.select %96, %108, %109 : vector<1x8xi1>, vector<1x8xf32>
    %cst_48 = arith.constant dense<0.000000e+00> : vector<1xf32>
    %111 = vector.multi_reduction <add>, %110, %cst_48 [1] : vector<1x8xf32> to vector<1xf32>
    %112 = vector.shape_cast %111 : vector<1xf32> to vector<1x1xf32>
    %113 = vector.broadcast %112 : vector<1x1xf32> to vector<1x8xf32>
    %114 = arith.divf %110, %113 : vector<1x8xf32>
    %115 = vector.extract_strided_slice %114 {offsets = [0, 7], sizes = [1, 1], strides = [1, 1]} : vector<1x8xf32> to vector<1x1xf32>
    %116 = vector.extract_strided_slice %114 {offsets = [0, 0], sizes = [1, 7], strides = [1, 1]} : vector<1x8xf32> to vector<1x7xf32>
    %117 = tpu.concatenate %115, %116 in 1 : vector<1x1xf32>, vector<1x7xf32> -> vector<1x8xf32>
    %118 = tpu.concatenate %114, %117 in 0 : vector<1x8xf32>, vector<1x8xf32> -> vector<2x8xf32>
    %119 = vector.extract_strided_slice %118 {offsets = [0, 6], sizes = [2, 2], strides = [1, 1]} : vector<2x8xf32> to vector<2x2xf32>
    %120 = vector.extract_strided_slice %118 {offsets = [0, 0], sizes = [2, 6], strides = [1, 1]} : vector<2x8xf32> to vector<2x6xf32>
    %121 = tpu.concatenate %119, %120 in 1 : vector<2x2xf32>, vector<2x6xf32> -> vector<2x8xf32>
    %122 = tpu.concatenate %118, %121 in 0 : vector<2x8xf32>, vector<2x8xf32> -> vector<4x8xf32>
    %123 = vector.extract_strided_slice %122 {offsets = [0, 4], sizes = [4, 4], strides = [1, 1]} : vector<4x8xf32> to vector<4x4xf32>
    %124 = vector.extract_strided_slice %122 {offsets = [0, 0], sizes = [4, 4], strides = [1, 1]} : vector<4x8xf32> to vector<4x4xf32>
    %125 = tpu.concatenate %123, %124 in 1 : vector<4x4xf32>, vector<4x4xf32> -> vector<4x8xf32>
    %126 = tpu.concatenate %122, %125 in 0 : vector<4x8xf32>, vector<4x8xf32> -> vector<8x8xf32>
    %cst_49 = arith.constant dense<0.000000e+00> : vector<8x32xf32>
    %127 = tpu.matmul %126, %29, %cst_49 {dimension_numbers = #tpu.dot_dimension_numbers<[1], [0], [0], [1], [0, 0, 1, 1], [], []>} : vector<8x8xf32>, vector<8x32xf32>, vector<8x32xf32> -> vector<8x32xf32>
    %cst_50 = arith.constant dense<0.000000e+00> : vector<8x32xf32>
    %128 = tpu.matmul %127, %13, %cst_50 {dimension_numbers = #tpu.dot_dimension_numbers<[1], [0], [0], [1], [0, 0, 1, 1], [], []>} : vector<8x32xf32>, vector<32x32xf32>, vector<8x32xf32> -> vector<8x32xf32>
    %129 = vector.broadcast %14 : vector<1x32xf32> to vector<8x32xf32>
    %130 = arith.addf %128, %129 : vector<8x32xf32>
    %c0_51 = arith.constant 0 : index
    %c0_52 = arith.constant 0 : index
    %c0_53 = arith.constant 0 : index
    %c0_54 = arith.constant 0 : index
    %131 = vector.load %arg13[%c0_51, %c0_52, %c0_53, %c0_54] : memref<1x8x4x32xf32, #tpu.memory_space<vmem>>, vector<1x8x1x32xf32>
    %132 = vector.shape_cast %131 : vector<1x8x1x32xf32> to vector<8x32xf32>
    %133 = vector.shape_cast %130 : vector<8x32xf32> to vector<1x8x1x32xf32>
    tpu.vector_store %arg13[%c0_51, %c0_52, %c0_53, %c0_54], %133 {strides = array<i32>} : memref<1x8x4x32xf32, #tpu.memory_space<vmem>>, vector<1x8x1x32xf32>,
    %134 = vector.extract_strided_slice %2 {offsets = [0, 1, 0], sizes = [8, 1, 32], strides = [1, 1, 1]} : vector<8x4x32xf32> to vector<8x1x32xf32>
    %135 = vector.shape_cast %134 : vector<8x1x32xf32> to vector<8x32xf32>
    %cst_55 = arith.constant dense<0.000000e+00> : vector<8x32xf32>
    %136 = tpu.matmul %135, %7, %cst_55 {dimension_numbers = #tpu.dot_dimension_numbers<[1], [0], [0], [1], [0, 0, 1, 1], [], []>, precision = #tpu.contract_precision<fp32>} : vector<8x32xf32>, vector<32x32xf32>, vector<8x32xf32> -> vector<8x32xf32>
    %137 = vector.broadcast %8 : vector<1x32xf32> to vector<8x32xf32>
    %138 = arith.addf %136, %137 : vector<8x32xf32>
    %139 = vector.extract_strided_slice %4 {offsets = [0, 1, 0], sizes = [8, 1, 32], strides = [1, 1, 1]} : vector<8x4x32xf32> to vector<8x1x32xf32>
    %140 = vector.shape_cast %139 : vector<8x1x32xf32> to vector<8x32xf32>
    %cst_56 = arith.constant dense<0.000000e+00> : vector<8x32xf32>
    %141 = tpu.matmul %140, %9, %cst_56 {dimension_numbers = #tpu.dot_dimension_numbers<[1], [0], [0], [1], [0, 0, 1, 1], [], []>, precision = #tpu.contract_precision<fp32>} : vector<8x32xf32>, vector<32x32xf32>, vector<8x32xf32> -> vector<8x32xf32>
    %142 = vector.broadcast %10 : vector<1x32xf32> to vector<8x32xf32>
    %143 = arith.addf %141, %142 : vector<8x32xf32>
    %144 = vector.extract_strided_slice %6 {offsets = [0, 1, 0], sizes = [8, 1, 32], strides = [1, 1, 1]} : vector<8x4x32xf32> to vector<8x1x32xf32>
    %145 = vector.shape_cast %144 : vector<8x1x32xf32> to vector<8x32xf32>
    %cst_57 = arith.constant dense<0.000000e+00> : vector<8x32xf32>
    %146 = tpu.matmul %145, %11, %cst_57 {dimension_numbers = #tpu.dot_dimension_numbers<[1], [0], [0], [1], [0, 0, 1, 1], [], []>} : vector<8x32xf32>, vector<32x32xf32>, vector<8x32xf32> -> vector<8x32xf32>
    %147 = vector.broadcast %12 : vector<1x32xf32> to vector<8x32xf32>
    %148 = arith.addf %146, %147 : vector<8x32xf32>
    %149 = tpu.transpose %143, [1, 0] : vector<8x32xf32> -> vector<32x8xf32>
    %cst_58 = arith.constant dense<0.000000e+00> : vector<8x8xf32>
    %150 = tpu.matmul %138, %149, %cst_58 {dimension_numbers = #tpu.dot_dimension_numbers<[1], [0], [0], [1], [0, 0, 1, 1], [], []>, precision = #tpu.contract_precision<fp32>} : vector<8x32xf32>, vector<32x8xf32>, vector<8x8xf32> -> vector<8x8xf32>
    %151 = vector.extract_strided_slice %150 {offsets = [0, 0], sizes = [4, 8], strides = [1, 1]} : vector<8x8xf32> to vector<4x8xf32>
    %152 = vector.extract_strided_slice %150 {offsets = [4, 0], sizes = [4, 8], strides = [1, 1]} : vector<8x8xf32> to vector<4x8xf32>
    %153 = vector.extract_strided_slice %152 {offsets = [0, 4], sizes = [4, 4], strides = [1, 1]} : vector<4x8xf32> to vector<4x4xf32>
    %154 = vector.extract_strided_slice %152 {offsets = [0, 0], sizes = [4, 4], strides = [1, 1]} : vector<4x8xf32> to vector<4x4xf32>
    %155 = tpu.concatenate %153, %154 in 1 : vector<4x4xf32>, vector<4x4xf32> -> vector<4x8xf32>
    %156 = arith.addf %151, %155 : vector<4x8xf32>
    %157 = vector.extract_strided_slice %156 {offsets = [0, 0], sizes = [2, 8], strides = [1, 1]} : vector<4x8xf32> to vector<2x8xf32>
    %158 = vector.extract_strided_slice %156 {offsets = [2, 0], sizes = [2, 8], strides = [1, 1]} : vector<4x8xf32> to vector<2x8xf32>
    %159 = vector.extract_strided_slice %158 {offsets = [0, 2], sizes = [2, 6], strides = [1, 1]} : vector<2x8xf32> to vector<2x6xf32>
    %160 = vector.extract_strided_slice %158 {offsets = [0, 0], sizes = [2, 2], strides = [1, 1]} : vector<2x8xf32> to vector<2x2xf32>
    %161 = tpu.concatenate %159, %160 in 1 : vector<2x6xf32>, vector<2x2xf32> -> vector<2x8xf32>
    %162 = arith.addf %157, %161 : vector<2x8xf32>
    %163 = vector.extract_strided_slice %162 {offsets = [0, 0], sizes = [1, 8], strides = [1, 1]} : vector<2x8xf32> to vector<1x8xf32>
    %164 = vector.extract_strided_slice %162 {offsets = [1, 0], sizes = [1, 8], strides = [1, 1]} : vector<2x8xf32> to vector<1x8xf32>
    %165 = vector.extract_strided_slice %164 {offsets = [0, 1], sizes = [1, 7], strides = [1, 1]} : vector<1x8xf32> to vector<1x7xf32>
    %166 = vector.extract_strided_slice %164 {offsets = [0, 0], sizes = [1, 1], strides = [1, 1]} : vector<1x8xf32> to vector<1x1xf32>
    %167 = tpu.concatenate %165, %166 in 1 : vector<1x7xf32>, vector<1x1xf32> -> vector<1x8xf32>
    %168 = arith.addf %163, %167 : vector<1x8xf32>
    %cst_59 = arith.constant 3.125000e-02 : f32
    %169 = vector.broadcast %cst_59 : f32 to vector<1x8xf32>
    %170 = arith.mulf %168, %169 : vector<1x8xf32>
    %false_60 = arith.constant false
    %171 = vector.broadcast %false_60 : i1 to vector<1x8xi1>
    %cst_61 = arith.constant 0.000000e+00 : f32
    %172 = vector.broadcast %cst_61 : f32 to vector<1x8xf32>
    %cst_62 = arith.constant dense<0xFF800000> : vector<1xf32>
    %173 = vector.multi_reduction <maximumf>, %170, %cst_62 [1] : vector<1x8xf32> to vector<1xf32>
    %174 = vector.shape_cast %173 : vector<1xf32> to vector<1x1xf32>
    %175 = vector.broadcast %174 : vector<1x1xf32> to vector<1x8xf32>
    %176 = arith.cmpf oeq, %170, %175 : vector<1x8xf32>
    %c8_i32_63 = arith.constant 8 : i32
    %177 = vector.broadcast %c8_i32_63 : i32 to vector<1x8xi32>
    %178 = arith.select %176, %0, %177 : vector<1x8xi1>, vector<1x8xi32>
    %cst_64 = arith.constant dense<2147483647> : vector<1xi32>
    %179 = vector.multi_reduction <minsi>, %178, %cst_64 [1] : vector<1x8xi32> to vector<1xi32>
    %180 = vector.shape_cast %179 : vector<1xi32> to vector<1x1xi32>
    %181 = vector.broadcast %180 : vector<1x1xi32> to vector<1x8xi32>
    %182 = arith.cmpi eq, %0, %181 : vector<1x8xi32>
    %c0_i32_65 = arith.constant 0 : i32
    %183 = vector.broadcast %c0_i32_65 : i32 to vector<1x1xi32>
    %184 = arith.cmpi eq, %180, %183 : vector<1x1xi32>
    %c8_i32_66 = arith.constant 8 : i32
    %185 = vector.broadcast %c8_i32_66 : i32 to vector<1x1xi32>
    %186 = arith.subi %185, %180 : vector<1x1xi32>
    %c0_i32_67 = arith.constant 0 : i32
    %187 = vector.broadcast %c0_i32_67 : i32 to vector<1x1xi32>
    %188 = arith.select %184, %187, %186 : vector<1x1xi1>, vector<1x1xi32>
    %189 = vector.broadcast %188 : vector<1x1xi32> to vector<1x8xi32>
    %190 = arith.cmpi eq, %0, %189 : vector<1x8xi32>
    %191 = arith.ori %171, %190 : vector<1x8xi1>
    %cst_68 = arith.constant 0.000000e+00 : f32
    %192 = vector.shape_cast %174 : vector<1x1xf32> to vector<1x1xf32>
    %193 = vector.broadcast %192 : vector<1x1xf32> to vector<1x8xf32>
    %194 = vector.broadcast %cst_68 : f32 to vector<1x8xf32>
    %195 = arith.select %190, %193, %194 : vector<1x8xi1>, vector<1x8xf32>
    %196 = arith.addf %172, %195 : vector<1x8xf32>
    %cst_69 = arith.constant -1.000000e+30 : f32
    %197 = vector.broadcast %cst_69 : f32 to vector<1x8xf32>
    %198 = arith.select %182, %197, %170 : vector<1x8xi1>, vector<1x8xf32>
    %cst_70 = arith.constant dense<0xFF800000> : vector<1xf32>
    %199 = vector.multi_reduction <maximumf>, %198, %cst_70 [1] : vector<1x8xf32> to vector<1xf32>
    %200 = vector.shape_cast %199 : vector<1xf32> to vector<1x1xf32>
    %201 = vector.broadcast %200 : vector<1x1xf32> to vector<1x8xf32>
    %202 = arith.cmpf oeq, %198, %201 : vector<1x8xf32>
    %c8_i32_71 = arith.constant 8 : i32
    %203 = vector.broadcast %c8_i32_71 : i32 to vector<1x8xi32>
    %204 = arith.select %202, %0, %203 : vector<1x8xi1>, vector<1x8xi32>
    %cst_72 = arith.constant dense<2147483647> : vector<1xi32>
    %205 = vector.multi_reduction <minsi>, %204, %cst_72 [1] : vector<1x8xi32> to vector<1xi32>
    %206 = vector.shape_cast %205 : vector<1xi32> to vector<1x1xi32>
    %c0_i32_73 = arith.constant 0 : i32
    %207 = vector.broadcast %c0_i32_73 : i32 to vector<1x1xi32>
    %208 = arith.cmpi eq, %206, %207 : vector<1x1xi32>
    %c8_i32_74 = arith.constant 8 : i32
    %209 = vector.broadcast %c8_i32_74 : i32 to vector<1x1xi32>
    %210 = arith.subi %209, %206 : vector<1x1xi32>
    %c0_i32_75 = arith.constant 0 : i32
    %211 = vector.broadcast %c0_i32_75 : i32 to vector<1x1xi32>
    %212 = arith.select %208, %211, %210 : vector<1x1xi1>, vector<1x1xi32>
    %213 = vector.broadcast %212 : vector<1x1xi32> to vector<1x8xi32>
    %214 = arith.cmpi eq, %0, %213 : vector<1x8xi32>
    %215 = arith.ori %191, %214 : vector<1x8xi1>
    %cst_76 = arith.constant 0.000000e+00 : f32
    %216 = vector.shape_cast %200 : vector<1x1xf32> to vector<1x1xf32>
    %217 = vector.broadcast %216 : vector<1x1xf32> to vector<1x8xf32>
    %218 = vector.broadcast %cst_76 : f32 to vector<1x8xf32>
    %219 = arith.select %214, %217, %218 : vector<1x8xi1>, vector<1x8xf32>
    %220 = arith.addf %196, %219 : vector<1x8xf32>
    %cst_77 = arith.constant -1.000000e+30 : f32
    %221 = vector.broadcast %cst_77 : f32 to vector<1x8xf32>
    %222 = arith.select %215, %220, %221 : vector<1x8xi1>, vector<1x8xf32>
    %cst_78 = arith.constant dense<0xFF800000> : vector<1xf32>
    %223 = vector.multi_reduction <maximumf>, %222, %cst_78 [1] : vector<1x8xf32> to vector<1xf32>
    %224 = vector.shape_cast %223 : vector<1xf32> to vector<1x1xf32>
    %225 = vector.broadcast %224 : vector<1x1xf32> to vector<1x8xf32>
    %226 = arith.subf %222, %225 : vector<1x8xf32>
    %227 = math.exp %226 : vector<1x8xf32>
    %cst_79 = arith.constant 0.000000e+00 : f32
    %228 = vector.broadcast %cst_79 : f32 to vector<1x8xf32>
    %229 = arith.select %215, %227, %228 : vector<1x8xi1>, vector<1x8xf32>
    %cst_80 = arith.constant dense<0.000000e+00> : vector<1xf32>
    %230 = vector.multi_reduction <add>, %229, %cst_80 [1] : vector<1x8xf32> to vector<1xf32>
    %231 = vector.shape_cast %230 : vector<1xf32> to vector<1x1xf32>
    %232 = vector.broadcast %231 : vector<1x1xf32> to vector<1x8xf32>
    %233 = arith.divf %229, %232 : vector<1x8xf32>
    %234 = vector.extract_strided_slice %233 {offsets = [0, 7], sizes = [1, 1], strides = [1, 1]} : vector<1x8xf32> to vector<1x1xf32>
    %235 = vector.extract_strided_slice %233 {offsets = [0, 0], sizes = [1, 7], strides = [1, 1]} : vector<1x8xf32> to vector<1x7xf32>
    %236 = tpu.concatenate %234, %235 in 1 : vector<1x1xf32>, vector<1x7xf32> -> vector<1x8xf32>
    %237 = tpu.concatenate %233, %236 in 0 : vector<1x8xf32>, vector<1x8xf32> -> vector<2x8xf32>
    %238 = vector.extract_strided_slice %237 {offsets = [0, 6], sizes = [2, 2], strides = [1, 1]} : vector<2x8xf32> to vector<2x2xf32>
    %239 = vector.extract_strided_slice %237 {offsets = [0, 0], sizes = [2, 6], strides = [1, 1]} : vector<2x8xf32> to vector<2x6xf32>
    %240 = tpu.concatenate %238, %239 in 1 : vector<2x2xf32>, vector<2x6xf32> -> vector<2x8xf32>
    %241 = tpu.concatenate %237, %240 in 0 : vector<2x8xf32>, vector<2x8xf32> -> vector<4x8xf32>
    %242 = vector.extract_strided_slice %241 {offsets = [0, 4], sizes = [4, 4], strides = [1, 1]} : vector<4x8xf32> to vector<4x4xf32>
    %243 = vector.extract_strided_slice %241 {offsets = [0, 0], sizes = [4, 4], strides = [1, 1]} : vector<4x8xf32> to vector<4x4xf32>
    %244 = tpu.concatenate %242, %243 in 1 : vector<4x4xf32>, vector<4x4xf32> -> vector<4x8xf32>
    %245 = tpu.concatenate %241, %244 in 0 : vector<4x8xf32>, vector<4x8xf32> -> vector<8x8xf32>
    %cst_81 = arith.constant dense<0.000000e+00> : vector<8x32xf32>
    %246 = tpu.matmul %245, %148, %cst_81 {dimension_numbers = #tpu.dot_dimension_numbers<[1], [0], [0], [1], [0, 0, 1, 1], [], []>} : vector<8x8xf32>, vector<8x32xf32>, vector<8x32xf32> -> vector<8x32xf32>
    %cst_82 = arith.constant dense<0.000000e+00> : vector<8x32xf32>
    %247 = tpu.matmul %246, %13, %cst_82 {dimension_numbers = #tpu.dot_dimension_numbers<[1], [0], [0], [1], [0, 0, 1, 1], [], []>} : vector<8x32xf32>, vector<32x32xf32>, vector<8x32xf32> -> vector<8x32xf32>
    %248 = vector.broadcast %14 : vector<1x32xf32> to vector<8x32xf32>
    %249 = arith.addf %247, %248 : vector<8x32xf32>
    %c0_83 = arith.constant 0 : index
    %c0_84 = arith.constant 0 : index
    %c1 = arith.constant 1 : index
    %c0_85 = arith.constant 0 : index
    %250 = vector.load %arg13[%c0_83, %c0_84, %c1, %c0_85] : memref<1x8x4x32xf32, #tpu.memory_space<vmem>>, vector<1x8x1x32xf32>
    %251 = vector.shape_cast %250 : vector<1x8x1x32xf32> to vector<8x32xf32>
    %252 = vector.shape_cast %249 : vector<8x32xf32> to vector<1x8x1x32xf32>
    tpu.vector_store %arg13[%c0_83, %c0_84, %c1, %c0_85], %252 {strides = array<i32>} : memref<1x8x4x32xf32, #tpu.memory_space<vmem>>, vector<1x8x1x32xf32>,
    %253 = vector.extract_strided_slice %2 {offsets = [0, 2, 0], sizes = [8, 1, 32], strides = [1, 1, 1]} : vector<8x4x32xf32> to vector<8x1x32xf32>
    %254 = vector.shape_cast %253 : vector<8x1x32xf32> to vector<8x32xf32>
    %cst_86 = arith.constant dense<0.000000e+00> : vector<8x32xf32>
    %255 = tpu.matmul %254, %7, %cst_86 {dimension_numbers = #tpu.dot_dimension_numbers<[1], [0], [0], [1], [0, 0, 1, 1], [], []>, precision = #tpu.contract_precision<fp32>} : vector<8x32xf32>, vector<32x32xf32>, vector<8x32xf32> -> vector<8x32xf32>
    %256 = vector.broadcast %8 : vector<1x32xf32> to vector<8x32xf32>
    %257 = arith.addf %255, %256 : vector<8x32xf32>
    %258 = vector.extract_strided_slice %4 {offsets = [0, 2, 0], sizes = [8, 1, 32], strides = [1, 1, 1]} : vector<8x4x32xf32> to vector<8x1x32xf32>
    %259 = vector.shape_cast %258 : vector<8x1x32xf32> to vector<8x32xf32>
    %cst_87 = arith.constant dense<0.000000e+00> : vector<8x32xf32>
    %260 = tpu.matmul %259, %9, %cst_87 {dimension_numbers = #tpu.dot_dimension_numbers<[1], [0], [0], [1], [0, 0, 1, 1], [], []>, precision = #tpu.contract_precision<fp32>} : vector<8x32xf32>, vector<32x32xf32>, vector<8x32xf32> -> vector<8x32xf32>
    %261 = vector.broadcast %10 : vector<1x32xf32> to vector<8x32xf32>
    %262 = arith.addf %260, %261 : vector<8x32xf32>
    %263 = vector.extract_strided_slice %6 {offsets = [0, 2, 0], sizes = [8, 1, 32], strides = [1, 1, 1]} : vector<8x4x32xf32> to vector<8x1x32xf32>
    %264 = vector.shape_cast %263 : vector<8x1x32xf32> to vector<8x32xf32>
    %cst_88 = arith.constant dense<0.000000e+00> : vector<8x32xf32>
    %265 = tpu.matmul %264, %11, %cst_88 {dimension_numbers = #tpu.dot_dimension_numbers<[1], [0], [0], [1], [0, 0, 1, 1], [], []>} : vector<8x32xf32>, vector<32x32xf32>, vector<8x32xf32> -> vector<8x32xf32>
    %266 = vector.broadcast %12 : vector<1x32xf32> to vector<8x32xf32>
    %267 = arith.addf %265, %266 : vector<8x32xf32>
    %268 = tpu.transpose %262, [1, 0] : vector<8x32xf32> -> vector<32x8xf32>
    %cst_89 = arith.constant dense<0.000000e+00> : vector<8x8xf32>
    %269 = tpu.matmul %257, %268, %cst_89 {dimension_numbers = #tpu.dot_dimension_numbers<[1], [0], [0], [1], [0, 0, 1, 1], [], []>, precision = #tpu.contract_precision<fp32>} : vector<8x32xf32>, vector<32x8xf32>, vector<8x8xf32> -> vector<8x8xf32>
    %270 = vector.extract_strided_slice %269 {offsets = [0, 0], sizes = [4, 8], strides = [1, 1]} : vector<8x8xf32> to vector<4x8xf32>
    %271 = vector.extract_strided_slice %269 {offsets = [4, 0], sizes = [4, 8], strides = [1, 1]} : vector<8x8xf32> to vector<4x8xf32>
    %272 = vector.extract_strided_slice %271 {offsets = [0, 4], sizes = [4, 4], strides = [1, 1]} : vector<4x8xf32> to vector<4x4xf32>
    %273 = vector.extract_strided_slice %271 {offsets = [0, 0], sizes = [4, 4], strides = [1, 1]} : vector<4x8xf32> to vector<4x4xf32>
    %274 = tpu.concatenate %272, %273 in 1 : vector<4x4xf32>, vector<4x4xf32> -> vector<4x8xf32>
    %275 = arith.addf %270, %274 : vector<4x8xf32>
    %276 = vector.extract_strided_slice %275 {offsets = [0, 0], sizes = [2, 8], strides = [1, 1]} : vector<4x8xf32> to vector<2x8xf32>
    %277 = vector.extract_strided_slice %275 {offsets = [2, 0], sizes = [2, 8], strides = [1, 1]} : vector<4x8xf32> to vector<2x8xf32>
    %278 = vector.extract_strided_slice %277 {offsets = [0, 2], sizes = [2, 6], strides = [1, 1]} : vector<2x8xf32> to vector<2x6xf32>
    %279 = vector.extract_strided_slice %277 {offsets = [0, 0], sizes = [2, 2], strides = [1, 1]} : vector<2x8xf32> to vector<2x2xf32>
    %280 = tpu.concatenate %278, %279 in 1 : vector<2x6xf32>, vector<2x2xf32> -> vector<2x8xf32>
    %281 = arith.addf %276, %280 : vector<2x8xf32>
    %282 = vector.extract_strided_slice %281 {offsets = [0, 0], sizes = [1, 8], strides = [1, 1]} : vector<2x8xf32> to vector<1x8xf32>
    %283 = vector.extract_strided_slice %281 {offsets = [1, 0], sizes = [1, 8], strides = [1, 1]} : vector<2x8xf32> to vector<1x8xf32>
    %284 = vector.extract_strided_slice %283 {offsets = [0, 1], sizes = [1, 7], strides = [1, 1]} : vector<1x8xf32> to vector<1x7xf32>
    %285 = vector.extract_strided_slice %283 {offsets = [0, 0], sizes = [1, 1], strides = [1, 1]} : vector<1x8xf32> to vector<1x1xf32>
    %286 = tpu.concatenate %284, %285 in 1 : vector<1x7xf32>, vector<1x1xf32> -> vector<1x8xf32>
    %287 = arith.addf %282, %286 : vector<1x8xf32>
    %cst_90 = arith.constant 3.125000e-02 : f32
    %288 = vector.broadcast %cst_90 : f32 to vector<1x8xf32>
    %289 = arith.mulf %287, %288 : vector<1x8xf32>
    %false_91 = arith.constant false
    %290 = vector.broadcast %false_91 : i1 to vector<1x8xi1>
    %cst_92 = arith.constant 0.000000e+00 : f32
    %291 = vector.broadcast %cst_92 : f32 to vector<1x8xf32>
    %cst_93 = arith.constant dense<0xFF800000> : vector<1xf32>
    %292 = vector.multi_reduction <maximumf>, %289, %cst_93 [1] : vector<1x8xf32> to vector<1xf32>
    %293 = vector.shape_cast %292 : vector<1xf32> to vector<1x1xf32>
    %294 = vector.broadcast %293 : vector<1x1xf32> to vector<1x8xf32>
    %295 = arith.cmpf oeq, %289, %294 : vector<1x8xf32>
    %c8_i32_94 = arith.constant 8 : i32
    %296 = vector.broadcast %c8_i32_94 : i32 to vector<1x8xi32>
    %297 = arith.select %295, %0, %296 : vector<1x8xi1>, vector<1x8xi32>
    %cst_95 = arith.constant dense<2147483647> : vector<1xi32>
    %298 = vector.multi_reduction <minsi>, %297, %cst_95 [1] : vector<1x8xi32> to vector<1xi32>
    %299 = vector.shape_cast %298 : vector<1xi32> to vector<1x1xi32>
    %300 = vector.broadcast %299 : vector<1x1xi32> to vector<1x8xi32>
    %301 = arith.cmpi eq, %0, %300 : vector<1x8xi32>
    %c0_i32_96 = arith.constant 0 : i32
    %302 = vector.broadcast %c0_i32_96 : i32 to vector<1x1xi32>
    %303 = arith.cmpi eq, %299, %302 : vector<1x1xi32>
    %c8_i32_97 = arith.constant 8 : i32
    %304 = vector.broadcast %c8_i32_97 : i32 to vector<1x1xi32>
    %305 = arith.subi %304, %299 : vector<1x1xi32>
    %c0_i32_98 = arith.constant 0 : i32
    %306 = vector.broadcast %c0_i32_98 : i32 to vector<1x1xi32>
    %307 = arith.select %303, %306, %305 : vector<1x1xi1>, vector<1x1xi32>
    %308 = vector.broadcast %307 : vector<1x1xi32> to vector<1x8xi32>
    %309 = arith.cmpi eq, %0, %308 : vector<1x8xi32>
    %310 = arith.ori %290, %309 : vector<1x8xi1>
    %cst_99 = arith.constant 0.000000e+00 : f32
    %311 = vector.shape_cast %293 : vector<1x1xf32> to vector<1x1xf32>
    %312 = vector.broadcast %311 : vector<1x1xf32> to vector<1x8xf32>
    %313 = vector.broadcast %cst_99 : f32 to vector<1x8xf32>
    %314 = arith.select %309, %312, %313 : vector<1x8xi1>, vector<1x8xf32>
    %315 = arith.addf %291, %314 : vector<1x8xf32>
    %cst_100 = arith.constant -1.000000e+30 : f32
    %316 = vector.broadcast %cst_100 : f32 to vector<1x8xf32>
    %317 = arith.select %301, %316, %289 : vector<1x8xi1>, vector<1x8xf32>
    %cst_101 = arith.constant dense<0xFF800000> : vector<1xf32>
    %318 = vector.multi_reduction <maximumf>, %317, %cst_101 [1] : vector<1x8xf32> to vector<1xf32>
    %319 = vector.shape_cast %318 : vector<1xf32> to vector<1x1xf32>
    %320 = vector.broadcast %319 : vector<1x1xf32> to vector<1x8xf32>
    %321 = arith.cmpf oeq, %317, %320 : vector<1x8xf32>
    %c8_i32_102 = arith.constant 8 : i32
    %322 = vector.broadcast %c8_i32_102 : i32 to vector<1x8xi32>
    %323 = arith.select %321, %0, %322 : vector<1x8xi1>, vector<1x8xi32>
    %cst_103 = arith.constant dense<2147483647> : vector<1xi32>
    %324 = vector.multi_reduction <minsi>, %323, %cst_103 [1] : vector<1x8xi32> to vector<1xi32>
    %325 = vector.shape_cast %324 : vector<1xi32> to vector<1x1xi32>
    %c0_i32_104 = arith.constant 0 : i32
    %326 = vector.broadcast %c0_i32_104 : i32 to vector<1x1xi32>
    %327 = arith.cmpi eq, %325, %326 : vector<1x1xi32>
    %c8_i32_105 = arith.constant 8 : i32
    %328 = vector.broadcast %c8_i32_105 : i32 to vector<1x1xi32>
    %329 = arith.subi %328, %325 : vector<1x1xi32>
    %c0_i32_106 = arith.constant 0 : i32
    %330 = vector.broadcast %c0_i32_106 : i32 to vector<1x1xi32>
    %331 = arith.select %327, %330, %329 : vector<1x1xi1>, vector<1x1xi32>
    %332 = vector.broadcast %331 : vector<1x1xi32> to vector<1x8xi32>
    %333 = arith.cmpi eq, %0, %332 : vector<1x8xi32>
    %334 = arith.ori %310, %333 : vector<1x8xi1>
    %cst_107 = arith.constant 0.000000e+00 : f32
    %335 = vector.shape_cast %319 : vector<1x1xf32> to vector<1x1xf32>
    %336 = vector.broadcast %335 : vector<1x1xf32> to vector<1x8xf32>
    %337 = vector.broadcast %cst_107 : f32 to vector<1x8xf32>
    %338 = arith.select %333, %336, %337 : vector<1x8xi1>, vector<1x8xf32>
    %339 = arith.addf %315, %338 : vector<1x8xf32>
    %cst_108 = arith.constant -1.000000e+30 : f32
    %340 = vector.broadcast %cst_108 : f32 to vector<1x8xf32>
    %341 = arith.select %334, %339, %340 : vector<1x8xi1>, vector<1x8xf32>
    %cst_109 = arith.constant dense<0xFF800000> : vector<1xf32>
    %342 = vector.multi_reduction <maximumf>, %341, %cst_109 [1] : vector<1x8xf32> to vector<1xf32>
    %343 = vector.shape_cast %342 : vector<1xf32> to vector<1x1xf32>
    %344 = vector.broadcast %343 : vector<1x1xf32> to vector<1x8xf32>
    %345 = arith.subf %341, %344 : vector<1x8xf32>
    %346 = math.exp %345 : vector<1x8xf32>
    %cst_110 = arith.constant 0.000000e+00 : f32
    %347 = vector.broadcast %cst_110 : f32 to vector<1x8xf32>
    %348 = arith.select %334, %346, %347 : vector<1x8xi1>, vector<1x8xf32>
    %cst_111 = arith.constant dense<0.000000e+00> : vector<1xf32>
    %349 = vector.multi_reduction <add>, %348, %cst_111 [1] : vector<1x8xf32> to vector<1xf32>
    %350 = vector.shape_cast %349 : vector<1xf32> to vector<1x1xf32>
    %351 = vector.broadcast %350 : vector<1x1xf32> to vector<1x8xf32>
    %352 = arith.divf %348, %351 : vector<1x8xf32>
    %353 = vector.extract_strided_slice %352 {offsets = [0, 7], sizes = [1, 1], strides = [1, 1]} : vector<1x8xf32> to vector<1x1xf32>
    %354 = vector.extract_strided_slice %352 {offsets = [0, 0], sizes = [1, 7], strides = [1, 1]} : vector<1x8xf32> to vector<1x7xf32>
    %355 = tpu.concatenate %353, %354 in 1 : vector<1x1xf32>, vector<1x7xf32> -> vector<1x8xf32>
    %356 = tpu.concatenate %352, %355 in 0 : vector<1x8xf32>, vector<1x8xf32> -> vector<2x8xf32>
    %357 = vector.extract_strided_slice %356 {offsets = [0, 6], sizes = [2, 2], strides = [1, 1]} : vector<2x8xf32> to vector<2x2xf32>
    %358 = vector.extract_strided_slice %356 {offsets = [0, 0], sizes = [2, 6], strides = [1, 1]} : vector<2x8xf32> to vector<2x6xf32>
    %359 = tpu.concatenate %357, %358 in 1 : vector<2x2xf32>, vector<2x6xf32> -> vector<2x8xf32>
    %360 = tpu.concatenate %356, %359 in 0 : vector<2x8xf32>, vector<2x8xf32> -> vector<4x8xf32>
    %361 = vector.extract_strided_slice %360 {offsets = [0, 4], sizes = [4, 4], strides = [1, 1]} : vector<4x8xf32> to vector<4x4xf32>
    %362 = vector.extract_strided_slice %360 {offsets = [0, 0], sizes = [4, 4], strides = [1, 1]} : vector<4x8xf32> to vector<4x4xf32>
    %363 = tpu.concatenate %361, %362 in 1 : vector<4x4xf32>, vector<4x4xf32> -> vector<4x8xf32>
    %364 = tpu.concatenate %360, %363 in 0 : vector<4x8xf32>, vector<4x8xf32> -> vector<8x8xf32>
    %cst_112 = arith.constant dense<0.000000e+00> : vector<8x32xf32>
    %365 = tpu.matmul %364, %267, %cst_112 {dimension_numbers = #tpu.dot_dimension_numbers<[1], [0], [0], [1], [0, 0, 1, 1], [], []>} : vector<8x8xf32>, vector<8x32xf32>, vector<8x32xf32> -> vector<8x32xf32>
    %cst_113 = arith.constant dense<0.000000e+00> : vector<8x32xf32>
    %366 = tpu.matmul %365, %13, %cst_113 {dimension_numbers = #tpu.dot_dimension_numbers<[1], [0], [0], [1], [0, 0, 1, 1], [], []>} : vector<8x32xf32>, vector<32x32xf32>, vector<8x32xf32> -> vector<8x32xf32>
    %367 = vector.broadcast %14 : vector<1x32xf32> to vector<8x32xf32>
    %368 = arith.addf %366, %367 : vector<8x32xf32>
    %c0_114 = arith.constant 0 : index
    %c0_115 = arith.constant 0 : index
    %c2 = arith.constant 2 : index
    %c0_116 = arith.constant 0 : index
    %369 = vector.load %arg13[%c0_114, %c0_115, %c2, %c0_116] : memref<1x8x4x32xf32, #tpu.memory_space<vmem>>, vector<1x8x1x32xf32>
    %370 = vector.shape_cast %369 : vector<1x8x1x32xf32> to vector<8x32xf32>
    %371 = vector.shape_cast %368 : vector<8x32xf32> to vector<1x8x1x32xf32>
    tpu.vector_store %arg13[%c0_114, %c0_115, %c2, %c0_116], %371 {strides = array<i32>} : memref<1x8x4x32xf32, #tpu.memory_space<vmem>>, vector<1x8x1x32xf32>,
    %372 = vector.extract_strided_slice %2 {offsets = [0, 3, 0], sizes = [8, 1, 32], strides = [1, 1, 1]} : vector<8x4x32xf32> to vector<8x1x32xf32>
    %373 = vector.shape_cast %372 : vector<8x1x32xf32> to vector<8x32xf32>
    %cst_117 = arith.constant dense<0.000000e+00> : vector<8x32xf32>
    %374 = tpu.matmul %373, %7, %cst_117 {dimension_numbers = #tpu.dot_dimension_numbers<[1], [0], [0], [1], [0, 0, 1, 1], [], []>, precision = #tpu.contract_precision<fp32>} : vector<8x32xf32>, vector<32x32xf32>, vector<8x32xf32> -> vector<8x32xf32>
    %375 = vector.broadcast %8 : vector<1x32xf32> to vector<8x32xf32>
    %376 = arith.addf %374, %375 : vector<8x32xf32>
    %377 = vector.extract_strided_slice %4 {offsets = [0, 3, 0], sizes = [8, 1, 32], strides = [1, 1, 1]} : vector<8x4x32xf32> to vector<8x1x32xf32>
    %378 = vector.shape_cast %377 : vector<8x1x32xf32> to vector<8x32xf32>
    %cst_118 = arith.constant dense<0.000000e+00> : vector<8x32xf32>
    %379 = tpu.matmul %378, %9, %cst_118 {dimension_numbers = #tpu.dot_dimension_numbers<[1], [0], [0], [1], [0, 0, 1, 1], [], []>, precision = #tpu.contract_precision<fp32>} : vector<8x32xf32>, vector<32x32xf32>, vector<8x32xf32> -> vector<8x32xf32>
    %380 = vector.broadcast %10 : vector<1x32xf32> to vector<8x32xf32>
    %381 = arith.addf %379, %380 : vector<8x32xf32>
    %382 = vector.extract_strided_slice %6 {offsets = [0, 3, 0], sizes = [8, 1, 32], strides = [1, 1, 1]} : vector<8x4x32xf32> to vector<8x1x32xf32>
    %383 = vector.shape_cast %382 : vector<8x1x32xf32> to vector<8x32xf32>
    %cst_119 = arith.constant dense<0.000000e+00> : vector<8x32xf32>
    %384 = tpu.matmul %383, %11, %cst_119 {dimension_numbers = #tpu.dot_dimension_numbers<[1], [0], [0], [1], [0, 0, 1, 1], [], []>} : vector<8x32xf32>, vector<32x32xf32>, vector<8x32xf32> -> vector<8x32xf32>
    %385 = vector.broadcast %12 : vector<1x32xf32> to vector<8x32xf32>
    %386 = arith.addf %384, %385 : vector<8x32xf32>
    %387 = tpu.transpose %381, [1, 0] : vector<8x32xf32> -> vector<32x8xf32>
    %cst_120 = arith.constant dense<0.000000e+00> : vector<8x8xf32>
    %388 = tpu.matmul %376, %387, %cst_120 {dimension_numbers = #tpu.dot_dimension_numbers<[1], [0], [0], [1], [0, 0, 1, 1], [], []>, precision = #tpu.contract_precision<fp32>} : vector<8x32xf32>, vector<32x8xf32>, vector<8x8xf32> -> vector<8x8xf32>
    %389 = vector.extract_strided_slice %388 {offsets = [0, 0], sizes = [4, 8], strides = [1, 1]} : vector<8x8xf32> to vector<4x8xf32>
    %390 = vector.extract_strided_slice %388 {offsets = [4, 0], sizes = [4, 8], strides = [1, 1]} : vector<8x8xf32> to vector<4x8xf32>
    %391 = vector.extract_strided_slice %390 {offsets = [0, 4], sizes = [4, 4], strides = [1, 1]} : vector<4x8xf32> to vector<4x4xf32>
    %392 = vector.extract_strided_slice %390 {offsets = [0, 0], sizes = [4, 4], strides = [1, 1]} : vector<4x8xf32> to vector<4x4xf32>
    %393 = tpu.concatenate %391, %392 in 1 : vector<4x4xf32>, vector<4x4xf32> -> vector<4x8xf32>
    %394 = arith.addf %389, %393 : vector<4x8xf32>
    %395 = vector.extract_strided_slice %394 {offsets = [0, 0], sizes = [2, 8], strides = [1, 1]} : vector<4x8xf32> to vector<2x8xf32>
    %396 = vector.extract_strided_slice %394 {offsets = [2, 0], sizes = [2, 8], strides = [1, 1]} : vector<4x8xf32> to vector<2x8xf32>
    %397 = vector.extract_strided_slice %396 {offsets = [0, 2], sizes = [2, 6], strides = [1, 1]} : vector<2x8xf32> to vector<2x6xf32>
    %398 = vector.extract_strided_slice %396 {offsets = [0, 0], sizes = [2, 2], strides = [1, 1]} : vector<2x8xf32> to vector<2x2xf32>
    %399 = tpu.concatenate %397, %398 in 1 : vector<2x6xf32>, vector<2x2xf32> -> vector<2x8xf32>
    %400 = arith.addf %395, %399 : vector<2x8xf32>
    %401 = vector.extract_strided_slice %400 {offsets = [0, 0], sizes = [1, 8], strides = [1, 1]} : vector<2x8xf32> to vector<1x8xf32>
    %402 = vector.extract_strided_slice %400 {offsets = [1, 0], sizes = [1, 8], strides = [1, 1]} : vector<2x8xf32> to vector<1x8xf32>
    %403 = vector.extract_strided_slice %402 {offsets = [0, 1], sizes = [1, 7], strides = [1, 1]} : vector<1x8xf32> to vector<1x7xf32>
    %404 = vector.extract_strided_slice %402 {offsets = [0, 0], sizes = [1, 1], strides = [1, 1]} : vector<1x8xf32> to vector<1x1xf32>
    %405 = tpu.concatenate %403, %404 in 1 : vector<1x7xf32>, vector<1x1xf32> -> vector<1x8xf32>
    %406 = arith.addf %401, %405 : vector<1x8xf32>
    %cst_121 = arith.constant 3.125000e-02 : f32
    %407 = vector.broadcast %cst_121 : f32 to vector<1x8xf32>
    %408 = arith.mulf %406, %407 : vector<1x8xf32>
    %false_122 = arith.constant false
    %409 = vector.broadcast %false_122 : i1 to vector<1x8xi1>
    %cst_123 = arith.constant 0.000000e+00 : f32
    %410 = vector.broadcast %cst_123 : f32 to vector<1x8xf32>
    %cst_124 = arith.constant dense<0xFF800000> : vector<1xf32>
    %411 = vector.multi_reduction <maximumf>, %408, %cst_124 [1] : vector<1x8xf32> to vector<1xf32>
    %412 = vector.shape_cast %411 : vector<1xf32> to vector<1x1xf32>
    %413 = vector.broadcast %412 : vector<1x1xf32> to vector<1x8xf32>
    %414 = arith.cmpf oeq, %408, %413 : vector<1x8xf32>
    %c8_i32_125 = arith.constant 8 : i32
    %415 = vector.broadcast %c8_i32_125 : i32 to vector<1x8xi32>
    %416 = arith.select %414, %0, %415 : vector<1x8xi1>, vector<1x8xi32>
    %cst_126 = arith.constant dense<2147483647> : vector<1xi32>
    %417 = vector.multi_reduction <minsi>, %416, %cst_126 [1] : vector<1x8xi32> to vector<1xi32>
    %418 = vector.shape_cast %417 : vector<1xi32> to vector<1x1xi32>
    %419 = vector.broadcast %418 : vector<1x1xi32> to vector<1x8xi32>
    %420 = arith.cmpi eq, %0, %419 : vector<1x8xi32>
    %c0_i32_127 = arith.constant 0 : i32
    %421 = vector.broadcast %c0_i32_127 : i32 to vector<1x1xi32>
    %422 = arith.cmpi eq, %418, %421 : vector<1x1xi32>
    %c8_i32_128 = arith.constant 8 : i32
    %423 = vector.broadcast %c8_i32_128 : i32 to vector<1x1xi32>
    %424 = arith.subi %423, %418 : vector<1x1xi32>
    %c0_i32_129 = arith.constant 0 : i32
    %425 = vector.broadcast %c0_i32_129 : i32 to vector<1x1xi32>
    %426 = arith.select %422, %425, %424 : vector<1x1xi1>, vector<1x1xi32>
    %427 = vector.broadcast %426 : vector<1x1xi32> to vector<1x8xi32>
    %428 = arith.cmpi eq, %0, %427 : vector<1x8xi32>
    %429 = arith.ori %409, %428 : vector<1x8xi1>
    %cst_130 = arith.constant 0.000000e+00 : f32
    %430 = vector.shape_cast %412 : vector<1x1xf32> to vector<1x1xf32>
    %431 = vector.broadcast %430 : vector<1x1xf32> to vector<1x8xf32>
    %432 = vector.broadcast %cst_130 : f32 to vector<1x8xf32>
    %433 = arith.select %428, %431, %432 : vector<1x8xi1>, vector<1x8xf32>
    %434 = arith.addf %410, %433 : vector<1x8xf32>
    %cst_131 = arith.constant -1.000000e+30 : f32
    %435 = vector.broadcast %cst_131 : f32 to vector<1x8xf32>
    %436 = arith.select %420, %435, %408 : vector<1x8xi1>, vector<1x8xf32>
    %cst_132 = arith.constant dense<0xFF800000> : vector<1xf32>
    %437 = vector.multi_reduction <maximumf>, %436, %cst_132 [1] : vector<1x8xf32> to vector<1xf32>
    %438 = vector.shape_cast %437 : vector<1xf32> to vector<1x1xf32>
    %439 = vector.broadcast %438 : vector<1x1xf32> to vector<1x8xf32>
    %440 = arith.cmpf oeq, %436, %439 : vector<1x8xf32>
    %c8_i32_133 = arith.constant 8 : i32
    %441 = vector.broadcast %c8_i32_133 : i32 to vector<1x8xi32>
    %442 = arith.select %440, %0, %441 : vector<1x8xi1>, vector<1x8xi32>
    %cst_134 = arith.constant dense<2147483647> : vector<1xi32>
    %443 = vector.multi_reduction <minsi>, %442, %cst_134 [1] : vector<1x8xi32> to vector<1xi32>
    %444 = vector.shape_cast %443 : vector<1xi32> to vector<1x1xi32>
    %c0_i32_135 = arith.constant 0 : i32
    %445 = vector.broadcast %c0_i32_135 : i32 to vector<1x1xi32>
    %446 = arith.cmpi eq, %444, %445 : vector<1x1xi32>
    %c8_i32_136 = arith.constant 8 : i32
    %447 = vector.broadcast %c8_i32_136 : i32 to vector<1x1xi32>
    %448 = arith.subi %447, %444 : vector<1x1xi32>
    %c0_i32_137 = arith.constant 0 : i32
    %449 = vector.broadcast %c0_i32_137 : i32 to vector<1x1xi32>
    %450 = arith.select %446, %449, %448 : vector<1x1xi1>, vector<1x1xi32>
    %451 = vector.broadcast %450 : vector<1x1xi32> to vector<1x8xi32>
    %452 = arith.cmpi eq, %0, %451 : vector<1x8xi32>
    %453 = arith.ori %429, %452 : vector<1x8xi1>
    %cst_138 = arith.constant 0.000000e+00 : f32
    %454 = vector.shape_cast %438 : vector<1x1xf32> to vector<1x1xf32>
    %455 = vector.broadcast %454 : vector<1x1xf32> to vector<1x8xf32>
    %456 = vector.broadcast %cst_138 : f32 to vector<1x8xf32>
    %457 = arith.select %452, %455, %456 : vector<1x8xi1>, vector<1x8xf32>
    %458 = arith.addf %434, %457 : vector<1x8xf32>
    %cst_139 = arith.constant -1.000000e+30 : f32
    %459 = vector.broadcast %cst_139 : f32 to vector<1x8xf32>
    %460 = arith.select %453, %458, %459 : vector<1x8xi1>, vector<1x8xf32>
    %cst_140 = arith.constant dense<0xFF800000> : vector<1xf32>
    %461 = vector.multi_reduction <maximumf>, %460, %cst_140 [1] : vector<1x8xf32> to vector<1xf32>
    %462 = vector.shape_cast %461 : vector<1xf32> to vector<1x1xf32>
    %463 = vector.broadcast %462 : vector<1x1xf32> to vector<1x8xf32>
    %464 = arith.subf %460, %463 : vector<1x8xf32>
    %465 = math.exp %464 : vector<1x8xf32>
    %cst_141 = arith.constant 0.000000e+00 : f32
    %466 = vector.broadcast %cst_141 : f32 to vector<1x8xf32>
    %467 = arith.select %453, %465, %466 : vector<1x8xi1>, vector<1x8xf32>
    %cst_142 = arith.constant dense<0.000000e+00> : vector<1xf32>
    %468 = vector.multi_reduction <add>, %467, %cst_142 [1] : vector<1x8xf32> to vector<1xf32>
    %469 = vector.shape_cast %468 : vector<1xf32> to vector<1x1xf32>
    %470 = vector.broadcast %469 : vector<1x1xf32> to vector<1x8xf32>
    %471 = arith.divf %467, %470 : vector<1x8xf32>
    %472 = vector.extract_strided_slice %471 {offsets = [0, 7], sizes = [1, 1], strides = [1, 1]} : vector<1x8xf32> to vector<1x1xf32>
    %473 = vector.extract_strided_slice %471 {offsets = [0, 0], sizes = [1, 7], strides = [1, 1]} : vector<1x8xf32> to vector<1x7xf32>
    %474 = tpu.concatenate %472, %473 in 1 : vector<1x1xf32>, vector<1x7xf32> -> vector<1x8xf32>
    %475 = tpu.concatenate %471, %474 in 0 : vector<1x8xf32>, vector<1x8xf32> -> vector<2x8xf32>
    %476 = vector.extract_strided_slice %475 {offsets = [0, 6], sizes = [2, 2], strides = [1, 1]} : vector<2x8xf32> to vector<2x2xf32>
    %477 = vector.extract_strided_slice %475 {offsets = [0, 0], sizes = [2, 6], strides = [1, 1]} : vector<2x8xf32> to vector<2x6xf32>
    %478 = tpu.concatenate %476, %477 in 1 : vector<2x2xf32>, vector<2x6xf32> -> vector<2x8xf32>
    %479 = tpu.concatenate %475, %478 in 0 : vector<2x8xf32>, vector<2x8xf32> -> vector<4x8xf32>
    %480 = vector.extract_strided_slice %479 {offsets = [0, 4], sizes = [4, 4], strides = [1, 1]} : vector<4x8xf32> to vector<4x4xf32>
    %481 = vector.extract_strided_slice %479 {offsets = [0, 0], sizes = [4, 4], strides = [1, 1]} : vector<4x8xf32> to vector<4x4xf32>
    %482 = tpu.concatenate %480, %481 in 1 : vector<4x4xf32>, vector<4x4xf32> -> vector<4x8xf32>
    %483 = tpu.concatenate %479, %482 in 0 : vector<4x8xf32>, vector<4x8xf32> -> vector<8x8xf32>
    %cst_143 = arith.constant dense<0.000000e+00> : vector<8x32xf32>
    %484 = tpu.matmul %483, %386, %cst_143 {dimension_numbers = #tpu.dot_dimension_numbers<[1], [0], [0], [1], [0, 0, 1, 1], [], []>} : vector<8x8xf32>, vector<8x32xf32>, vector<8x32xf32> -> vector<8x32xf32>
    %cst_144 = arith.constant dense<0.000000e+00> : vector<8x32xf32>
    %485 = tpu.matmul %484, %13, %cst_144 {dimension_numbers = #tpu.dot_dimension_numbers<[1], [0], [0], [1], [0, 0, 1, 1], [], []>} : vector<8x32xf32>, vector<32x32xf32>, vector<8x32xf32> -> vector<8x32xf32>
    %486 = vector.broadcast %14 : vector<1x32xf32> to vector<8x32xf32>
    %487 = arith.addf %485, %486 : vector<8x32xf32>
    %c0_145 = arith.constant 0 : index
    %c0_146 = arith.constant 0 : index
    %c3 = arith.constant 3 : index
    %c0_147 = arith.constant 0 : index
    %488 = vector.load %arg13[%c0_145, %c0_146, %c3, %c0_147] : memref<1x8x4x32xf32, #tpu.memory_space<vmem>>, vector<1x8x1x32xf32>
    %489 = vector.shape_cast %488 : vector<1x8x1x32xf32> to vector<8x32xf32>
    %490 = vector.shape_cast %487 : vector<8x32xf32> to vector<1x8x1x32xf32>
    tpu.vector_store %arg13[%c0_145, %c0_146, %c3, %c0_147], %490 {strides = array<i32>} : memref<1x8x4x32xf32, #tpu.memory_space<vmem>>, vector<1x8x1x32xf32>,
    return
  }
  func.func @transform_0(%arg0: i32, %arg1: i32) -> (i32, i32, i32, i32) {
    %c0_i32 = arith.constant 0 : i32
    %c0_i32_0 = arith.constant 0 : i32
    %c0_i32_1 = arith.constant 0 : i32
    return %arg0, %c0_i32, %arg1, %c0_i32_0 : i32, i32, i32, i32
  }
  func.func @transform_1(%arg0: i32, %arg1: i32) -> (i32, i32, i32, i32) {
    %c0_i32 = arith.constant 0 : i32
    %c0_i32_0 = arith.constant 0 : i32
    %c0_i32_1 = arith.constant 0 : i32
    return %arg0, %c0_i32, %arg1, %c0_i32_0 : i32, i32, i32, i32
  }
  func.func @transform_2(%arg0: i32, %arg1: i32) -> (i32, i32, i32, i32) {
    %c0_i32 = arith.constant 0 : i32
    %c0_i32_0 = arith.constant 0 : i32
    %c0_i32_1 = arith.constant 0 : i32
    return %arg0, %c0_i32, %arg1, %c0_i32_0 : i32, i32, i32, i32
  }
  func.func @transform_3(%arg0: i32, %arg1: i32) -> (i32, i32) {
    %c0_i32 = arith.constant 0 : i32
    %c0_i32_0 = arith.constant 0 : i32
    %c0_i32_1 = arith.constant 0 : i32
    return %c0_i32, %c0_i32_0 : i32, i32
  }
  func.func @transform_4(%arg0: i32, %arg1: i32) -> (i32, i32) {
    %c0_i32 = arith.constant 0 : i32
    %c0_i32_0 = arith.constant 0 : i32
    %c0_i32_1 = arith.constant 0 : i32
    return %c0_i32, %c0_i32_0 : i32, i32
  }
  func.func @transform_5(%arg0: i32, %arg1: i32) -> (i32, i32) {
    %c0_i32 = arith.constant 0 : i32
    %c0_i32_0 = arith.constant 0 : i32
    %c0_i32_1 = arith.constant 0 : i32
    return %c0_i32, %c0_i32_0 : i32, i32
  }
  func.func @transform_6(%arg0: i32, %arg1: i32) -> (i32, i32) {
    %c0_i32 = arith.constant 0 : i32
    %c0_i32_0 = arith.constant 0 : i32
    %c0_i32_1 = arith.constant 0 : i32
    return %c0_i32, %c0_i32_0 : i32, i32
  }
  func.func @transform_7(%arg0: i32, %arg1: i32) -> (i32, i32) {
    %c0_i32 = arith.constant 0 : i32
    %c0_i32_0 = arith.constant 0 : i32
    %c0_i32_1 = arith.constant 0 : i32
    return %c0_i32, %c0_i32_0 : i32, i32
  }
  func.func @transform_8(%arg0: i32, %arg1: i32) -> (i32, i32) {
    %c0_i32 = arith.constant 0 : i32
    %c0_i32_0 = arith.constant 0 : i32
    %c0_i32_1 = arith.constant 0 : i32
    return %c0_i32, %c0_i32_0 : i32, i32
  }
  func.func @transform_9(%arg0: i32, %arg1: i32) -> (i32, i32) {
    %c0_i32 = arith.constant 0 : i32
    %c0_i32_0 = arith.constant 0 : i32
    %c0_i32_1 = arith.constant 0 : i32
    return %c0_i32, %c0_i32_0 : i32, i32
  }
  func.func @transform_10(%arg0: i32, %arg1: i32) -> (i32, i32) {
    %c0_i32 = arith.constant 0 : i32
    %c0_i32_0 = arith.constant 0 : i32
    %c0_i32_1 = arith.constant 0 : i32
    return %c0_i32, %c0_i32_0 : i32, i32
  }
  func.func @transform_11(%arg0: i32, %arg1: i32) -> (i32, i32, i32, i32) {
    %c0_i32 = arith.constant 0 : i32
    %c0_i32_0 = arith.constant 0 : i32
    %c0_i32_1 = arith.constant 0 : i32
    return %arg0, %c0_i32, %arg1, %c0_i32_0 : i32, i32, i32, i32
  }
}

</mosaic_0001>

<bundles_post_ra>
// kernel: tpu_custom_call.1
= control target key start
LH: loop header
LB: loop body
LE: loop exit
PB: predicated region body
PF: predicated region fallthrough
CT: control target
= control target key end

     0   :  { %s11962_s0 = inlined_call_operand.hbm [shape: f32[2,8,4,32], index: 0, kind: input, shape index: {}]   ;;  %s11963_s1 = inlined_call_operand.hbm [shape: f32[2,8,4,32], index: 1, kind: input, shape index: {}]   ;;  %s11964_s2 = inlined_call_operand.hbm [shape: f32[2,8,4,32], index: 2, kind: input, shape index: {}]   ;;  %s11965_s3 = inlined_call_operand.hbm [shape: f32[32,32], index: 3, kind: input, shape index: {}]   ;;  %s11966_s4 = inlined_call_operand.vmem [shape: f32[1,32], index: 4, kind: input, shape index: {}]   ;;  %s11967_s5 = inlined_call_operand.hbm [shape: f32[32,32], index: 5, kind: input, shape index: {}]   ;;  %s11968_s6 = inlined_call_operand.vmem [shape: f32[1,32], index: 6, kind: input, shape index: {}]   ;;  %s11969_s7 = inlined_call_operand.hbm [shape: f32[32,32], index: 7, kind: input, shape index: {}]   ;;  %s11970_s8 = inlined_call_operand.vmem [shape: f32[1,32], index: 8, kind: input, shape index: {}]   ;;  %s11971_s9 = inlined_call_operand.hbm [shape: f32[32,32], index: 9, kind: input, shape index: {}]   ;;  %s11972_s10 = inlined_call_operand.vmem [shape: f32[1,32], index: 10, kind: input, shape index: {}]   ;;  %s11973_s11 = inlined_call_operand.hbm [shape: f32[2,8,4,32], index: 11, kind: output, shape index: {}]  }
   0x1   :  { %12065 = sst [smem:[#allocation53_spill]] %s11963_s1 }
   0x2   :  { %12066 = sst [smem:[#allocation54_spill]] %s11965_s3 }
   0x3   :  { %12067 = sst [smem:[#allocation55_spill]] %s11967_s5 }
   0x4   :  { %12068 = sst [smem:[#allocation56_spill]] %s11969_s7 }
   0x5   :  { %12069 = sst [smem:[#allocation57_spill]] %s11973_s11 }
   0x6   :  { %16 = vsyncpa [#allocation3], 0 }
   0x7   :  { %18 = vsyncpa [#allocation3 + $0x1], 0 }
   0x8   :  { %19 = vsyncpa [#allocation6], 0 }
   0x9   :  { %21 = vsyncpa [#allocation6 + $0x1], 0 }
   0xa   :  { %22 = vsyncpa [#allocation9], 0 }
   0xb   :  { %23 = vsyncpa [#allocation12], 0 }
   0xc   :  { %24 = vsyncpa [#allocation4], 0 }
   0xd   :  { %26 = vsyncpa [#allocation4 + $0x1], 0  ;;  %s10127_s17 = smov 0   ;;  %s10129_s18 = smov 0  }
   0xe   :  { %s10131_s19 = smov 0   ;;  %s10133_s20 = smov 0  }
   0xf   :  { %s10135_s21 = smov 0   ;;  %s10137_s22 = smov 0  }
  0x10 LB: > { %12070 = sst [smem:[#allocation20_spill]] %s10019_s17  ;;  %s10158_s23 = sadd.s32 4294967295, %s10039_s22   ;;  %s10039_s22 = sphi %s10137_s22, %s32_s22   ;;  %s10035_s21 = sphi %s10135_s21, %s12261_s21   ;;  %s10031_s20 = sphi %s10133_s20, %s12260_s20   ;;  %s10027_s19 = sphi %s10131_s19, %s12264_s19   ;;  %s10023_s18 = sphi %s10129_s18, %s12263_s18   ;;  %s10019_s17 = sphi %s10127_s17, %s12262_s17  }
  0x11   : > { %12071 = sst [smem:[#allocation21_spill]] %s10031_s20  ;;  %s8434_s24 = sadd.s32 4294967294, %s10039_s22  }
  0x12   : > { %12072 = sst [smem:[#allocation22_spill]] %s10035_s21  ;;  %p66_p0 = scmp.ne.s32.totalorder %s10023_s18, %s10019_s17 }
  0x13   : > { %12073 = sst [smem:[#allocation23_spill]] %s10039_s22  ;;  %p11975_p1 = scmp.eq.s32.totalorder %s10158_s23, 0 }
  0x14   : > { %p316_p2 = scmp.eq.s32.totalorder %s10158_s23, 1  ;;  %p322_p3 = scmp.eq.s32.totalorder %s8434_s24, 1 }
  0x15   : > { %p10167_p4 = por %p11975_p1, %p66_p0  ;;  %p8435_p5 = scmp.ge.s32.totalorder %s10039_s22, 1 }
  0x16   : > { %p10172_p6 = por %p322_p3, %p66_p0  ;;  %p329_p7 = scmp.lt.s32.totalorder %s10039_s22, 3 }
  0x17   : > { %s10041_s28 = smov [#allocation8]   ;;  %s10042_s12 = smov [#allocation11]  }
  0x18   : > { %s12075_s26 = scalar_select %p10172_p6, 1, 0 }
  0x19   : > { %p10177_p8 = pnand %p8435_p5, %p329_p7  ;;  %s341_s29 = sshll.u32 %s10041_s28, 4  ;;  %s342_s29 = int_to_ptr.vmem [resolvable:$true] %s341_s29 }
  0x1a   : > { %12076 = sst [smem:[#allocation24_spill]] %s12075_s26  ;;  %s373_s13 = sshll.u32 %s10042_s12, 4  ;;  %s374_s13 = int_to_ptr.vmem [resolvable:$true] %s373_s13 }
  0x1b   : > { %p9600_p9 = pneg %p10177_p8  ;;  %s9770_s14 = scalar_lea.vmem %s342_s29, 512 }
  0x1c   : > { %p9771_p13 = scmp.ne.s32.totalorder %s342_s29, %s9770_s14  ;;  %p9778_p5 = scmp.lt.s32.totalorder %s342_s29, %s342_s29 }
  0x1d   : > { %p10186_p11 = pnand %p9600_p9, %p11975_p1  ;;  %p9779_p7 = scmp.lt.s32.totalorder %s9770_s14, %s9770_s14 }
  0x1f   : > { %p11987_p12 = pneg %p10186_p11  ;;  %p9780_p10 = por %p9779_p7, %p9778_p5 }
  0x21   : > { %p9773_p0 = pnand %p9771_p13, %p11987_p12 }
  0x23   : > { %p9774_p3 = pneg %p9773_p0 }
  0x25   : > { %p9781_p9 = pnand %p9780_p10, %p9774_p3 }
  0x27   : > { %9784 = shalt.err (!%p9781_p9)
}
  0x28   : > { %s11976_s15 = smov 128   ;;  %s11978_s16 = smov 8  }
  0x29   : > { %s12079_s3 = sld [smem:[#allocation54_spill]]  ;;  %s9796_s12 = scalar_lea.vmem %s374_s13, 512 }
  0x2a   : > { %p9797_p13 = scmp.ne.s32.totalorder %s374_s13, %s9796_s12  ;;  %p9804_p10 = scmp.lt.s32.totalorder %s374_s13, %s374_s13 }
  0x2b   : > { %p9805_p3 = scmp.lt.s32.totalorder %s9796_s12, %s9796_s12 }
  0x2c   : > { %p9799_p0 = pnand %p9797_p13, %p11987_p12 }
  0x2d   : > { %p9806_p7 = por %p9805_p3, %p9804_p10 }
  0x2e   : > { %p9800_p5 = pneg %p9799_p0 }
  0x2f   : > { %9603 = dma.hbm_to_vmem [thread:$0]  (!%p10186_p11), %s12079_s3, 512, %s342_s29, [#allocation9], %s11976_s15, %s11976_s15, %s11978_s16  }
  0x30   : > { %p9807_p9 = pnand %p9806_p7, %p9800_p5 }
  0x32   : > { %9810 = shalt.err (!%p9807_p9)
}
  0x33   : > { %s12080_s7 = sld [smem:[#allocation56_spill]]  ;;  %s44_s29 = sadd.s32 1, %s10035_s21 }
  0x34   : > { %s53_s24 = sadd.s32 1, %s10027_s19  ;;  %p46_p13 = scmp.ge.s32.totalorder %s44_s29, 2 }
  0x35   : > { %p60_p0 = scmp.ne.s32.totalorder %s10027_s19, %s10023_s18  ;;  %p61_p5 = scmp.eq.s32.totalorder %s10039_s22, 0 }
  0x36   : > { %p9631_p10 = scmp.lt.s32.totalorder %s10039_s22, 2  ;;  %s12266_s29 = smov (%p46_p13, %s44_s29), 0 }
  0x37   : > { %12081 = sst [smem:[#allocation25_spill]] %s12266_s29  ;;  %p62_p3 = por %p61_p5, %p60_p0 }
  0x38   : > { %p10224_p7 = por %p316_p2, %p60_p0  ;;  %s48_s28 = ssub.s32 %s10035_s21, %s12266_s29 }
  0x39   : > { %9609 = dma.hbm_to_vmem [thread:$0]  (!%p10186_p11), %s12080_s7, 512, %s374_s13, [#allocation12], %s11976_s15, %s11976_s15, %s11978_s16  }
  0x3a   : > { %s12082_s26 = scalar_select %p10224_p7, 1, 0 }
  0x3b   : > { %s11982_s12 = sand.u32 1, %s10027_s19   ;;  %p51_p9 = scmp.eq.s32.totalorder %s48_s28, 0 }
  0x3c   : > { %12083 = sst [smem:[#allocation26_spill]] %s12082_s26  ;;  %s10233_s13 = sshll.u32 %s11982_s12, 5 }
  0x3d   : > { %s10236_s14 = sshll.u32 %s10035_s21, 9  ;;  %p10238_p1 = pnand %p9631_p10, %p62_p3 }
  0x3e   : > { %s10243_s16 = scalar_select %p51_p9, %s10027_s19, %s53_s24  }
  0x3f   : > { %s428_s3 = sand.u32 1, %s10039_s22   ;;  %s12086_s1 = sld [smem:[#allocation53_spill]] }
  0x40   : > { %12085 = sst [smem:[#allocation27_spill]] %s10243_s16  ;;  %s432_s17 = scalar_lea.vmem [#allocation5], %s10233_s13 }
  0x41   : > { %s440_s12 = sshll.u32 %s432_s17, 4  ;;  %s10251_s11 = scalar_lea.sflag [#allocation6], %s428_s3  ;;  %s441_s12 = int_to_ptr.vmem [resolvable:$true] %s440_s12 }
  0x42   : > { %p11988_p2 = pneg %p10238_p1  ;;  %s9824_s21 = scalar_lea.vmem %s441_s12, 512 }
  0x43   : > { %p9825_p13 = scmp.ne.s32.totalorder %s441_s12, %s9824_s21  ;;  %s10045_s24 = smov [#allocation5]  }
  0x44   : > { %s9829_s16 = sshll.u32 %s10045_s24, 4  ;;  %s9830_s16 = int_to_ptr.vmem [resolvable:$false] %s9829_s16 }
  0x45   : > { %s439_s28 = scalar_lea.hbm %s12086_s1, %s10236_s14  ;;  %p9827_p0 = pnand %p9825_p13, %p11988_p2 }
  0x46   : > { %s9831_s22 = scalar_lea.vmem %s9830_s16, 1024  ;;  %p9832_p10 = scmp.lt.s32.totalorder %s441_s12, %s9830_s16 }
  0x47   : > { %p9828_p5 = pneg %p9827_p0  ;;  %p9833_p3 = scmp.lt.s32.totalorder %s9831_s22, %s9824_s21 }
  0x49   : > { %p9834_p9 = por %p9833_p3, %p9832_p10 }
  0x4b   : > { %p9835_p12 = pnand %p9834_p9, %p9828_p5 }
  0x4d   : > { %9838 = shalt.err (!%p9835_p12)
}
  0x4e   : > { %s11989_s7 = smov 64   ;;  %s11991_s3 = smov 4  }
  0x4f   : > { %9619 = dma.hbm_to_vmem [thread:$0]  (!%p10238_p1), %s439_s28, 512, %s441_s12, %s10251_s11, %s11989_s7, %s11989_s7, %s11991_s3  }
  0x50   : > { %s10048_s17 = smov [#allocation10]   ;;  %s10049_s24 = smov [#allocation13]  }
  0x51   : > { %s357_s29 = sshll.u32 %s10048_s17, 4  ;;  %s389_s1 = sshll.u32 %s10049_s24, 4  ;;  %s358_s29 = int_to_ptr.vmem [resolvable:$true] %s357_s29  ;;  %s390_s1 = int_to_ptr.vmem [resolvable:$true] %s389_s1 }
  0x52   : > { %s9850_s16 = scalar_lea.vmem %s358_s29, 512  ;;  %p12087_p0 = pneg %p10186_p11 }
  0x53   : > { %p9851_p13 = scmp.ne.s32.totalorder %s358_s29, %s9850_s16  ;;  %p9858_p10 = scmp.lt.s32.totalorder %s358_s29, %s358_s29 }
  0x54   : > { %p9859_p3 = scmp.lt.s32.totalorder %s9850_s16, %s9850_s16 }
  0x55   : > { %p9853_p12 = pnand %p9851_p13, %p12087_p0 }
  0x56   : > { %p9860_p9 = por %p9859_p3, %p9858_p10 }
  0x57   : > { %p9854_p5 = pneg %p9853_p12 }
  0x59   : > { %p9861_p2 = pnand %p9860_p9, %p9854_p5 }
  0x5b   : > { %9864 = shalt.err (!%p9861_p2)
}
  0x5c   : > { %s12088_s21 = smov 8   ;;  %s12089_s22 = smov 128  }
  0x5d   : > { %s12090_s5 = sld [smem:[#allocation55_spill]]  ;;  %s9876_s17 = scalar_lea.vmem %s390_s1, 512 }
  0x5e   : > { %p9877_p6 = scmp.ne.s32.totalorder %s390_s1, %s9876_s17  ;;  %p12091_p13 = pmov %p12087_p0 }
  0x5f   : > { %p9884_p10 = scmp.lt.s32.totalorder %s390_s1, %s390_s1  ;;  %p9885_p5 = scmp.lt.s32.totalorder %s9876_s17, %s9876_s17 }
  0x60   : > { %p9879_p0 = pnand %p9877_p6, %p12091_p13 }
  0x61   : > { %p9886_p2 = por %p9885_p5, %p9884_p10 }
  0x62   : > { %p9880_p12 = pneg %p9879_p0 }
  0x63   : > { %9606 = dma.hbm_to_vmem [thread:$0]  (!%p10186_p11), %s12090_s5, 512, %s358_s29, [#allocation9], %s12089_s22, %s12089_s22, %s12088_s21  }
  0x64   : > { %p9887_p3 = pnand %p9886_p2, %p9880_p12 }
  0x66   : > { %9890 = shalt.err (!%p9887_p3)
}
  0x67   : > { %9612 = dma.hbm_to_vmem [thread:$0]  (!%p10186_p11), %s11971_s9, 512, %s390_s1, [#allocation12], %s12089_s22, %s12089_s22, %s12088_s21  }
  0x68   : > { %s417_s28 = scalar_lea.hbm %s11962_s0, %s10236_s14  ;;  %s410_s17 = scalar_lea.vmem [#allocation2], %s10233_s13 }
  0x69   : > { %s418_s7 = sshll.u32 %s410_s17, 4  ;;  %s461_s5 = scalar_lea.hbm %s11964_s2, %s10236_s14  ;;  %s419_s7 = int_to_ptr.vmem [resolvable:$true] %s418_s7 }
  0x6a   : > { %s12092_s26 = sand.u32 1, %s10027_s19   ;;  %s9904_s24 = scalar_lea.vmem %s419_s7, 512 }
  0x6b   : > { %s407_s20 = scalar_lea.sflag [#allocation3], %s12092_s26  ;;  %p9905_p6 = scmp.ne.s32.totalorder %s419_s7, %s9904_s24 }
  0x6c   : > { %p12093_p9 = pneg %p10238_p1  ;;  %s10050_s1 = smov [#allocation2]  }
  0x6d   : > { %s9909_s21 = sshll.u32 %s10050_s1, 4  ;;  %s9910_s21 = int_to_ptr.vmem [resolvable:$false] %s9909_s21 }
  0x6e   : > { %p9907_p13 = pnand %p9905_p6, %p12093_p9  ;;  %s9911_s22 = scalar_lea.vmem %s9910_s21, 1024 }
  0x6f   : > { %p9912_p11 = scmp.lt.s32.totalorder %s419_s7, %s9910_s21  ;;  %p9913_p12 = scmp.lt.s32.totalorder %s9911_s22, %s9904_s24 }
  0x70   : > { %p9908_p0 = pneg %p9907_p13 }
  0x71   : > { %p9914_p10 = por %p9913_p12, %p9912_p11 }
  0x73   : > { %p9915_p5 = pnand %p9914_p10, %p9908_p0 }
  0x75   : > { %9918 = shalt.err (!%p9915_p5)
}
  0x76   : > { %s12094_s3 = smov 4   ;;  %s12095_s16 = smov 64  }
  0x77   : > { %9616 = dma.hbm_to_vmem [thread:$0]  (!%p10238_p1), %s417_s28, 512, %s419_s7, %s407_s20, %s12095_s16, %s12095_s16, %s12094_s3  }
  0x78   : > { %s454_s26 = scalar_lea.vmem [#allocation7], %s10233_s13  ;;  %p12096_p3 = pmov %p12093_p9 }
  0x79   : > { %s462_s29 = sshll.u32 %s454_s26, 4  ;;  %s10051_s17 = smov [#allocation7]   ;;  %s463_s29 = int_to_ptr.vmem [resolvable:$true] %s462_s29 }
  0x7a   : > { %s9932_s12 = scalar_lea.vmem %s463_s29, 512  ;;  %s9937_s30 = sshll.u32 %s10051_s17, 4  ;;  %s9938_s30 = int_to_ptr.vmem [resolvable:$false] %s9937_s30 }
  0x7b   : > { %p9933_p2 = scmp.ne.s32.totalorder %s463_s29, %s9932_s12  ;;  %s9939_s24 = scalar_lea.vmem %s9938_s30, 1024 }
  0x7c   : > { %p9940_p13 = scmp.lt.s32.totalorder %s463_s29, %s9938_s30  ;;  %p9941_p0 = scmp.lt.s32.totalorder %s9939_s24, %s9932_s12 }
  0x7d   : > { %p9935_p6 = pnand %p9933_p2, %p12096_p3 }
  0x7e   : > { %p9942_p11 = por %p9941_p0, %p9940_p13 }
  0x7f   : > { %p9936_p9 = pneg %p9935_p6 }
  0x81   : > { %p9943_p12 = pnand %p9942_p11, %p9936_p9 }
  0x83   : > { %9946 = shalt.err (!%p9943_p12)
}
  0x84   : > { %9622 = dma.hbm_to_vmem [thread:$0]  (!%p10238_p1), %s461_s5, 512, %s463_s29, %s10251_s11, %s12095_s16, %s12095_s16, %s12094_s3  }
  0x85   : > { %474 = sbr.rel (%p10177_p8) target bundleno = 10628 (0x2984), region = 64 }
  0x8a   : > { %s10323_s7 = sand.u32 1, %s10023_s18  }
  0x8b   : > { %s10326_s15 = sshll.u32 %s10323_s7, 5  ;;  %s477_s28 = scalar_lea.sflag [#allocation3], %s10323_s7 }
  0x8c   : > { %s10330_s1 = scalar_lea.vmem [#allocation2], %s10326_s15 }
  0x8d   : > { %9998 = dma.done.wait (%p10167_p4), %s477_s28, 512  }
  0x8e   : > { %10000 = vsyncadd (%p10167_p4), %s477_s28, 4294966784  ;;  %s485_s5 = sand.u32 1, %s10158_s23   ;;  %s10338_s27 = scalar_lea.vmem [#allocation5], %s10326_s15 }
  0x8f   : > { %s486_s11 = scalar_lea.sflag [#allocation6], %s485_s5 }
  0x90   : > { %10002 = dma.done.wait (%p10167_p4), %s486_s11, 1024  }
  0x91   : > { %10004 = vsyncadd (%p10167_p4), %s486_s11, 4294966272  ;;  %s10345_s14 = scalar_lea.vmem [#allocation7], %s10326_s15  ;;  %p12097_p1 = scmp.eq.s32.totalorder %s10158_s23, 0 }
  0x93   : > { %10006 = dma.done.wait (%p12097_p1), [#allocation9], 1024   ;;  %p12098_p8 = pmov %p12097_p1 }
  0x94   : > { %p12099_p10 = pmov %p12097_p1 }
  0x95   : > { %10008 = vsyncadd (%p12098_p8), [#allocation9], 4294966272 }
  0x96   : > { %10010 = dma.done.wait (%p12099_p10), [#allocation12], 1024   ;;  %p12100_p5 = pmov %p12097_p1 }
  0x97   : > { %v12009_v0 = vmov 0.0   ;;  %vm10053_vm0 = vmmov 0   ;;  %vm624_vm1 = vcmask 1041409   ;;  %v592_v1 = vld [vmem:[#allocation8 + $0x18] sm:$0xff]  ;;  %v591_v2 = vld [vmem:[#allocation8 + $0x10] sm:$0xff]  ;;  %v590_v3 = vld [vmem:[#allocation8 + $0x8] sm:$0xff] }
  0x98   : > { %10012 = vsyncadd (%p12100_p5), [#allocation12], 4294966272  ;;  %8820 = vmatprep.subr.mxu0 %v12009_v0  ;;  %8831 = vmatprep.subr.mxu1 %v12009_v0  ;;  %vm12057_vm2 = vcmask 1042434   ;;  %vm12056_vm3 = vcmask 1043459   ;;  %vm12037_vm4 = vcmask 1044484   ;;  %v10361_v4 = vand.u32 4294901760, %v592_v1 }
  0x99   : > { %8828 = vmatprep.mubr.msk.f32.mxu0 %vm10053_vm0, %v12009_v0  ;;  %8839 = vmatprep.mubr.msk.f32.mxu1 %vm10053_vm0, %v12009_v0  ;;  %v10363_v5 = vand.u32 4294901760, %v591_v2  ;;  %v10365_v6 = vand.u32 4294901760, %v590_v3  ;;  %v589_v7 = vld [vmem:[#allocation8] sm:$0xff]  ;;  %v10376_v11 = vld [vmem:[%s10330_s1 + $0x8] sm:$0xf]  ;;  %vm12036_vm5 = vcmask 1045509  }
  0x9a   : > { %v10368_v8 = vld [vmem:[%s10330_s1] sm:$0xf]  ;;  %v10370_v9 = vand.u32 4294901760, %v589_v7  ;;  %v10373_v10 = vld [vmem:[%s10330_s1 + $0x4] sm:$0xf]  ;;  %8821 = vmatpush3.msra.mxu0 %v10361_v4  ;;  %v10380_v12 = vsub.f32 %v592_v1, %v10361_v4  ;;  %v626_v21 = vrot.slane %v10376_v11, 6 }
  0x9b   : > { %v10383_v13 = vsub.f32 %v591_v2, %v10363_v5  ;;  %v10386_v14 = vsub.f32 %v590_v3, %v10365_v6  ;;  %v10389_v15 = vld [vmem:[%s10330_s1 + $0xc] sm:$0xf]  ;;  %v10392_v16 = vld [vmem:[%s10330_s1 + $0x10] sm:$0xf]  ;;  %v10395_v17 = vld [vmem:[%s10330_s1 + $0x14] sm:$0xf]  ;;  %8822 = vmatprep.subr.mxu0 %v12009_v0 }
  0x9c   : > { %v10399_v18 = vsub.f32 %v589_v7, %v10370_v9  ;;  %v10402_v19 = vld [vmem:[%s10330_s1 + $0x18] sm:$0xf]  ;;  %v623_v20 = vrot.slane %v10373_v10, 7  ;;  %vm12035_vm6 = vcmask 1046534   ;;  %v10407_v22 = vand.u32 4294901760, %v10380_v12  ;;  %8823 = vmatpush3.msra.mxu0 %v10363_v5  ;;  %s10054_s26 = smov 124  }
  0x9d   : > { %v10411_v23 = vand.u32 4294901760, %v10383_v13  ;;  %v10414_v24 = vand.u32 4294901760, %v10386_v14  ;;  %v10417_v25 = vld [vmem:[%s10330_s1 + $0x1c] sm:$0xf]  ;;  %v629_v26 = vrot.slane %v10389_v15, 5  ;;  %8824 = vmatprep.subr.mxu0 %v12009_v0  ;;  %v632_v29 = vrot.slane %v10392_v16, 4 }
  0x9e   : > { %v10422_v27 = vand.u32 4294901760, %v10399_v18  ;;  %v625_v28 = vsel %vm624_vm1, %v623_v20, %v10368_v8  ;;  %v635_v30 = vrot.slane %v10395_v17, 3  ;;  %v754_v31 = vsub.f32 %v10380_v12, %v10407_v22  ;;  %8825 = vmatpush3.msra.mxu0 %v10365_v6  ;;  %v10441_v38 = vld [vmem:[%s10338_s27 + $0x4] sm:$0xf]  ;;  %v10452_v43 = vld [vmem:[%s10338_s27 + $0x8] sm:$0xf] }
  0x9f   : > { %v761_v32 = vsub.f32 %v10383_v13, %v10411_v23  ;;  %v768_v33 = vsub.f32 %v10386_v14, %v10414_v24  ;;  %v628_v34 = vsel %vm12057_vm2, %v626_v21, %v625_v28  ;;  %8826 = vmatprep.subr.mxu0 %v12009_v0  ;;  %v638_v36 = vrot.slane %v10402_v19, 2  ;;  %v10457_v45 = vld [vmem:[%s10338_s27] sm:$0xf]  ;;  %v10467_v50 = vld [vmem:[%s10338_s27 + $0xc] sm:$0xf]  ;;  %v597_v21 = vld [vmem:[#allocation10 + $0x18] sm:$0xff] }
  0xa0   : > { %v631_v35 = vsel %vm12056_vm3, %v629_v26, %v628_v34  ;;  %v641_v37 = vrot.slane %v10417_v25, 1  ;;  %vm12030_vm7 = vcmask 1047559   ;;  %v10443_v39 = vand.u32 4294901760, %v754_v31  ;;  %8827 = vmatpush3.msra.mxu0 %v10370_v9  ;;  %v10470_v51 = vld [vmem:[%s10338_s27 + $0x10] sm:$0xf]  ;;  %v595_v34 = vld [vmem:[#allocation10 + $0x8] sm:$0xff] }
  0xa1   : > { %v10445_v40 = vand.u32 4294901760, %v761_v32  ;;  %v775_v41 = vsub.f32 %v10399_v18, %v10422_v27  ;;  %v634_v42 = vsel %vm12037_vm4, %v632_v29, %v631_v35  ;;  %8842 = vmatprep.subr.mxu0 %v12009_v0  ;;  %vm12034_vm8 = vcmask 261120   ;;  %v10478_v55 = vld [vmem:[%s10338_s27 + $0x14] sm:$0xf]  ;;  %v10486_v58 = vld [vmem:[%s10338_s27 + $0x18] sm:$0xf] }
  0xa2   : > { %12101 = vst [vmem:[#allocation28_spill] sm:$0xff] %v10443_v39  ;;  %v637_v44 = vsel %vm12036_vm5, %v635_v30, %v634_v42  ;;  %8832 = vmatpush3.msra.mxu1 %v10443_v39  ;;  %v10460_v46 = vand.u32 4294901760, %v768_v33  ;;  %v1146_v48 = vrot.slane %v10441_v38, 7  ;;  %v1148_v52 = vrot.slane %v10452_v43, 6  ;;  %v10495_v63 = vld [vmem:[%s10338_s27 + $0x1c] sm:$0xf] }
  0xa3   : > { %12102 = vst [vmem:[#allocation29_spill] sm:$0xff] %v10445_v40  ;;  %v640_v47 = vsel %vm12035_vm6, %v638_v36, %v637_v44  ;;  %8833 = vmatprep.subr.mxu1 %v12009_v0  ;;  %v10474_v53 = vand.u32 4294901760, %v775_v41  ;;  %v1150_v60 = vrot.slane %v10467_v50, 5  ;;  %v1152_v61 = vrot.slane %v10470_v51, 4  ;;  %v596_v31 = vld [vmem:[#allocation10 + $0x10] sm:$0xff]  ;;  %s10055_s29 = smov 4  }
  0xa4   : > { %12103 = vst [vmem:[#allocation30_spill] sm:$0xff] %v10460_v46  ;;  %v643_v49 = vsel %vm12030_vm7, %v641_v37, %v640_v47  ;;  %8834 = vmatpush3.msra.mxu1 %v10445_v40  ;;  %v1147_v56 = vsel %vm624_vm1, %v1146_v48, %v10457_v45  ;;  %v1154_v1 = vrot.slane %v10478_v55, 3  ;;  %v1156_v3 = vrot.slane %v10486_v58, 2  ;;  %v594_v37 = vld [vmem:[#allocation10] sm:$0xff]  ;;  %s10056_s12 = smov 126   ;;  %s10057_s17 = smov 6  }
  0xa5   : > { %12104 = vst [vmem:[#allocation31_spill] sm:$0xff] %v10474_v53  ;;  %v645_v54 = vsel %vm12034_vm8, %v643_v49, 0  ;;  %8835 = vmatprep.subr.mxu1 %v12009_v0  ;;  %v1149_v59 = vsel %vm12057_vm2, %v1148_v52, %v1147_v56  ;;  %v1158_v28 = vrot.slane %v10495_v63, 1  ;;  %v10513_v33 = vand.u32 4294901760, %v597_v21  ;;  %v10741_v39 = vld [vmem:[%s11968_s6] ss:$0 sm:$0xff] }
  0xa6   : > { %v10483_v57 = vand.u32 4294901760, %v645_v54  ;;  %8836 = vmatpush3.msra.mxu1 %v10460_v46  ;;  %v1151_v2 = vsel %vm12056_vm3, %v1150_v60, %v1149_v59  ;;  %v10518_v36 = vand.u32 4294901760, %v596_v31  ;;  %v10528_v42 = vand.u32 4294901760, %v595_v34  ;;  %12122 = vst [vmem:[#allocation49_spill] sm:$0xff] %v10741_v39  ;;  %s10058_s30 = smov 7   ;;  %s10059_s24 = smov 127  }
  0xa7   : > { %8837 = vmatprep.subr.mxu1 %v12009_v0  ;;  %v1153_v20 = vsel %vm12037_vm4, %v1152_v61, %v1151_v2  ;;  %v10526_v41 = vsub.f32 %v597_v21, %v10513_v33  ;;  %v10537_v48 = vand.u32 4294901760, %v594_v37  ;;  %vm2206_vm9 = vcmask 31744   ;;  %s10060_s20 = smov 1   ;;  %s10061_s13 = smov 121  }
  0xa8   : > { %v717_v62 = vsub.f32 %v645_v54, %v10483_v57  ;;  %8838 = vmatpush3.msra.mxu1 %v10474_v53  ;;  %v1155_v26 = vsel %vm12036_vm5, %v1154_v1, %v1153_v20  ;;  %v10535_v47 = vsub.f32 %v596_v31, %v10518_v36  ;;  %v10549_v54 = vsub.f32 %v595_v34, %v10528_v42  ;;  %v10675_v31 = vld [vmem:[%s10345_s14 + $0x4] sm:$0xf]  ;;  %s10062_s28 = smov 122   ;;  %s10063_s5 = smov 2  }
  0xa9   : > { %8853 = vmatprep.subr.mxu1 %v12009_v0  ;;  %8840 = vmatmul.mubr.f32.vlgmr.msra.gmra.mxu1 %v10483_v57  ;;  %v1157_v30 = vsel %vm12035_vm6, %v1156_v3, %v1155_v26  ;;  %v10546_v52 = vand.u32 4294901760, %v10526_v41  ;;  %v10558_v59 = vsub.f32 %v594_v37, %v10537_v48  ;;  %12109 = vst [vmem:[#allocation36_spill] sm:$0xff] %v10675_v31  ;;  %v1661_v34 = vrot.slane %v10675_v31, 7  ;;  %v10684_v37 = vld [vmem:[%s10345_s14] sm:$0xf]  ;;  %s11061_s25 = scalar_lea.vmem [#allocation14], %s10326_s15 }
  0xaa   : > { %v718_v7 = vand.u32 4294901760, %v717_v62  ;;  %8854 = vmatpush3.msra.mxu1 %v10361_v4  ;;  %8861 = vmatprep.mubr.msk.f32.mxu1 %vm10053_vm0, %v12009_v0  ;;  %v1159_v35 = vsel %vm12030_vm7, %v1158_v28, %v1157_v30  ;;  %v10555_v56 = vand.u32 4294901760, %v10535_v47  ;;  %12112 = vst [vmem:[#allocation39_spill] sm:$0xff] %v10684_v37  ;;  %vm12028_vm10 = vcmask 48128   ;;  %s10065_s23 = smov [#allocation14]  }
  0xab   : > { %8855 = vmatprep.subr.mxu1 %v12009_v0  ;;  %v1160_v44 = vsel %vm12034_vm8, %v1159_v35, 0  ;;  %v1269_v61 = vsub.f32 %v10526_v41, %v10546_v52  ;;  %v10580_v2 = vand.u32 4294901760, %v10558_v59  ;;  %v10681_v35 = vld [vmem:[#allocation11 + $0x18] sm:$0xff]  ;;  %vm12027_vm11 = vcmask 56320   ;;  %s9951_s15 = sshll.u32 %s10065_s23, 4  ;;  %s9952_s15 = int_to_ptr.vmem [resolvable:$false] %s9951_s15 }
  0xac   : > { %v719_v29 = vsub.f32 %v717_v62, %v718_v7  ;;  %8856 = vmatpush3.msra.mxu1 %v10363_v5  ;;  %v10541_v49 = vand.u32 4294901760, %v1160_v44  ;;  %v1276_v1 = vsub.f32 %v10535_v47, %v10555_v56  ;;  %12111 = vst [vmem:[#allocation38_spill] sm:$0xff] %v10681_v35  ;;  %vm2239_vm12 = vcmask 57344  }
  0xad   : > { %8857 = vmatprep.subr.mxu1 %v12009_v0  ;;  %v1290_v26 = vsub.f32 %v10558_v59, %v10580_v2 }
  0xae   : > { %v720_v32 = vand.u32 4294901760, %v719_v29  ;;  %8858 = vmatpush3.msra.mxu1 %v10365_v6  ;;  %v10563_v60 = vsub.f32 %v1160_v44, %v10541_v49  ;;  %v10596_v21 = vand.u32 4294901760, %v1276_v1  ;;  %v10687_v44 = vld [vmem:[%s10345_s14 + $0xc] sm:$0xf] }
  0xaf   : > { %8859 = vmatprep.subr.mxu1 %v12009_v0  ;;  %v10611_v30 = vand.u32 4294901760, %v1290_v26  ;;  %12113 = vst [vmem:[#allocation40_spill] sm:$0xff] %v10687_v44  ;;  %v1665_v1 = vrot.slane %v10687_v44, 5  ;;  %v10712_v44 = vld [vmem:[#allocation11 + $0x8] sm:$0xff] }
  0xb0   : > { %8829 = vmatmul.mubr.f32.vlgmr.msra.gmra.mxu0 %v720_v32  ;;  %8860 = vmatpush3.msra.mxu1 %v10370_v9  ;;  %v1233_v3 = vand.u32 4294901760, %v10563_v60  ;;  %12106 = vst [vmem:[#allocation33_spill] sm:$0xff] %v10596_v21  ;;  %v10678_v32 = vld [vmem:[%s10345_s14 + $0x8] sm:$0xf]  ;;  %12118 = vst [vmem:[#allocation45_spill] sm:$0xff] %v10712_v44 }
  0xb1   : > { %8843 = vmatpush3.msra.mxu0 %v10380_v12  ;;  %8850 = vmatprep.mubr.msk.f32.mxu0 %vm10053_vm0, %v12009_v0  ;;  %12108 = vst [vmem:[#allocation35_spill] sm:$0xff] %v10611_v30  ;;  %12110 = vst [vmem:[#allocation37_spill] sm:$0xff] %v10678_v32 }
  0xb2   : > { %8844 = vmatprep.subr.mxu0 %v12009_v0  ;;  %8875 = vmatprep.subr.mxu1 %v12009_v0  ;;  %v1234_v28 = vsub.f32 %v10563_v60, %v1233_v3 }
  0xb3   : > { %8845 = vmatpush3.msra.mxu0 %v10383_v13  ;;  %8862 = vmatmul.mubr.f32.vlgmr.msra.gmra.mxu1 %v718_v7  ;;  %v10588_v7 = vand.u32 4294901760, %v1269_v61  ;;  %v1662_v61 = vsel %vm624_vm1, %v1661_v34, %v10684_v37  ;;  %v10717_v37 = vld [vmem:[%s10345_s14 + $0x1c] sm:$0xf] }
  0xb4   : > { %8846 = vmatprep.subr.mxu0 %v12009_v0  ;;  %8876 = vmatpush3.msra.mxu1 %v10361_v4  ;;  %12120 = vst [vmem:[#allocation47_spill] sm:$0xff] %v10717_v37 }
  0xb5   : > { %8847 = vmatpush3.msra.mxu0 %v10386_v14  ;;  %8877 = vmatprep.subr.mxu1 %v12009_v0  ;;  %12105 = vst [vmem:[#allocation32_spill] sm:$0xff] %v10588_v7 }
  0xb6   : > { %8848 = vmatprep.subr.mxu0 %v12009_v0  ;;  %8878 = vmatpush3.msra.mxu1 %v10363_v5 }
  0xb7   : > { %8849 = vmatpush3.msra.mxu0 %v10399_v18  ;;  %8879 = vmatprep.subr.mxu1 %v12009_v0 }
  0xb8   : > { %8851 = vmatmul.mubr.f32.vlgmr.msra.gmra.mxu0 %v717_v62  ;;  %8864 = vmatprep.subr.mxu0 %v12009_v0  ;;  %v10570_v62 = vand.u32 4294901760, %v10549_v54 }
  0xb9   : > { %8865 = vmatpush3.msra.mxu0 %v10407_v22  ;;  %8880 = vmatpush3.msra.mxu1 %v10365_v6 }
  0xba   : > { %8866 = vmatprep.subr.mxu0 %v12009_v0  ;;  %8881 = vmatprep.subr.mxu1 %v12009_v0  ;;  %v1283_v20 = vsub.f32 %v10549_v54, %v10570_v62 }
  0xbb   : > { %8867 = vmatpush3.msra.mxu0 %v10411_v23  ;;  %8872 = vmatprep.mubr.msk.f32.mxu0 %vm10053_vm0, %v12009_v0 }
  0xbc   : > { %8868 = vmatprep.subr.mxu0 %v12009_v0  ;;  %8882 = vmatpush3.msra.mxu1 %v10370_v9  ;;  %v10605_v29 = vand.u32 4294901760, %v1283_v20  ;;  %v10701_v20 = vld [vmem:[%s10345_s14 + $0x14] sm:$0xf] }
  0xbd   : > { %8869 = vmatpush3.msra.mxu0 %v10414_v24  ;;  %8883 = vmatprep.mubr.msk.f32.mxu1 %vm10053_vm0, %v12009_v0  ;;  %12116 = vst [vmem:[#allocation43_spill] sm:$0xff] %v10701_v20  ;;  %v1669_v34 = vrot.slane %v10701_v20, 3 }
  0xbe   : > { %8870 = vmatprep.subr.mxu0 %v12009_v0  ;;  %8897 = vmatprep.subr.mxu1 %v12009_v0  ;;  %12107 = vst [vmem:[#allocation34_spill] sm:$0xff] %v10605_v29 }
  0xbf   : > { %8871 = vmatpush3.msra.mxu0 %v10422_v27  ;;  %8884 = vmatmul.mubr.f32.vlgmr.msra.gmra.mxu1 %v10483_v57 }
  0xc0   : > { %8873 = vmatmul.mubr.f32.vlgmr.msra.gmra.mxu0 %v10483_v57  ;;  %8886 = vmatprep.subr.mxu0 %v12009_v0  ;;  %v1235_v57 = vand.u32 4294901760, %v1234_v28 }
  0xc1   : > { %8887 = vmatpush3.msra.mxu0 %v10513_v33  ;;  %8898 = vmatpush3.msra.mxu1 %v10588_v7 }
  0xc2   : > { %8888 = vmatprep.subr.mxu0 %v12009_v0  ;;  %8899 = vmatprep.subr.mxu1 %v12009_v0 }
  0xc3   : > { %8889 = vmatpush3.msra.mxu0 %v10518_v36  ;;  %8900 = vmatpush3.msra.mxu1 %v10596_v21 }
  0xc4   : > { %8890 = vmatprep.subr.mxu0 %v12009_v0  ;;  %8901 = vmatprep.subr.mxu1 %v12009_v0 }
  0xc5   : > { %8891 = vmatpush3.msra.mxu0 %v10528_v42  ;;  %8902 = vmatpush3.msra.mxu1 %v10605_v29 }
  0xc6   : > { %8892 = vmatprep.subr.mxu0 %v12009_v0  ;;  %8903 = vmatprep.subr.mxu1 %v12009_v0 }
  0xc7   : > { %8893 = vmatpush3.msra.mxu0 %v10537_v48  ;;  %8894 = vmatprep.mubr.msk.f32.mxu0 %vm10053_vm0, %v12009_v0 }
  0xc8   : > { %8904 = vmatpush3.msra.mxu1 %v10611_v30  ;;  %8895 = vmatmul.mubr.f32.vlgmr.msra.gmra.mxu0 %v1235_v57  ;;  %v10707_v57 = vld [vmem:[%s10345_s14 + $0x18] sm:$0xf] }
  0xc9   : > { %8905 = vmatprep.mubr.msk.f32.mxu1 %vm10053_vm0, %v12009_v0  ;;  %8908 = vmatprep.subr.mxu0 %v12009_v0  ;;  %12117 = vst [vmem:[#allocation44_spill] sm:$0xff] %v10707_v57 }
  0xca   : > { %8919 = vmatprep.subr.mxu1 %v12009_v0  ;;  %8906 = vmatmul.mubr.f32.vlgmr.msra.gmra.mxu1 %v10541_v49 }
  0xcb   : > { %8909 = vmatpush3.msra.mxu0 %v10526_v41  ;;  %8920 = vmatpush3.msra.mxu1 %v10513_v33 }
  0xcc   : > { %8910 = vmatprep.subr.mxu0 %v12009_v0  ;;  %8921 = vmatprep.subr.mxu1 %v12009_v0 }
  0xcd   : > { %8911 = vmatpush3.msra.mxu0 %v10535_v47  ;;  %8922 = vmatpush3.msra.mxu1 %v10518_v36 }
  0xce   : > { %8912 = vmatprep.subr.mxu0 %v12009_v0  ;;  %8923 = vmatprep.subr.mxu1 %v12009_v0 }
  0xcf   : > { %8913 = vmatpush3.msra.mxu0 %v10549_v54  ;;  %8924 = vmatpush3.msra.mxu1 %v10528_v42 }
  0xd0   : > { %8914 = vmatprep.subr.mxu0 %v12009_v0  ;;  %8925 = vmatprep.subr.mxu1 %v12009_v0 }
  0xd1   : > { %8915 = vmatpush3.msra.mxu0 %v10558_v59  ;;  %8916 = vmatprep.mubr.msk.f32.mxu0 %vm10053_vm0, %v12009_v0 }
  0xd2   : > { %8926 = vmatpush3.msra.mxu1 %v10537_v48  ;;  %8917 = vmatmul.mubr.f32.vlgmr.msra.gmra.mxu0 %v10563_v60  ;;  %v10692_v60 = vld [vmem:[%s10345_s14 + $0x10] sm:$0xf] }
  0xd3   : > { %8927 = vmatprep.mubr.msk.f32.mxu1 %vm10053_vm0, %v12009_v0  ;;  %8930 = vmatprep.subr.mxu0 %v12009_v0  ;;  %12114 = vst [vmem:[#allocation41_spill] sm:$0xff] %v10692_v60  ;;  %v1667_v28 = vrot.slane %v10692_v60, 4 }
  0xd4   : > { %8941 = vmatprep.subr.mxu1 %v12009_v0  ;;  %8928 = vmatmul.mubr.f32.vlgmr.msra.gmra.mxu1 %v1233_v3  ;;  %v10698_v3 = vld [vmem:[#allocation11 + $0x10] sm:$0xff] }
  0xd5   : > { %8931 = vmatpush3.msra.mxu0 %v10546_v52  ;;  %8942 = vmatpush3.msra.mxu1 %v10513_v33  ;;  %12115 = vst [vmem:[#allocation42_spill] sm:$0xff] %v10698_v3 }
  0xd6   : > { %8932 = vmatprep.subr.mxu0 %v12009_v0  ;;  %8943 = vmatprep.subr.mxu1 %v12009_v0 }
  0xd7   : > { %8933 = vmatpush3.msra.mxu0 %v10555_v56  ;;  %8944 = vmatpush3.msra.mxu1 %v10518_v36 }
  0xd8   : > { %8934 = vmatprep.subr.mxu0 %v12009_v0  ;;  %8945 = vmatprep.subr.mxu1 %v12009_v0 }
  0xd9   : > { %8935 = vmatpush3.msra.mxu0 %v10570_v62  ;;  %8946 = vmatpush3.msra.mxu1 %v10528_v42 }
  0xda   : > { %8936 = vmatprep.subr.mxu0 %v12009_v0  ;;  %8947 = vmatprep.subr.mxu1 %v12009_v0 }
  0xdb   : > { %8937 = vmatpush3.msra.mxu0 %v10580_v2  ;;  %8938 = vmatprep.mubr.msk.f32.mxu0 %vm10053_vm0, %v12009_v0 }
  0xdc   : > { %8948 = vmatpush3.msra.mxu1 %v10537_v48  ;;  %8949 = vmatprep.mubr.msk.f32.mxu1 %vm10053_vm0, %v12009_v0 }
  0xdd   : > { %8939 = vmatmul.mubr.f32.vlgmr.msra.gmra.mxu0 %v10541_v49  ;;  %8950 = vmatmul.mubr.f32.vlgmr.msra.gmra.mxu1 %v10541_v49  ;;  %v1663_v49 = vrot.slane %v10678_v32, 6  ;;  %v10714_v32 = vld [vmem:[#allocation11] sm:$0xff] }
  0xde   : > { %8952 = vmatprep.subr.mxu0 %v12009_v0  ;;  %8963 = vmatprep.subr.mxu1 %v12009_v0  ;;  %12119 = vst [vmem:[#allocation46_spill] sm:$0xff] %v10714_v32 }
  0xdf   : > { %8960 = vmatprep.mubr.msk.f32.mxu0 %vm10053_vm0, %v12009_v0  ;;  %8965 = vmatprep.mubr.msk.f32.mxu1 %vm10053_vm0, %v12009_v0  ;;  %v1664_v26 = vsel %vm12057_vm2, %v1663_v49, %v1662_v61  ;;  %v1671_v61 = vrot.slane %v10707_v57, 2 }
  0xe0   : > { %8953 = vmatpush3.msra.mxu0 %v10681_v35  ;;  %v1666_v31 = vsel %vm12056_vm3, %v1665_v1, %v1664_v26  ;;  %v1673_v1 = vrot.slane %v10717_v37, 1  ;;  %v12123_v35 = vmov 0.0  }
  0xe1   : > { %8954 = vmatprep.subr.mxu0 %v12009_v0  ;;  %v1668_v49 = vsel %vm12037_vm4, %v1667_v28, %v1666_v31 }
  0xe2   : > { %8955 = vmatpush3.msra.mxu0 %v10698_v3  ;;  %v1670_v60 = vsel %vm12036_vm5, %v1669_v34, %v1668_v49 }
  0xe3   : > { %8956 = vmatprep.subr.mxu0 %v12009_v0  ;;  %v1672_v26 = vsel %vm12035_vm6, %v1671_v61, %v1670_v60  ;;  %v10735_v60 = vld [vmem:[%s11966_s4] ss:$0 sm:$0xff] }
  0xe4   : > { %8957 = vmatpush3.msra.mxu0 %v10712_v44  ;;  %v1674_v20 = vsel %vm12030_vm7, %v1673_v1, %v1672_v26  ;;  %12121 = vst [vmem:[#allocation48_spill] sm:$0xff] %v10735_v60 }
  0xe5   : > { %8958 = vmatprep.subr.mxu0 %v12009_v0 }
  0xe6   : > { %8959 = vmatpush3.msra.mxu0 %v10714_v32 }
  0xe7   : > { %8961 = vmatmul.mubr.msk.f32.vlgmr.msra.gmra.mxu0 %vm12034_vm8, %v1674_v20  ;;  %8983 = vmatprep.subr.mxu0 %v12009_v0 }
  0xe8   : > { %8985 = vmatprep.mubr.msk.f32.mxu0 %vm10053_vm0, %v12009_v0 }
 0x169   : > { %v813_v31 = vpop.f32.mrf.mxu1 }
 0x16b   : > { %v8841_v28 = vpop.f32.mrf.mxu1 }
 0x170   : > { %v722_v34 = vpop.f32.mrf.mxu0 }
 0x171   : > { %v723_v20 = vadd.f32 %v10735_v60, %v722_v34 }
 0x172   : > { %v8830_v49 = vpop.f32.mrf.mxu0 }
 0x173   : > { %v970_v37 = vpop.f32.mrf.mxu1  ;;  %v814_v21 = vadd.f32 %v813_v31, %v723_v20 }
 0x175   : > { %v8863_v57 = vpop.f32.mrf.mxu1 }
 0x178   : > { %v893_v30 = vpop.f32.mrf.mxu0 }
 0x179   : > { %v894_v7 = vadd.f32 %v893_v30, %v814_v21 }
 0x17a   : > { %v8852_v29 = vpop.f32.mrf.mxu0 }
 0x17b   : > { %v971_v28 = vadd.f32 %v970_v37, %v894_v7 }
 0x17f   : > { %v1128_v1 = vpop.f32.mrf.mxu1 }
 0x180   : > { %v1053_v61 = vpop.f32.mrf.mxu0 }
 0x181   : > { %v8885_v0 = vpop.f32.mrf.mxu1  ;;  %v1054_v49 = vadd.f32 %v1053_v61, %v971_v28 }
 0x182   : > { %v8874_v26 = vpop.f32.mrf.mxu0 }
 0x183   : > { %v1129_v29 = vadd.f32 %v1128_v1, %v1054_v49 }
 0x185   : > { %v1748_v60 = vsel %vm12034_vm8, %v1129_v29, 0 }
 0x186   : > { %v1819_v21 = vand.u32 4294901760, %v1748_v60 }
 0x188   : > { %v1237_v53 = vpop.f32.mrf.mxu0  ;;  %v1820_v20 = vsub.f32 %v1748_v60, %v1819_v21 }
 0x189   : > { %v1238_v34 = vadd.f32 %v10741_v39, %v1237_v53 }
 0x18a   : > { %v1328_v46 = vpop.f32.mrf.mxu1  ;;  %v8896_v57 = vpop.f32.mrf.mxu0  ;;  %v1821_v1 = vand.u32 4294901760, %v1820_v20 }
 0x18b   : > { %v1329_v7 = vadd.f32 %v1328_v46, %v1238_v34 }
 0x18c   : > { %v8907_v40 = vpop.f32.mrf.mxu1  ;;  %v1822_v39 = vsub.f32 %v1820_v20, %v1821_v1 }
 0x192   : > { %v1408_v26 = vpop.f32.mrf.mxu0 }
 0x193   : > { %v1409_v37 = vadd.f32 %v1408_v26, %v1329_v7 }
 0x194   : > { %v1485_v31 = vpop.f32.mrf.mxu1  ;;  %v8918_v0 = vpop.f32.mrf.mxu0 }
 0x195   : > { %v1486_v61 = vadd.f32 %v1485_v31, %v1409_v37  ;;  %v1823_v0 = vand.u32 4294901760, %v1822_v39  ;;  %v10767_v39 = vld [vmem:[%s11970_s8] ss:$0 sm:$0xff] }
 0x196   : > { %v8929_v30 = vpop.f32.mrf.mxu1 }
 0x19d   : > { %v1568_v40 = vpop.f32.mrf.mxu0  ;;  %v1643_v49 = vpop.f32.mrf.mxu1 }
 0x19e   : > { %v1569_v28 = vadd.f32 %v1568_v40, %v1486_v61 }
 0x19f   : > { %v8940_v57 = vpop.f32.mrf.mxu0  ;;  %v8951_v44 = vpop.f32.mrf.mxu1 }
 0x1a0   : > { %v1644_v32 = vadd.f32 %v1643_v49, %v1569_v28 }
 0x1a2   : > { %v1751_v53 = vsel %vm12034_vm8, %v1644_v32, 0 }
 0x1a3   : > { %v1784_v29 = vand.u32 4294901760, %v1751_v53 }
 0x1a5   : > { %v1861_v3 = vsub.f32 %v1751_v53, %v1784_v29  ;;  %8964 = vmatpush3.xpose.msra.mxu1 %v1784_v29 }
 0x1a6   : > { %8968 = vmatprep.subr.mxu1 %v12123_v35 }
 0x1a7   : > { %v1862_v46 = vand.u32 4294901760, %v1861_v3  ;;  %v1743_v32 = vpop.f32.mrf.mxu0 }
 0x1a8   : > { %8966 = vmatmul.mubr.f32.vlgmr.msra.gmra.mxu1 %v1823_v0  ;;  %v1744_v44 = vadd.f32 %v10767_v39, %v1743_v32 }
 0x1a9   : > { %8984 = vmatpush3.xpose.msra.mxu0 %v1862_v46  ;;  %v1863_v60 = vsub.f32 %v1861_v3, %v1862_v46  ;;  %8970 = vmatprep.mubr.msk.f32.mxu1 %vm10053_vm0, %v12123_v35 }
 0x1aa   : > { %8993 = vmatprep.subr.mxu0 %v12123_v35 }
 0x1ab   : > { %v1864_v34 = vand.u32 4294901760, %v1863_v60 }
 0x1ac   : > { %8986 = vmatmul.mubr.f32.vlgmr.msra.gmra.mxu0 %v1819_v21 }
 0x1ad   : > { %8969 = vmatpush3.xpose.msra.mxu1 %v1864_v34  ;;  %8995 = vmatprep.mubr.msk.f32.mxu0 %vm10053_vm0, %v12123_v35 }
 0x1ae   : > { %8973 = vmatprep.subr.mxu1 %v12123_v35  ;;  %8994 = vmatpush3.msra.mxu0 %v1744_v44 }
 0x1af   : > { %9009 = vmatprep.subr.mxu0 %v12123_v35 }
 0x1b0   : > { %8971 = vmatmul.mubr.f32.vlgmr.msra.gmra.mxu1 %v1819_v21 }
 0x1b1   : > { %8974 = vmatpush3.xpose.msra.mxu1 %v1861_v3  ;;  %8975 = vmatprep.mubr.msk.f32.mxu1 %vm10053_vm0, %v12123_v35  ;;  %v8962_v3 = vpop.f32.mrf.mxu0 }
 0x1b2   : > { %8978 = vmatprep.subr.mxu1 %v12123_v35 }
 0x1b4   : > { %8976 = vmatmul.mubr.f32.vlgmr.msra.gmra.mxu1 %v1820_v20 }
 0x1b5   : > { %8979 = vmatpush3.xpose.msra.mxu1 %v1784_v29  ;;  %8980 = vmatprep.mubr.msk.f32.mxu1 %vm10053_vm0, %v12123_v35 }
 0x1b6   : > { %8988 = vmatprep.subr.mxu1 %v12123_v35 }
 0x1b8   : > { %8981 = vmatmul.mubr.f32.vlgmr.msra.gmra.mxu1 %v1821_v1 }
 0x1b9   : > { %8989 = vmatpush3.xpose.msra.mxu1 %v1784_v29  ;;  %8990 = vmatprep.mubr.msk.f32.mxu1 %vm10053_vm0, %v12123_v35 }
 0x1ba   : > { %8998 = vmatprep.subr.mxu1 %v12123_v35 }
 0x1bc   : > { %8991 = vmatmul.mubr.f32.vlgmr.msra.gmra.mxu1 %v1819_v21 }
 0x1bd   : > { %9006 = vmatprep.mubr.msk.f32.mxu1 %vm10053_vm0, %v12123_v35 }
 0x268   : > { %v1825_v26 = vpop.f32.mrf.mxu1 }
 0x26a   : > { %v8967_v31 = vpop.f32.mrf.mxu1 }
 0x26c   : > { %v2123_v7 = vpop.f32.mrf.mxu0 }
 0x26e   : > { %v8987_v30 = vpop.f32.mrf.mxu0 }
 0x270   : > { %v1901_v21 = vpop.f32.mrf.mxu1 }
 0x271   : > { %v1902_v61 = vadd.f32 %v1901_v21, %v1825_v26 }
 0x272   : > { %v8972_v37 = vpop.f32.mrf.mxu1 }
 0x274   : > { %v1975_v20 = vpop.f32.mrf.mxu1 }
 0x275   : > { %v1976_v1 = vadd.f32 %v1975_v20, %v1902_v61 }
 0x276   : > { %v8977_v40 = vpop.f32.mrf.mxu1 }
 0x278   : > { %v2049_v28 = vpop.f32.mrf.mxu1 }
 0x279   : > { %v2050_v49 = vadd.f32 %v2049_v28, %v1976_v1 }
 0x27a   : > { %v8982_v57 = vpop.f32.mrf.mxu1 }
 0x27b   : > { %v2124_v53 = vadd.f32 %v2123_v7, %v2050_v49  ;;  %v563_v57 = vlaneseq }
 0x27c   : > { %v2195_v29 = vpop.f32.mrf.mxu1 }
 0x27d   : > { %v2196_v0 = vadd.f32 %v2195_v29, %v2124_v53  ;;  %v10782_v53 = vand.u32 127, %v563_v57 }
 0x27e   : > { %v8992_v46 = vpop.f32.mrf.mxu1 }
 0x27f   : > { %2200 = vrot.lane.b32.xlu0 %v2196_v0, %s10054_s26 }
 0x283   : > { %2203 = vrot.lane.b32.xlu0 %v2196_v0, %s10055_s29 }
 0x2f1   : > { %v2201_v60 = vpop.permute.xlu0 %2200 }
 0x2f5   : > { %v2204_v34 = vpop.permute.xlu0 %2203 }
 0x2f6   : > { %v2207_v32 = vsel %vm2206_vm9, %v2201_v60, %v2204_v34 }
 0x2f7   : > { %v2209_v44 = vrot.slane %v2207_v32, 4 }
 0x2f9   : > { %v2211_v3 = vadd.f32 %v2209_v44, %v2196_v0 }
 0x2fb   : > { %2213 = vrot.lane.b32.xlu1 %v2211_v3, %s10056_s12 }
 0x2ff   : > { %2216 = vrot.lane.b32.xlu1 %v2211_v3, %s10057_s17 }
 0x36d   : > { %v2214_v26 = vpop.permute.xlu1 %2213 }
 0x371   : > { %v2217_v31 = vpop.permute.xlu1 %2216 }
 0x372   : > { %v2220_v7 = vsel %vm12028_vm10, %v2214_v26, %v2217_v31 }
 0x373   : > { %v2222_v30 = vrot.slane %v2220_v7, 2 }
 0x375   : > { %v2224_v21 = vadd.f32 %v2222_v30, %v2211_v3 }
 0x377   : > { %2229 = vrot.lane.b32.xlu1 %v2224_v21, %s10058_s30  ;;  %2226 = vrot.lane.b32.xlu0 %v2224_v21, %s10059_s24 }
 0x3e9   : > { %v2230_v37 = vpop.permute.xlu1 %2229  ;;  %v2227_v20 = vpop.permute.xlu0 %2226 }
 0x3ea   : > { %v2233_v61 = vsel %vm12027_vm11, %v2227_v20, %v2230_v37 }
 0x3eb   : > { %v2235_v40 = vrot.slane %v2233_v61, 1 }
 0x3ed   : > { %v2237_v1 = vadd.f32 %v2235_v40, %v2224_v21 }
 0x3ef   : > { %v2238_v28 = vmul.f32 0.03125, %v2237_v1 }
 0x3f1   : > { %v2240_v49 = vsel %vm2239_vm12, %v2238_v28, -inf }
 0x3f2   : > { %2241 = vmax.xlane.f32.xlu0 %v2240_v49 }
 0x47b   : > { %v2242_v29 = vpop.xlane.xlu0 %2241 }
 0x47c   : > { %vm2243_vm13 = vcmp.eq.f32.partialorder %v2238_v28, %v2242_v29 }
 0x47d   : > { %v2244_v0 = vsel %vm2243_vm13, %v10782_v53, 8 }
 0x47e   : > { %v2245_v46 = vsel %vm2239_vm12, %v2244_v0, 2147483647 }
 0x47f   : > { %v2247_v60 = vshra.s32 %v2245_v46, 16  ;;  %v2246_v32 = vand.u32 65535, %v2245_v46 }
 0x481   : > { %v2249_v34 = vcvt.s32.f32 %v2247_v60  ;;  %v2248_v3 = vcvt.s32.f32 %v2246_v32 }
 0x483   : > { %2250 = vmin.xlane.f32.xlu1 %v2249_v34 }
 0x50c   : > { %v2251_v44 = vpop.xlane.xlu1 %2250 }
 0x50d   : > { %vm2252_vm14 = vcmp.eq.f32.partialorder %v2249_v34, %v2251_v44  ;;  %v2257_v31 = vcvt.f32.s32 %v2251_v44 }
 0x50e   : > { %v2253_v26 = vsel %vm2252_vm14, %v2248_v3, inf }
 0x50f   : > { %2254 = vmin.xlane.f32.xlu0 %v2253_v26  ;;  %v2258_v30 = vshll.u32 %v2257_v31, 16 }
 0x598   : > { %v2255_v7 = vpop.xlane.xlu0 %2254 }
 0x599   : > { %v2256_v21 = vcvt.f32.s32 %v2255_v7 }
 0x59b   : > { %v2259_v37 = vadd.s32 %v2258_v30, %v2256_v21 }
 0x59d   : > { %vm2260_vm15 = vcmp.eq.s32.totalorder %v10782_v53, %v2259_v37 }
 0x59e   : > { %v2267_v20 = vsel %vm2260_vm15, -1e+30, %v2238_v28  ;;  %v2262_v28 = vsub.s32 8, %v2259_v37  ;;  %vm2261_vm15 = vcmp.eq.s32.totalorder %v2259_v37, 0 }
 0x59f   : > { %v2268_v61 = vsel %vm2239_vm12, %v2267_v20, -inf }
 0x5a0   : > { %2269 = vmax.xlane.f32.xlu0 %v2268_v61  ;;  %v2263_v21 = vsel %vm2261_vm15, 0, %v2262_v28  ;;  %vm12029_vm15 = vcmask 15360  }
 0x5a1   : > { %vm2264_vm11 = vcmp.eq.s32.totalorder %v10782_v53, %v2263_v21 }
 0x629   : > { %v2270_v40 = vpop.xlane.xlu0 %2269 }
 0x62a   : > { %vm2271_vm13 = vcmp.eq.f32.partialorder %v2267_v20, %v2270_v40 }
 0x62b   : > { %v2272_v1 = vsel %vm2271_vm13, %v10782_v53, 8 }
 0x62c   : > { %v2273_v49 = vsel %vm2239_vm12, %v2272_v1, 2147483647  ;;  %v2265_v1 = vsel %vm2264_vm11, %v2242_v29, 0.0 }
 0x62d   : > { %v2275_v0 = vshra.s32 %v2273_v49, 16  ;;  %v2274_v60 = vand.u32 65535, %v2273_v49 }
 0x62f   : > { %v2277_v46 = vcvt.s32.f32 %v2275_v0  ;;  %v2276_v32 = vcvt.s32.f32 %v2274_v60 }
 0x631   : > { %2278 = vmin.xlane.f32.xlu1 %v2277_v46 }
 0x6ba   : > { %v2279_v34 = vpop.xlane.xlu1 %2278 }
 0x6bb   : > { %vm2280_vm14 = vcmp.eq.f32.partialorder %v2277_v46, %v2279_v34  ;;  %v2285_v3 = vcvt.f32.s32 %v2279_v34 }
 0x6bc   : > { %v2281_v44 = vsel %vm2280_vm14, %v2276_v32, inf }
 0x6bd   : > { %2282 = vmin.xlane.f32.xlu0 %v2281_v44  ;;  %v2286_v31 = vshll.u32 %v2285_v3, 16 }
 0x746   : > { %v2283_v26 = vpop.xlane.xlu0 %2282 }
 0x747   : > { %v2284_v7 = vcvt.f32.s32 %v2283_v26 }
 0x749   : > { %v2287_v30 = vadd.s32 %v2286_v31, %v2284_v7 }
 0x74b   : > { %vm2288_vm13 = vcmp.eq.s32.totalorder %v2287_v30, 0  ;;  %v2289_v20 = vsub.s32 8, %v2287_v30 }
 0x74d   : > { %v2290_v61 = vsel %vm2288_vm13, 0, %v2289_v20  ;;  %vm2334_vm13 = vcmask 1041408  }
 0x74e   : > { %vm2291_vm10 = vcmp.eq.s32.totalorder %v10782_v53, %v2290_v61 }
 0x74f   : > { %v2293_v49 = vsel %vm2291_vm10, %v2270_v40, 0.0  ;;  %vm2292_vm14 = vmor %vm2264_vm11, %vm2291_vm10  ;;  %vm2315_vm10 = vcmask 7168   ;;  %vm2320_vm11 = vcmask 1040384  }
 0x750   : > { %v2294_v0 = vadd.f32 %v2293_v49, %v2265_v1  ;;  %v10800_v1 = vld [vmem:[#allocation13 + $0x18] sm:$0xff]  ;;  %v10802_v49 = vld [vmem:[#allocation13 + $0x10] sm:$0xff] }
 0x751   : > { %8999 = vmatpush3.msra.mxu1 %v10800_v1 }
 0x752   : > { %v2295_v46 = vsel %vm2292_vm14, %v2294_v0, -1e+30  ;;  %9000 = vmatprep.subr.mxu1 %v12123_v35  ;;  %v10806_v0 = vld [vmem:[#allocation13 + $0x8] sm:$0xff] }
 0x753   : > { %v2296_v60 = vsel %vm2239_vm12, %v2295_v46, -inf  ;;  %9001 = vmatpush3.msra.mxu1 %v10802_v49 }
 0x754   : > { %2297 = vmax.xlane.f32.xlu1 %v2296_v60  ;;  %9002 = vmatprep.subr.mxu1 %v12123_v35  ;;  %v10810_v60 = vld [vmem:[#allocation13] sm:$0xff] }
 0x755   : > { %9003 = vmatpush3.msra.mxu1 %v10806_v0 }
 0x756   : > { %9004 = vmatprep.subr.mxu1 %v12123_v35 }
 0x757   : > { %9005 = vmatpush3.msra.mxu1 %v10810_v60 }
 0x758   : > { %9020 = vmatprep.subr.mxu1 %v12123_v35 }
 0x7dd   : > { %v2298_v37 = vpop.xlane.xlu1 %2297 }
 0x7de   : > { %v2299_v34 = vsub.f32 %v2295_v46, %v2298_v37 }
 0x7e0   : > { %v2300_v32 = vmul.f32 1.442695, %v2299_v34 }
 0x7e2   : > { %9707 = vpow2.f32 %v2300_v32 }
 0x7ef   : > { %v9708_v44 = vpop.eup %9707 }
 0x7f0   : > { %v2302_v3 = vsel %vm2292_vm14, %v9708_v44, 0.0  ;;  %vm2347_vm14 = vcmask 1043456  }
 0x7f1   : > { %v2303_v28 = vsel %vm2239_vm12, %v2302_v3, 0.0 }
 0x7f2   : > { %2304 = vadd.xlane.f32.xlu0 %v2303_v28 }
 0x87b   : > { %v2305_v26 = vpop.xlane.xlu0 %2304 }
 0x87c   : > { %9709 = vrcp.f32 %v2305_v26 }
 0x889   : > { %v9710_v31 = vpop.eup %9709 }
 0x88a   : > { %v2307_v29 = vmul.f32 %v9710_v31, %v2302_v3 }
 0x88c   : > { %2312 = vrot.lane.b32.xlu0 %v2307_v29, %s10060_s20  ;;  %2309 = vrot.lane.b32.xlu1 %v2307_v29, %s10061_s13 }
 0x8fe   : > { %v2313_v40 = vpop.permute.xlu0 %2312  ;;  %v2310_v7 = vpop.permute.xlu1 %2309 }
 0x8ff   : > { %v2316_v30 = vsel %vm2315_vm10, %v2310_v7, %v2313_v40  ;;  %v2571_v40 = vrot.slane %v10376_v11, 7  ;;  %v2581_v11 = vrot.slane %v10417_v25, 2  ;;  %v3070_v25 = vrot.slane %v10457_v45, 1 }
 0x900   : > { %v2318_v21 = vrot.slane %v2316_v30, 7  ;;  %v2573_v30 = vrot.slane %v10389_v15, 6 }
 0x902   : > { %v2321_v20 = vsel %vm2320_vm11, %v2307_v29, %v2318_v21  ;;  %v2569_v29 = vrot.slane %v10368_v8, 1 }
 0x903   : > { %2323 = vrot.lane.b32.xlu1 %v2321_v20, %s10062_s28 }
 0x904   : > { %v2570_v7 = vsel %vm624_vm1, %v10373_v10, %v2569_v29 }
 0x905   : > { %v2572_v21 = vsel %vm12057_vm2, %v2571_v40, %v2570_v7  ;;  %v3076_v40 = vrot.slane %v10470_v51, 5  ;;  %v3082_v7 = vrot.slane %v10495_v63, 2 }
 0x907   : > { %2326 = vrot.lane.b32.xlu1 %v2321_v20, %s10063_s5 }
 0x975   : > { %v2324_v61 = vpop.permute.xlu1 %2323 }
 0x979   : > { %v2327_v46 = vpop.permute.xlu1 %2326 }
 0x97a   : > { %v2330_v37 = vsel %vm12029_vm15, %v2324_v61, %v2327_v46  ;;  %vm2349_vm15 = vcmask 64512   ;;  %v2574_v61 = vsel %vm12056_vm3, %v2573_v30, %v2572_v21  ;;  %v2577_v46 = vrot.slane %v10395_v17, 4 }
 0x97b   : > { %v2332_v34 = vrot.slane %v2330_v37, 6 }
 0x97d   : > { %v2335_v32 = vsel %vm2334_vm13, %v2321_v20, %v2332_v34  ;;  %v2575_v20 = vrot.slane %v10392_v16, 5  ;;  %v2579_v34 = vrot.slane %v10402_v19, 3 }
 0x97e   : > { %2340 = vrot.lane.b32.xlu1 %v2335_v32, %s10055_s29  ;;  %2337 = vrot.lane.b32.xlu0 %v2335_v32, %s10054_s26 }
 0x97f   : > { %v2576_v37 = vsel %vm12037_vm4, %v2575_v20, %v2574_v61 }
 0x980   : > { %v2578_v8 = vsel %vm12036_vm5, %v2577_v46, %v2576_v37  ;;  %v12124_v37 = vld [vmem:[#allocation38_spill] sm:$0xff] }
 0x981   : > { %v2580_v10 = vsel %vm12035_vm6, %v2579_v34, %v2578_v8  ;;  %v12125_v34 = vld [vmem:[#allocation42_spill] sm:$0xff]  ;;  %v12126_v8 = vld [vmem:[#allocation45_spill] sm:$0xff] }
 0x982   : > { %v2582_v15 = vsel %vm12030_vm7, %v2581_v11, %v2580_v10  ;;  %v12127_v11 = vld [vmem:[#allocation46_spill] sm:$0xff] }
 0x9f0   : > { %v2341_v44 = vpop.permute.xlu1 %2340  ;;  %v2338_v3 = vpop.permute.xlu0 %2337 }
 0x9f1   : > { %v2343_v28 = vsel %vm2206_vm9, %v2338_v3, %v2341_v44 }
 0x9f2   : > { %v2345_v26 = vrot.slane %v2343_v28, 4  ;;  %v3072_v28 = vrot.slane %v10452_v43, 7  ;;  %v3078_v43 = vrot.slane %v10478_v55, 4 }
 0x9f4   : > { %v2348_v31 = vsel %vm2347_vm14, %v2335_v32, %v2345_v26  ;;  %v2583_v32 = vsel %vm12034_vm8, %v2582_v15, 0  ;;  %v3071_v26 = vsel %vm624_vm1, %v10441_v38, %v3070_v25  ;;  %v12128_v15 = vld [vmem:[#allocation28_spill] sm:$0xff]  ;;  %v12131_v25 = vld [vmem:[#allocation31_spill] sm:$0xff] }
 0x9f5   : > { %8996 = vmatmul.mubr.msk.f32.vlgmr.msra.gmra.mxu0 %vm2349_vm15, %v2348_v31  ;;  %v10849_v44 = vand.u32 4294901760, %v2583_v32  ;;  %v3074_v31 = vrot.slane %v10467_v50, 6  ;;  %v3073_v29 = vsel %vm12057_vm2, %v3072_v28, %v3071_v26  ;;  %v3080_v50 = vrot.slane %v10486_v58, 3  ;;  %v12134_v28 = vld [vmem:[#allocation34_spill] sm:$0xff]  ;;  %v12135_v26 = vld [vmem:[#allocation35_spill] sm:$0xff] }
 0x9f6   : > { %9010 = vmatpush3.msra.mxu0 %v10361_v4  ;;  %9017 = vmatprep.mubr.msk.f32.mxu0 %vm10053_vm0, %v12123_v35 }
 0x9f7   : > { %9011 = vmatprep.subr.mxu0 %v12123_v35  ;;  %v10852_v16 = vsub.f32 %v2583_v32, %v10849_v44  ;;  %v3075_v45 = vsel %vm12056_vm3, %v3074_v31, %v3073_v29 }
 0x9f8   : > { %9012 = vmatpush3.msra.mxu0 %v10363_v5  ;;  %v3077_v38 = vsel %vm12037_vm4, %v3076_v40, %v3075_v45 }
 0x9f9   : > { %9013 = vmatprep.subr.mxu0 %v12123_v35  ;;  %v2656_v17 = vand.u32 4294901760, %v10852_v16  ;;  %v3079_v51 = vsel %vm12036_vm5, %v3078_v43, %v3077_v38 }
 0x9fa   : > { %9014 = vmatpush3.msra.mxu0 %v10365_v6  ;;  %v3081_v30 = vsel %vm12035_vm6, %v3080_v50, %v3079_v51 }
 0x9fb   : > { %9015 = vmatprep.subr.mxu0 %v12123_v35  ;;  %v2657_v19 = vsub.f32 %v10852_v16, %v2656_v17  ;;  %v3083_v55 = vsel %vm12030_vm7, %v3082_v7, %v3081_v30 }
 0x9fc   : > { %9016 = vmatpush3.msra.mxu0 %v10370_v9  ;;  %v3084_v21 = vsel %vm12034_vm8, %v3083_v55, 0 }
 0x9fd   : > { %9031 = vmatprep.subr.mxu0 %v12123_v35  ;;  %v2658_v3 = vand.u32 4294901760, %v2657_v19  ;;  %v10893_v58 = vand.u32 4294901760, %v3084_v21  ;;  %v12129_v19 = vld [vmem:[#allocation29_spill] sm:$0xff] }
 0x9ff   : > { %9018 = vmatmul.mubr.f32.vlgmr.msra.gmra.mxu0 %v2658_v3  ;;  %v10899_v63 = vsub.f32 %v3084_v21, %v10893_v58  ;;  %v12130_v3 = vld [vmem:[#allocation30_spill] sm:$0xff]  ;;  %v12136_v21 = vld [vmem:[#allocation39_spill] sm:$0xff] }
 0xa00   : > { %9032 = vmatpush3.msra.mxu0 %v10380_v12  ;;  %9039 = vmatprep.mubr.msk.f32.mxu0 %vm10053_vm0, %v12123_v35 }
 0xa01   : > { %9033 = vmatprep.subr.mxu0 %v12123_v35  ;;  %v3157_v20 = vand.u32 4294901760, %v10899_v63 }
 0xa02   : > { %9034 = vmatpush3.msra.mxu0 %v10383_v13 }
 0xa03   : > { %9035 = vmatprep.subr.mxu0 %v12123_v35  ;;  %v3158_v61 = vsub.f32 %v10899_v63, %v3157_v20 }
 0xa04   : > { %9036 = vmatpush3.msra.mxu0 %v10386_v14 }
 0xa05   : > { %9037 = vmatprep.subr.mxu0 %v12123_v35  ;;  %v3159_v46 = vand.u32 4294901760, %v3158_v61  ;;  %v12138_v61 = vld [vmem:[#allocation36_spill] sm:$0xff] }
 0xa06   : > { %9038 = vmatpush3.msra.mxu0 %v10399_v18 }
 0xa07   : > { %9053 = vmatprep.subr.mxu0 %v12123_v35  ;;  %9040 = vmatmul.mubr.f32.vlgmr.msra.gmra.mxu0 %v10852_v16  ;;  %v12132_v16 = vld [vmem:[#allocation32_spill] sm:$0xff] }
 0xa08   : > { %9054 = vmatpush3.msra.mxu0 %v10407_v22  ;;  %9061 = vmatprep.mubr.msk.f32.mxu0 %vm10053_vm0, %v12123_v35 }
 0xa09   : > { %9055 = vmatprep.subr.mxu0 %v12123_v35 }
 0xa0a   : > { %9056 = vmatpush3.msra.mxu0 %v10411_v23 }
 0xa0b   : > { %9057 = vmatprep.subr.mxu0 %v12123_v35 }
 0xa0c   : > { %9058 = vmatpush3.msra.mxu0 %v10414_v24 }
 0xa0d   : > { %9059 = vmatprep.subr.mxu0 %v12123_v35 }
 0xa0e   : > { %9060 = vmatpush3.msra.mxu0 %v10422_v27 }
 0xa0f   : > { %9062 = vmatmul.mubr.f32.vlgmr.msra.gmra.mxu0 %v10849_v44  ;;  %9075 = vmatprep.subr.mxu0 %v12123_v35 }
 0xa10   : > { %9076 = vmatpush3.msra.mxu0 %v10513_v33  ;;  %9083 = vmatprep.mubr.msk.f32.mxu0 %vm10053_vm0, %v12123_v35 }
 0xa11   : > { %9077 = vmatprep.subr.mxu0 %v12123_v35 }
 0xa12   : > { %9078 = vmatpush3.msra.mxu0 %v10518_v36 }
 0xa13   : > { %9079 = vmatprep.subr.mxu0 %v12123_v35 }
 0xa14   : > { %9080 = vmatpush3.msra.mxu0 %v10528_v42 }
 0xa15   : > { %9081 = vmatprep.subr.mxu0 %v12123_v35 }
 0xa16   : > { %9082 = vmatpush3.msra.mxu0 %v10537_v48 }
 0xa17   : > { %9097 = vmatprep.subr.mxu0 %v12123_v35  ;;  %9084 = vmatmul.mubr.f32.vlgmr.msra.gmra.mxu0 %v3159_v46 }
 0xa18   : > { %9098 = vmatpush3.msra.mxu0 %v10526_v41  ;;  %9105 = vmatprep.mubr.msk.f32.mxu0 %vm10053_vm0, %v12123_v35 }
 0xa19   : > { %9099 = vmatprep.subr.mxu0 %v12123_v35 }
 0xa1a   : > { %9100 = vmatpush3.msra.mxu0 %v10535_v47 }
 0xa1b   : > { %9101 = vmatprep.subr.mxu0 %v12123_v35 }
 0xa1c   : > { %9102 = vmatpush3.msra.mxu0 %v10549_v54 }
 0xa1d   : > { %9103 = vmatprep.subr.mxu0 %v12123_v35 }
 0xa1e   : > { %9104 = vmatpush3.msra.mxu0 %v10558_v59 }
 0xa1f   : > { %9119 = vmatprep.subr.mxu0 %v12123_v35  ;;  %9106 = vmatmul.mubr.f32.vlgmr.msra.gmra.mxu0 %v10899_v63  ;;  %v12137_v63 = vld [vmem:[#allocation37_spill] sm:$0xff] }
 0xa20   : > { %9120 = vmatpush3.msra.mxu0 %v10546_v52  ;;  %9127 = vmatprep.mubr.msk.f32.mxu0 %vm10053_vm0, %v12123_v35 }
 0xa21   : > { %9121 = vmatprep.subr.mxu0 %v12123_v35 }
 0xa22   : > { %9122 = vmatpush3.msra.mxu0 %v10555_v56 }
 0xa23   : > { %9123 = vmatprep.subr.mxu0 %v12123_v35 }
 0xa24   : > { %9124 = vmatpush3.msra.mxu0 %v10570_v62 }
 0xa25   : > { %9125 = vmatprep.subr.mxu0 %v12123_v35 }
 0xa26   : > { %9126 = vmatpush3.msra.mxu0 %v10580_v2 }
 0xa27   : > { %9128 = vmatmul.mubr.f32.vlgmr.msra.gmra.mxu0 %v10893_v58  ;;  %9141 = vmatprep.subr.mxu0 %v12123_v35 }
 0xa28   : > { %9142 = vmatpush3.msra.mxu0 %v12124_v37  ;;  %9149 = vmatprep.mubr.msk.f32.mxu0 %vm10053_vm0, %v12123_v35  ;;  %v12139_v37 = vld [vmem:[#allocation40_spill] sm:$0xff] }
 0xa29   : > { %9143 = vmatprep.subr.mxu0 %v12123_v35 }
 0xa2a   : > { %9144 = vmatpush3.msra.mxu0 %v12125_v34  ;;  %v3575_v34 = vrot.slane %v12139_v37, 6 }
 0xa2b   : > { %9145 = vmatprep.subr.mxu0 %v12123_v35 }
 0xa2c   : > { %9146 = vmatpush3.msra.mxu0 %v12126_v8 }
 0xa2d   : > { %9147 = vmatprep.subr.mxu0 %v12123_v35 }
 0xa2e   : > { %9148 = vmatpush3.msra.mxu0 %v12127_v11  ;;  %v12140_v11 = vld [vmem:[#allocation41_spill] sm:$0xff] }
 0xa2f   : > { %9157 = vmatprep.subr.mxu0 %v12123_v35 }
 0xab5   : > { %v2419_v10 = vpop.f32.mrf.mxu0 }
 0xab6   : > { %9007 = vmatmul.mubr.msk.f32.vlgmr.msra.gmra.mxu1 %vm12034_vm8, %v2419_v10  ;;  %v3577_v10 = vrot.slane %v12140_v11, 5 }
 0xab7   : > { %9021 = vmatpush3.msra.mxu1 %v12128_v15  ;;  %v8997_v32 = vpop.f32.mrf.mxu0  ;;  %9028 = vmatprep.mubr.msk.f32.mxu1 %vm10053_vm0, %v12123_v35 }
 0xab8   : > { %9022 = vmatprep.subr.mxu1 %v12123_v35 }
 0xab9   : > { %9023 = vmatpush3.msra.mxu1 %v12129_v19 }
 0xaba   : > { %9024 = vmatprep.subr.mxu1 %v12123_v35 }
 0xabb   : > { %9025 = vmatpush3.msra.mxu1 %v12130_v3 }
 0xabc   : > { %9026 = vmatprep.subr.mxu1 %v12123_v35 }
 0xabd   : > { %9027 = vmatpush3.msra.mxu1 %v12131_v25 }
 0xabe   : > { %9029 = vmatmul.mubr.f32.vlgmr.msra.gmra.mxu1 %v10849_v44  ;;  %9042 = vmatprep.subr.mxu1 %v12123_v35 }
 0xabf   : > { %9043 = vmatpush3.msra.mxu1 %v10361_v4  ;;  %9050 = vmatprep.mubr.msk.f32.mxu1 %vm10053_vm0, %v12123_v35 }
 0xac0   : > { %9044 = vmatprep.subr.mxu1 %v12123_v35 }
 0xac1   : > { %9045 = vmatpush3.msra.mxu1 %v10363_v5 }
 0xac2   : > { %9046 = vmatprep.subr.mxu1 %v12123_v35 }
 0xac3   : > { %9047 = vmatpush3.msra.mxu1 %v10365_v6 }
 0xac4   : > { %9048 = vmatprep.subr.mxu1 %v12123_v35 }
 0xac5   : > { %9049 = vmatpush3.msra.mxu1 %v10370_v9 }
 0xac6   : > { %9051 = vmatmul.mubr.f32.vlgmr.msra.gmra.mxu1 %v2656_v17  ;;  %9064 = vmatprep.subr.mxu1 %v12123_v35  ;;  %v12133_v17 = vld [vmem:[#allocation33_spill] sm:$0xff] }
 0xac7   : > { %9065 = vmatpush3.msra.mxu1 %v10361_v4  ;;  %9072 = vmatprep.mubr.msk.f32.mxu1 %vm10053_vm0, %v12123_v35 }
 0xac8   : > { %9066 = vmatprep.subr.mxu1 %v12123_v35 }
 0xac9   : > { %9067 = vmatpush3.msra.mxu1 %v10363_v5 }
 0xaca   : > { %9068 = vmatprep.subr.mxu1 %v12123_v35 }
 0xacb   : > { %9069 = vmatpush3.msra.mxu1 %v10365_v6 }
 0xacc   : > { %9070 = vmatprep.subr.mxu1 %v12123_v35 }
 0xacd   : > { %9071 = vmatpush3.msra.mxu1 %v10370_v9 }
 0xace   : > { %9073 = vmatmul.mubr.f32.vlgmr.msra.gmra.mxu1 %v10849_v44  ;;  %9086 = vmatprep.subr.mxu1 %v12123_v35  ;;  %v2660_v44 = vpop.f32.mrf.mxu0 }
 0xacf   : > { %9087 = vmatpush3.msra.mxu1 %v12132_v16  ;;  %9094 = vmatprep.mubr.msk.f32.mxu1 %vm10053_vm0, %v12123_v35 }
 0xad0   : > { %9088 = vmatprep.subr.mxu1 %v12123_v35  ;;  %v9019_v31 = vpop.f32.mrf.mxu0 }
 0xad1   : > { %9089 = vmatpush3.msra.mxu1 %v12133_v17  ;;  %v12141_v31 = vld [vmem:[#allocation43_spill] sm:$0xff] }
 0xad2   : > { %9090 = vmatprep.subr.mxu1 %v12123_v35  ;;  %v11018_v29 = vpop.f32.mrf.mxu0 }
 0xad3   : > { %9091 = vmatpush3.msra.mxu1 %v12134_v28 }
 0xad4   : > { %9092 = vmatprep.subr.mxu1 %v12123_v35  ;;  %v9041_v40 = vpop.f32.mrf.mxu0 }
 0xad5   : > { %9093 = vmatpush3.msra.mxu1 %v12135_v26  ;;  %v3579_v40 = vrot.slane %v12141_v31, 4 }
 0xad6   : > { %9095 = vmatmul.mubr.f32.vlgmr.msra.gmra.mxu1 %v10893_v58  ;;  %9108 = vmatprep.subr.mxu1 %v12123_v35  ;;  %v11020_v45 = vpop.f32.mrf.mxu0 }
 0xad7   : > { %9109 = vmatpush3.msra.mxu1 %v10513_v33  ;;  %9116 = vmatprep.mubr.msk.f32.mxu1 %vm10053_vm0, %v12123_v35 }
 0xad8   : > { %9110 = vmatprep.subr.mxu1 %v12123_v35  ;;  %v9063_v43 = vpop.f32.mrf.mxu0 }
 0xad9   : > { %9111 = vmatpush3.msra.mxu1 %v10518_v36 }
 0xada   : > { %9112 = vmatprep.subr.mxu1 %v12123_v35  ;;  %v11022_v38 = vpop.f32.mrf.mxu0 }
 0xadb   : > { %9113 = vmatpush3.msra.mxu1 %v10528_v42 }
 0xadc   : > { %9114 = vmatprep.subr.mxu1 %v12123_v35  ;;  %v9085_v50 = vpop.f32.mrf.mxu0 }
 0xadd   : > { %9115 = vmatpush3.msra.mxu1 %v10537_v48  ;;  %v12142_v50 = vld [vmem:[#allocation44_spill] sm:$0xff] }
 0xade   : > { %9117 = vmatmul.mubr.f32.vlgmr.msra.gmra.mxu1 %v3157_v20  ;;  %9130 = vmatprep.subr.mxu1 %v12123_v35  ;;  %v3573_v20 = vrot.slane %v12137_v63, 7 }
 0xadf   : > { %9131 = vmatpush3.msra.mxu1 %v10513_v33  ;;  %9138 = vmatprep.mubr.msk.f32.mxu1 %vm10053_vm0, %v12123_v35  ;;  %v11024_v51 = vpop.f32.mrf.mxu0 }
 0xae0   : > { %9132 = vmatprep.subr.mxu1 %v12123_v35 }
 0xae1   : > { %9133 = vmatpush3.msra.mxu1 %v10518_v36  ;;  %v9107_v7 = vpop.f32.mrf.mxu0 }
 0xae2   : > { %9134 = vmatprep.subr.mxu1 %v12123_v35  ;;  %v3581_v7 = vrot.slane %v12142_v50, 3 }
 0xae3   : > { %9135 = vmatpush3.msra.mxu1 %v10528_v42 }
 0xae4   : > { %9136 = vmatprep.subr.mxu1 %v12123_v35 }
 0xae5   : > { %9137 = vmatpush3.msra.mxu1 %v10537_v48 }
 0xae6   : > { %9139 = vmatmul.mubr.f32.vlgmr.msra.gmra.mxu1 %v10893_v58  ;;  %9152 = vmatprep.subr.mxu1 %v12123_v35  ;;  %v3571_v58 = vrot.slane %v12136_v21, 1  ;;  %v12143_v21 = vld [vmem:[#allocation47_spill] sm:$0xff] }
 0xae7   : > { %9154 = vmatprep.mubr.msk.f32.mxu1 %vm10053_vm0, %v12123_v35  ;;  %v11026_v30 = vpop.f32.mrf.mxu0  ;;  %v3583_v63 = vrot.slane %v12143_v21, 2 }
 0xae8   : > { %v3572_v46 = vsel %vm624_vm1, %v12138_v61, %v3571_v58 }
 0xae9   : > { %v9129_v55 = vpop.f32.mrf.mxu0  ;;  %v3574_v8 = vsel %vm12057_vm2, %v3573_v20, %v3572_v46  ;;  %v10064_v20 = vmov 1966171168  }
 0xaea   : > { %v3576_v32 = vsel %vm12056_vm3, %v3575_v34, %v3574_v8  ;;  %v2505_v46 = vunpack.c.l.s4 %v10064_v20  ;;  %v2508_v34 = vshrl.u32 %v563_v57, 7  ;;  %v11050_v8 = vld [vmem:[%s11972_s10] ss:$0 sm:$0xff] }
 0xaeb   : > { %v3578_v43 = vsel %vm12037_vm4, %v3577_v10, %v3576_v32 }
 0xaec   : > { %v3580_v55 = vsel %vm12036_vm5, %v3579_v40, %v3578_v43  ;;  %v2506_v37 = vunpack.c.0.s8 %v2505_v46 }
 0xaed   : > { %v3582_v58 = vsel %vm12035_vm6, %v3581_v7, %v3580_v55 }
 0xaee   : > { %v3584_v61 = vsel %vm12030_vm7, %v3583_v63, %v3582_v58  ;;  %v11052_v11 = vsub.s32 %v2506_v37, %v2508_v34  ;;  %vm12033_vm7 = vcmask 253952  }
 0xaef   : > { %9150 = vmatmul.mubr.msk.f32.vlgmr.msra.gmra.mxu0 %vm12034_vm8, %v3584_v61 }
 0xaf0   : > { %9159 = vmatprep.mubr.msk.f32.mxu0 %vm10053_vm0, %v12123_v35  ;;  %12144 = vst [vmem:[#allocation38_spill] sm:$0xff] %v11052_v11 }
 0xb76   : > { %v2498_v10 = vpop.f32.mrf.mxu1 }
 0xb77   : > { %v2499_v32 = vadd.f32 %v11050_v8, %v2498_v10 }
 0xb78   : > { %v9008_v31 = vpop.f32.mrf.mxu1 }
 0xb79   : > { %v2503_v40 = vcombine.high %v2499_v32, %v2499_v32  ;;  %v2510_v43 = vrot.slane %v2499_v32, %v11052_v11  ;;  %v12145_v32 = vld [vmem:[#allocation48_spill] sm:$0xff] }
 0xb7a   : > { %v2661_v31 = vadd.f32 %v12145_v32, %v2660_v44 }
 0xb7b   : > { %v2517_v50 = vrot.slane %v2503_v40, %v11052_v11  ;;  %v2518_v7 = vcombine.high %v2510_v43, %v2510_v43  ;;  %v2526_v57 = vrot.slane %v2510_v43, %v11052_v11 }
 0xb7d   : > { %v2519_v55 = vcombine.high %v2517_v50, %v2517_v50  ;;  %v2533_v21 = vrot.slane %v2517_v50, %v11052_v11  ;;  %v2540_v63 = vrot.slane %v2518_v7, %v11052_v11  ;;  %v2548_v58 = vcombine.high %v2526_v57, %v2526_v57  ;;  %2561 = vst.msk [vmem:[%s11061_s25] sm:$0x1] %vm12033_vm7, %v2526_v57 }
 0xb7e   : > { %v2751_v61 = vpop.f32.mrf.mxu1 }
 0xb7f   : > { %v2547_v20 = vrot.slane %v2519_v55, %v11052_v11  ;;  %v2549_v46 = vcombine.high %v2533_v21, %v2533_v21  ;;  %v2550_v37 = vcombine.high %v2540_v63, %v2540_v63  ;;  %2562 = vst.msk [vmem:[%s11061_s25 + $0x4] sm:$0x1] %vm12033_vm7, %v2540_v63  ;;  %2563 = vst.msk [vmem:[%s11061_s25 + $0x8] sm:$0x1] %vm12033_vm7, %v2548_v58 }
 0xb80   : > { %2565 = vst.msk [vmem:[%s11061_s25 + $0x10] sm:$0x1] %vm12033_vm7, %v2533_v21  ;;  %v9030_v34 = vpop.f32.mrf.mxu1  ;;  %v2752_v50 = vadd.f32 %v2751_v61, %v2661_v31 }
 0xb81   : > { %v2551_v10 = vcombine.high %v2547_v20, %v2547_v20  ;;  %2564 = vst.msk [vmem:[%s11061_s25 + $0xc] sm:$0x1] %vm12033_vm7, %v2550_v37  ;;  %2566 = vst.msk [vmem:[%s11061_s25 + $0x14] sm:$0x1] %vm12033_vm7, %v2547_v20  ;;  %v12146_v20 = vld [vmem:[#allocation49_spill] sm:$0xff] }
 0xb82   : > { %2567 = vst.msk [vmem:[%s11061_s25 + $0x18] sm:$0x1] %vm12033_vm7, %v2549_v46  ;;  %v2832_v7 = vadd.f32 %v11018_v29, %v2752_v50  ;;  %v3162_v34 = vadd.f32 %v12146_v20, %v11022_v38 }
 0xb83   : > { %2568 = vst.msk [vmem:[%s11061_s25 + $0x1c] sm:$0x1] %vm12033_vm7, %v2551_v10  ;;  %vm12147_vm7 = vcmask 48128  }
 0xb86   : > { %v2908_v40 = vpop.f32.mrf.mxu1 }
 0xb87   : > { %v2909_v55 = vadd.f32 %v2908_v40, %v2832_v7 }
 0xb88   : > { %v9052_v43 = vpop.f32.mrf.mxu1 }
 0xb89   : > { %v2992_v63 = vadd.f32 %v11020_v45, %v2909_v55 }
 0xb8e   : > { %v3066_v57 = vpop.f32.mrf.mxu1 }
 0xb8f   : > { %v3067_v58 = vadd.f32 %v3066_v57, %v2992_v63 }
 0xb90   : > { %v9074_v21 = vpop.f32.mrf.mxu1 }
 0xb91   : > { %v3658_v10 = vsel %vm12034_vm8, %v3067_v58, 0 }
 0xb92   : > { %v3729_v44 = vand.u32 4294901760, %v3658_v10 }
 0xb94   : > { %v3730_v29 = vsub.f32 %v3658_v10, %v3729_v44 }
 0xb96   : > { %v3252_v37 = vpop.f32.mrf.mxu1  ;;  %v3731_v40 = vand.u32 4294901760, %v3730_v29 }
 0xb97   : > { %v3253_v11 = vadd.f32 %v3252_v37, %v3162_v34 }
 0xb98   : > { %v9096_v46 = vpop.f32.mrf.mxu1  ;;  %v3732_v38 = vsub.f32 %v3730_v29, %v3731_v40 }
 0xb99   : > { %v3333_v61 = vadd.f32 %v11024_v51, %v3253_v11 }
 0xb9a   : > { %v3733_v58 = vand.u32 4294901760, %v3732_v38 }
 0xb9e   : > { %v3409_v32 = vpop.f32.mrf.mxu1 }
 0xb9f   : > { %v3410_v43 = vadd.f32 %v3409_v32, %v3333_v61 }
 0xba0   : > { %v9118_v31 = vpop.f32.mrf.mxu1 }
 0xba1   : > { %v3493_v50 = vadd.f32 %v11026_v30, %v3410_v43 }
 0xba6   : > { %v3567_v45 = vpop.f32.mrf.mxu1 }
 0xba7   : > { %v3568_v7 = vadd.f32 %v3567_v45, %v3493_v50 }
 0xba8   : > { %v9140_v57 = vpop.f32.mrf.mxu1 }
 0xba9   : > { %v3661_v55 = vsel %vm12034_vm8, %v3568_v7, 0  ;;  %vm12148_vm8 = vcmask 56320  }
 0xbaa   : > { %v3694_v21 = vand.u32 4294901760, %v3661_v55 }
 0xbac   : > { %v3771_v63 = vsub.f32 %v3661_v55, %v3694_v21  ;;  %9153 = vmatpush3.xpose.msra.mxu1 %v3694_v21 }
 0xbad   : > { %9162 = vmatprep.subr.mxu1 %v12123_v35 }
 0xbae   : > { %v3772_v37 = vand.u32 4294901760, %v3771_v63 }
 0xbaf   : > { %9155 = vmatmul.mubr.f32.vlgmr.msra.gmra.mxu1 %v3733_v58  ;;  %v3653_v11 = vpop.f32.mrf.mxu0 }
 0xbb0   : > { %9163 = vmatpush3.xpose.msra.mxu1 %v3771_v63  ;;  %9164 = vmatprep.mubr.msk.f32.mxu1 %vm10053_vm0, %v12123_v35  ;;  %v3773_v51 = vsub.f32 %v3771_v63, %v3772_v37 }
 0xbb1   : > { %9172 = vmatprep.subr.mxu1 %v12123_v35  ;;  %v9151_v20 = vpop.f32.mrf.mxu0 }
 0xbb2   : > { %v3774_v30 = vand.u32 4294901760, %v3773_v51 }
 0xbb3   : > { %9165 = vmatmul.mubr.f32.vlgmr.msra.gmra.mxu1 %v3730_v29 }
 0xbb4   : > { %9158 = vmatpush3.xpose.msra.mxu0 %v3774_v30  ;;  %9173 = vmatpush3.xpose.msra.mxu1 %v3772_v37 }
 0xbb5   : > { %9174 = vmatprep.mubr.msk.f32.mxu1 %vm10053_vm0, %v12123_v35  ;;  %9167 = vmatprep.subr.mxu0 %v12123_v35 }
 0xbb6   : > { %9182 = vmatprep.subr.mxu1 %v12123_v35 }
 0xbb7   : > { %9160 = vmatmul.mubr.f32.vlgmr.msra.gmra.mxu0 %v3729_v44  ;;  %9175 = vmatmul.mubr.f32.vlgmr.msra.gmra.mxu1 %v3729_v44 }
 0xbb8   : > { %9168 = vmatpush3.xpose.msra.mxu0 %v3694_v21  ;;  %9169 = vmatprep.mubr.msk.f32.mxu0 %vm10053_vm0, %v12123_v35 }
 0xbb9   : > { %9177 = vmatprep.subr.mxu0 %v12123_v35  ;;  %9184 = vmatprep.mubr.msk.f32.mxu1 %vm10053_vm0, %v12123_v35 }
 0xbbb   : > { %9170 = vmatmul.mubr.f32.vlgmr.msra.gmra.mxu0 %v3731_v40 }
 0xbbc   : > { %9178 = vmatpush3.xpose.msra.mxu0 %v3694_v21  ;;  %9179 = vmatprep.mubr.msk.f32.mxu0 %vm10053_vm0, %v12123_v35 }
 0xbbd   : > { %9187 = vmatprep.subr.mxu0 %v12123_v35 }
 0xbbf   : > { %9180 = vmatmul.mubr.f32.vlgmr.msra.gmra.mxu0 %v3729_v44 }
 0xbc0   : > { %9188 = vmatpush3.msra.mxu0 %v10800_v1  ;;  %9195 = vmatprep.mubr.msk.f32.mxu0 %vm10053_vm0, %v12123_v35  ;;  %v3654_v1 = vadd.f32 %v10767_v39, %v3653_v11 }
 0xbc1   : > { %9189 = vmatprep.subr.mxu0 %v12123_v35 }
 0xbc2   : > { %9190 = vmatpush3.msra.mxu0 %v10802_v49  ;;  %9183 = vmatpush3.msra.mxu1 %v3654_v1 }
 0xbc3   : > { %9191 = vmatprep.subr.mxu0 %v12123_v35  ;;  %9198 = vmatprep.subr.mxu1 %v12123_v35 }
 0xbc4   : > { %9192 = vmatpush3.msra.mxu0 %v10806_v0 }
 0xbc5   : > { %9193 = vmatprep.subr.mxu0 %v12123_v35 }
 0xbc6   : > { %9194 = vmatpush3.msra.mxu0 %v10810_v60 }
 0xbc7   : > { %9209 = vmatprep.subr.mxu0 %v12123_v35 }
 0xc6f   : > { %v3735_v34 = vpop.f32.mrf.mxu1 }
 0xc71   : > { %v9156_v46 = vpop.f32.mrf.mxu1 }
 0xc73   : > { %v3885_v49 = vpop.f32.mrf.mxu1 }
 0xc75   : > { %v9166_v10 = vpop.f32.mrf.mxu1 }
 0xc77   : > { %v3811_v44 = vpop.f32.mrf.mxu0  ;;  %v4033_v32 = vpop.f32.mrf.mxu1 }
 0xc78   : > { %v3812_v0 = vadd.f32 %v3811_v44, %v3735_v34 }
 0xc79   : > { %v9161_v61 = vpop.f32.mrf.mxu0  ;;  %v9176_v31 = vpop.f32.mrf.mxu1 }
 0xc7a   : > { %v3886_v29 = vadd.f32 %v3885_v49, %v3812_v0 }
 0xc7b   : > { %v3959_v60 = vpop.f32.mrf.mxu0 }
 0xc7c   : > { %v3960_v43 = vadd.f32 %v3959_v60, %v3886_v29 }
 0xc7d   : > { %v9171_v40 = vpop.f32.mrf.mxu0 }
 0xc7e   : > { %v4034_v50 = vadd.f32 %v4033_v32, %v3960_v43 }
 0xc7f   : > { %v4105_v45 = vpop.f32.mrf.mxu0 }
 0xc80   : > { %v4106_v39 = vadd.f32 %v4105_v45, %v4034_v50 }
 0xc81   : > { %v9181_v7 = vpop.f32.mrf.mxu0 }
 0xc82   : > { %4113 = vrot.lane.b32.xlu1 %v4106_v39, %s10055_s29  ;;  %4110 = vrot.lane.b32.xlu0 %v4106_v39, %s10054_s26 }
 0xcf4   : > { %v4114_v57 = vpop.permute.xlu1 %4113  ;;  %v4111_v55 = vpop.permute.xlu0 %4110 }
 0xcf5   : > { %v4116_v38 = vsel %vm2206_vm9, %v4111_v55, %v4114_v57 }
 0xcf6   : > { %v4118_v21 = vrot.slane %v4116_v38, 4 }
 0xcf8   : > { %v4120_v63 = vadd.f32 %v4118_v21, %v4106_v39 }
 0xcfa   : > { %4125 = vrot.lane.b32.xlu1 %v4120_v63, %s10057_s17  ;;  %4122 = vrot.lane.b32.xlu0 %v4120_v63, %s10056_s12 }
 0xd6c   : > { %v4126_v58 = vpop.permute.xlu1 %4125  ;;  %v4123_v37 = vpop.permute.xlu0 %4122 }
 0xd6d   : > { %v4128_v51 = vsel %vm12147_vm7, %v4123_v37, %v4126_v58 }
 0xd6e   : > { %v4130_v30 = vrot.slane %v4128_v51, 2 }
 0xd70   : > { %v4132_v11 = vadd.f32 %v4130_v30, %v4120_v63 }
 0xd72   : > { %4137 = vrot.lane.b32.xlu1 %v4132_v11, %s10058_s30  ;;  %4134 = vrot.lane.b32.xlu0 %v4132_v11, %s10059_s24 }
 0xde4   : > { %v4138_v1 = vpop.permute.xlu1 %4137  ;;  %v4135_v20 = vpop.permute.xlu0 %4134 }
 0xde5   : > { %v4140_v34 = vsel %vm12148_vm8, %v4135_v20, %v4138_v1 }
 0xde6   : > { %v4142_v46 = vrot.slane %v4140_v34, 1 }
 0xde8   : > { %v4144_v49 = vadd.f32 %v4142_v46, %v4132_v11 }
 0xdea   : > { %v4145_v10 = vmul.f32 0.03125, %v4144_v49 }
 0xdec   : > { %v4146_v44 = vsel %vm2239_vm12, %v4145_v10, -inf }
 0xded   : > { %4147 = vmax.xlane.f32.xlu0 %v4146_v44 }
 0xe76   : > { %v4148_v32 = vpop.xlane.xlu0 %4147 }
 0xe77   : > { %vm4149_vm6 = vcmp.eq.f32.partialorder %v4145_v10, %v4148_v32 }
 0xe78   : > { %v4150_v0 = vsel %vm4149_vm6, %v10782_v53, 8 }
 0xe79   : > { %v4151_v61 = vsel %vm2239_vm12, %v4150_v0, 2147483647 }
 0xe7a   : > { %v4153_v31 = vshra.s32 %v4151_v61, 16  ;;  %v4152_v60 = vand.u32 65535, %v4151_v61 }
 0xe7c   : > { %v4155_v29 = vcvt.s32.f32 %v4153_v31  ;;  %v4154_v40 = vcvt.s32.f32 %v4152_v60 }
 0xe7e   : > { %4156 = vmin.xlane.f32.xlu1 %v4155_v29 }
 0xf07   : > { %v4157_v43 = vpop.xlane.xlu1 %4156 }
 0xf08   : > { %vm4158_vm7 = vcmp.eq.f32.partialorder %v4155_v29, %v4157_v43  ;;  %v4163_v45 = vcvt.f32.s32 %v4157_v43 }
 0xf09   : > { %v4159_v50 = vsel %vm4158_vm7, %v4154_v40, inf }
 0xf0a   : > { %4160 = vmin.xlane.f32.xlu0 %v4159_v50  ;;  %v4164_v7 = vshll.u32 %v4163_v45, 16 }
 0xf93   : > { %v4161_v39 = vpop.xlane.xlu0 %4160 }
 0xf94   : > { %v4162_v57 = vcvt.f32.s32 %v4161_v39 }
 0xf96   : > { %v4165_v55 = vadd.s32 %v4164_v7, %v4162_v57 }
 0xf98   : > { %vm4166_vm8 = vcmp.eq.s32.totalorder %v10782_v53, %v4165_v55  ;;  %v4168_v49 = vsub.s32 8, %v4165_v55 }
 0xf99   : > { %v4173_v38 = vsel %vm4166_vm8, -1e+30, %v4145_v10  ;;  %vm4167_vm8 = vcmp.eq.s32.totalorder %v4165_v55, 0 }
 0xf9a   : > { %v4174_v21 = vsel %vm2239_vm12, %v4173_v38, -inf  ;;  %v4169_v31 = vsel %vm4167_vm8, 0, %v4168_v49  ;;  %vm12151_vm8 = vcmask 1045509  }
 0xf9b   : > { %4175 = vmax.xlane.f32.xlu0 %v4174_v21  ;;  %vm4170_vm5 = vcmp.eq.s32.totalorder %v10782_v53, %v4169_v31 }
 0xf9c   : > { %v4171_v43 = vsel %vm4170_vm5, %v4148_v32, 0.0 }
0x1024   : > { %v4176_v63 = vpop.xlane.xlu0 %4175 }
0x1025   : > { %vm4177_vm6 = vcmp.eq.f32.partialorder %v4173_v38, %v4176_v63 }
0x1026   : > { %v4178_v58 = vsel %vm4177_vm6, %v10782_v53, 8 }
0x1027   : > { %v4179_v37 = vsel %vm2239_vm12, %v4178_v58, 2147483647 }
0x1028   : > { %v4181_v51 = vshra.s32 %v4179_v37, 16  ;;  %v4180_v11 = vand.u32 65535, %v4179_v37 }
0x102a   : > { %v4183_v30 = vcvt.s32.f32 %v4181_v51  ;;  %v4182_v20 = vcvt.s32.f32 %v4180_v11 }
0x102c   : > { %4184 = vmin.xlane.f32.xlu1 %v4183_v30 }
0x10b5   : > { %v4185_v1 = vpop.xlane.xlu1 %4184 }
0x10b6   : > { %vm4186_vm7 = vcmp.eq.f32.partialorder %v4183_v30, %v4185_v1  ;;  %v4191_v46 = vcvt.f32.s32 %v4185_v1 }
0x10b7   : > { %v4187_v34 = vsel %vm4186_vm7, %v4182_v20, inf }
0x10b8   : > { %4188 = vmin.xlane.f32.xlu0 %v4187_v34  ;;  %v4192_v44 = vshll.u32 %v4191_v46, 16 }
0x1141   : > { %v4189_v10 = vpop.xlane.xlu0 %4188 }
0x1142   : > { %v4190_v0 = vcvt.f32.s32 %v4189_v10 }
0x1144   : > { %v4193_v61 = vadd.s32 %v4192_v44, %v4190_v0 }
0x1146   : > { %vm4194_vm6 = vcmp.eq.s32.totalorder %v4193_v61, 0  ;;  %v4195_v29 = vsub.s32 8, %v4193_v61 }
0x1148   : > { %v4196_v60 = vsel %vm4194_vm6, 0, %v4195_v29  ;;  %vm12152_vm6 = vcmask 1046534  }
0x1149   : > { %vm4197_vm4 = vcmp.eq.s32.totalorder %v10782_v53, %v4196_v60 }
0x114a   : > { %v4199_v40 = vsel %vm4197_vm4, %v4176_v63, 0.0  ;;  %vm4198_vm7 = vmor %vm4170_vm5, %vm4197_vm4  ;;  %vm12149_vm4 = vcmask 15360   ;;  %vm12150_vm5 = vcmask 1044484  }
0x114b   : > { %v4200_v50 = vadd.f32 %v4199_v40, %v4171_v43  ;;  %v11161_v43 = vld [vmem:[%s10330_s1] sm:$0xf] }
0x114c   : > { %v4462_v40 = vrot.slane %v11161_v43, 2 }
0x114d   : > { %v4201_v45 = vsel %vm4198_vm7, %v4200_v50, -1e+30  ;;  %v11165_v50 = vld [vmem:[%s10330_s1 + $0x4] sm:$0xf] }
0x114e   : > { %v4202_v39 = vsel %vm2239_vm12, %v4201_v45, -inf }
0x114f   : > { %4203 = vmax.xlane.f32.xlu1 %v4202_v39 }
0x11d8   : > { %v4204_v7 = vpop.xlane.xlu1 %4203 }
0x11d9   : > { %v4205_v57 = vsub.f32 %v4201_v45, %v4204_v7  ;;  %v4463_v45 = vrot.slane %v11165_v50, 1  ;;  %v11170_v7 = vld [vmem:[%s10330_s1 + $0xc] sm:$0xf] }
0x11db   : > { %v4206_v55 = vmul.f32 1.442695, %v4205_v57  ;;  %v4464_v39 = vsel %vm624_vm1, %v4463_v45, %v4462_v40  ;;  %v4466_v57 = vrot.slane %v11170_v7, 7  ;;  %v11220_v45 = vld [vmem:[%s10338_s27 + $0x4] sm:$0xf] }
0x11dd   : > { %9711 = vpow2.f32 %v4206_v55  ;;  %v11174_v55 = vld [vmem:[%s10330_s1 + $0x8] sm:$0xf] }
0x11ea   : > { %v9712_v38 = vpop.eup %9711 }
0x11eb   : > { %v4208_v21 = vsel %vm4198_vm7, %v9712_v38, 0.0  ;;  %v4465_v38 = vsel %vm12057_vm2, %v11174_v55, %v4464_v39  ;;  %vm12153_vm7 = vcmask 1047559   ;;  %v4964_v39 = vrot.slane %v11220_v45, 1 }
0x11ec   : > { %v4209_v58 = vsel %vm2239_vm12, %v4208_v21, 0.0 }
0x11ed   : > { %4210 = vadd.xlane.f32.xlu0 %v4209_v58 }
0x1276   : > { %v4211_v37 = vpop.xlane.xlu0 %4210 }
0x1277   : > { %9713 = vrcp.f32 %v4211_v37  ;;  %v4467_v37 = vsel %vm12056_vm3, %v4466_v57, %v4465_v38  ;;  %v11227_v38 = vld [vmem:[%s10338_s27 + $0xc] sm:$0xf] }
0x1284   : > { %v9714_v51 = vpop.eup %9713 }
0x1285   : > { %v4213_v32 = vmul.f32 %v9714_v51, %v4208_v21  ;;  %v11179_v21 = vld [vmem:[%s10330_s1 + $0x10] sm:$0xf]  ;;  %v11184_v51 = vld [vmem:[%s10330_s1 + $0x14] sm:$0xf] }
0x1286   : > { %v4468_v58 = vrot.slane %v11179_v21, 6 }
0x1287   : > { %4218 = vrot.lane.b32.xlu0 %v4213_v32, %s10060_s20  ;;  %4215 = vrot.lane.b32.xlu1 %v4213_v32, %s10061_s13 }
0x12f9   : > { %v4219_v63 = vpop.permute.xlu0 %4218  ;;  %v4216_v30 = vpop.permute.xlu1 %4215 }
0x12fa   : > { %v4221_v11 = vsel %vm2315_vm10, %v4216_v30, %v4219_v63  ;;  %v4469_v63 = vsel %vm12150_vm5, %v4468_v58, %v4467_v37  ;;  %v11189_v30 = vld [vmem:[%s10330_s1 + $0x18] sm:$0xf]  ;;  %v4967_v58 = vrot.slane %v11227_v38, 7  ;;  %v11232_v37 = vld [vmem:[%s10338_s27 + $0x8] sm:$0xf] }
0x12fb   : > { %v4223_v1 = vrot.slane %v4221_v11, 7  ;;  %v4472_v11 = vrot.slane %v11189_v30, 4 }
0x12fd   : > { %v4225_v20 = vsel %vm2320_vm11, %v4213_v32, %v4223_v1  ;;  %v4470_v32 = vrot.slane %v11184_v51, 5 }
0x12fe   : > { %4227 = vrot.lane.b32.xlu1 %v4225_v20, %s10062_s28 }
0x12ff   : > { %v4471_v1 = vsel %vm12151_vm8, %v4470_v32, %v4469_v63  ;;  %v11237_v63 = vld [vmem:[%s10338_s27 + $0x10] sm:$0xf] }
0x1302   : > { %4230 = vrot.lane.b32.xlu1 %v4225_v20, %s10063_s5 }
0x1370   : > { %v4228_v34 = vpop.permute.xlu1 %4227 }
0x1374   : > { %v4231_v46 = vpop.permute.xlu1 %4230 }
0x1375   : > { %v4233_v49 = vsel %vm12149_vm4, %v4228_v34, %v4231_v46  ;;  %v4473_v46 = vsel %vm12152_vm6, %v4472_v11, %v4471_v1  ;;  %vm12154_vm4 = vcmask 261120   ;;  %v4969_v11 = vrot.slane %v11237_v63, 6 }
0x1376   : > { %v4235_v10 = vrot.slane %v4233_v49, 6 }
0x1378   : > { %v4237_v44 = vsel %vm2334_vm13, %v4225_v20, %v4235_v10  ;;  %v11194_v20 = vld [vmem:[%s10330_s1 + $0x1c] sm:$0xf]  ;;  %s9953_s1 = scalar_lea.vmem %s9952_s15, 1024 }
0x1379   : > { %4242 = vrot.lane.b32.xlu1 %v4237_v44, %s10055_s29  ;;  %4239 = vrot.lane.b32.xlu0 %v4237_v44, %s10054_s26  ;;  %v4474_v34 = vrot.slane %v11194_v20, 3 }
0x137b   : > { %v4475_v49 = vsel %vm12153_vm7, %v4474_v34, %v4473_v46  ;;  %v11244_v34 = vld [vmem:[%s10338_s27 + $0x14] sm:$0xf] }
0x137c   : > { %v4476_v10 = vsel %vm12154_vm4, %v4475_v49, 0  ;;  %v4971_v46 = vrot.slane %v11244_v34, 5 }
0x13eb   : > { %v4243_v0 = vpop.permute.xlu1 %4242  ;;  %v4240_v61 = vpop.permute.xlu0 %4239 }
0x13ec   : > { %v4245_v31 = vsel %vm2206_vm9, %v4240_v61, %v4243_v0 }
0x13ed   : > { %v4247_v29 = vrot.slane %v4245_v31, 4 }
0x13ef   : > { %v4249_v60 = vsel %vm2347_vm14, %v4237_v44, %v4247_v29  ;;  %v11200_v44 = vand.u32 4294901760, %v4476_v10 }
0x13f0   : > { %9185 = vmatmul.mubr.msk.f32.vlgmr.msra.gmra.mxu1 %vm2349_vm15, %v4249_v60  ;;  %v11216_v60 = vld [vmem:[%s10338_s27] sm:$0xf] }
0x13f1   : > { %9199 = vmatpush3.msra.mxu1 %v10361_v4  ;;  %9206 = vmatprep.mubr.msk.f32.mxu1 %vm10053_vm0, %v12123_v35  ;;  %v11203_v0 = vsub.f32 %v4476_v10, %v11200_v44  ;;  %v4963_v40 = vrot.slane %v11216_v60, 2  ;;  %v11252_v10 = vld [vmem:[%s10338_s27 + $0x18] sm:$0xf] }
0x13f2   : > { %9200 = vmatprep.subr.mxu1 %v12123_v35 }
0x13f3   : > { %9201 = vmatpush3.msra.mxu1 %v10363_v5  ;;  %v4549_v61 = vand.u32 4294901760, %v11203_v0  ;;  %v4965_v57 = vsel %vm624_vm1, %v4964_v39, %v4963_v40  ;;  %v11258_v40 = vld [vmem:[%s10338_s27 + $0x1c] sm:$0xf] }
0x13f4   : > { %9202 = vmatprep.subr.mxu1 %v12123_v35  ;;  %v4966_v32 = vsel %vm12057_vm2, %v11232_v37, %v4965_v57  ;;  %v4975_v39 = vrot.slane %v11258_v40, 3 }
0x13f5   : > { %9203 = vmatpush3.msra.mxu1 %v10365_v6  ;;  %v4550_v31 = vsub.f32 %v11203_v0, %v4549_v61  ;;  %v4968_v1 = vsel %vm12056_vm3, %v4967_v58, %v4966_v32 }
0x13f6   : > { %9204 = vmatprep.subr.mxu1 %v12123_v35  ;;  %v4970_v49 = vsel %vm12150_vm5, %v4969_v11, %v4968_v1  ;;  %vm12159_vm5 = vmmov %vm12154_vm4 }
0x13f7   : > { %9205 = vmatpush3.msra.mxu1 %v10370_v9  ;;  %v4551_v29 = vand.u32 4294901760, %v4550_v31  ;;  %v4973_v31 = vrot.slane %v11252_v10, 4 }
0x13f8   : > { %9220 = vmatprep.subr.mxu1 %v12123_v35 }
0x13f9   : > { %9207 = vmatmul.mubr.f32.vlgmr.msra.gmra.mxu1 %v4551_v29  ;;  %v4972_v29 = vsel %vm12151_vm8, %v4971_v46, %v4970_v49  ;;  %vm12166_vm8 = vcmask 1044484  }
0x13fa   : > { %9221 = vmatpush3.msra.mxu1 %v10380_v12  ;;  %9228 = vmatprep.mubr.msk.f32.mxu1 %vm10053_vm0, %v12123_v35  ;;  %v4974_v57 = vsel %vm12152_vm6, %v4973_v31, %v4972_v29  ;;  %v11312_v29 = vld [vmem:[#allocation11 + $0x18] sm:$0xff]  ;;  %vm12168_vm6 = vcmask 1045509  }
0x13fb   : > { %9222 = vmatprep.subr.mxu1 %v12123_v35  ;;  %v4976_v58 = vsel %vm12153_vm7, %v4975_v39, %v4974_v57  ;;  %12155 = vst [vmem:[#allocation42_spill] sm:$0xff] %v11312_v29  ;;  %v11318_v39 = vld [vmem:[#allocation11 + $0x10] sm:$0xff]  ;;  %v11322_v57 = vld [vmem:[#allocation11 + $0x8] sm:$0xff]  ;;  %vm12170_vm7 = vcmask 1046534  }
0x13fc   : > { %9223 = vmatpush3.msra.mxu1 %v10383_v13  ;;  %v4977_v32 = vsel %vm12154_vm4, %v4976_v58, 0  ;;  %12156 = vst [vmem:[#allocation45_spill] sm:$0xff] %v11318_v39  ;;  %12157 = vst [vmem:[#allocation46_spill] sm:$0xff] %v11322_v57  ;;  %v11326_v58 = vld [vmem:[#allocation11] sm:$0xff]  ;;  %vm12171_vm4 = vcmask 1047559  }
0x13fd   : > { %9224 = vmatprep.subr.mxu1 %v12123_v35  ;;  %v11268_v11 = vand.u32 4294901760, %v4977_v32  ;;  %12158 = vst [vmem:[#allocation39_spill] sm:$0xff] %v11326_v58 }
0x13fe   : > { %9225 = vmatpush3.msra.mxu1 %v10386_v14 }
0x13ff   : > { %9226 = vmatprep.subr.mxu1 %v12123_v35  ;;  %v11274_v1 = vsub.f32 %v4977_v32, %v11268_v11 }
0x1400   : > { %9227 = vmatpush3.msra.mxu1 %v10399_v18 }
0x1401   : > { %9242 = vmatprep.subr.mxu1 %v12123_v35  ;;  %9229 = vmatmul.mubr.f32.vlgmr.msra.gmra.mxu1 %v11203_v0  ;;  %v5050_v46 = vand.u32 4294901760, %v11274_v1 }
0x1402   : > { %9243 = vmatpush3.msra.mxu1 %v10407_v22  ;;  %9250 = vmatprep.mubr.msk.f32.mxu1 %vm10053_vm0, %v12123_v35 }
0x1403   : > { %9244 = vmatprep.subr.mxu1 %v12123_v35  ;;  %v5051_v49 = vsub.f32 %v11274_v1, %v5050_v46 }
0x1404   : > { %9245 = vmatpush3.msra.mxu1 %v10411_v23 }
0x1405   : > { %9246 = vmatprep.subr.mxu1 %v12123_v35  ;;  %v5052_v31 = vand.u32 4294901760, %v5051_v49 }
0x1406   : > { %9247 = vmatpush3.msra.mxu1 %v10414_v24 }
0x1407   : > { %9248 = vmatprep.subr.mxu1 %v12123_v35 }
0x1408   : > { %9249 = vmatpush3.msra.mxu1 %v10422_v27 }
0x1409   : > { %9251 = vmatmul.mubr.f32.vlgmr.msra.gmra.mxu1 %v11200_v44  ;;  %9264 = vmatprep.subr.mxu1 %v12123_v35 }
0x140a   : > { %9265 = vmatpush3.msra.mxu1 %v10513_v33  ;;  %9272 = vmatprep.mubr.msk.f32.mxu1 %vm10053_vm0, %v12123_v35 }
0x140b   : > { %9266 = vmatprep.subr.mxu1 %v12123_v35 }
0x140c   : > { %9267 = vmatpush3.msra.mxu1 %v10518_v36 }
0x140d   : > { %9268 = vmatprep.subr.mxu1 %v12123_v35 }
0x140e   : > { %9269 = vmatpush3.msra.mxu1 %v10528_v42 }
0x140f   : > { %9270 = vmatprep.subr.mxu1 %v12123_v35 }
0x1410   : > { %9271 = vmatpush3.msra.mxu1 %v10537_v48 }
0x1411   : > { %9286 = vmatprep.subr.mxu1 %v12123_v35  ;;  %9273 = vmatmul.mubr.f32.vlgmr.msra.gmra.mxu1 %v5052_v31 }
0x1412   : > { %9287 = vmatpush3.msra.mxu1 %v10526_v41  ;;  %9294 = vmatprep.mubr.msk.f32.mxu1 %vm10053_vm0, %v12123_v35 }
0x1413   : > { %9288 = vmatprep.subr.mxu1 %v12123_v35 }
0x1414   : > { %9289 = vmatpush3.msra.mxu1 %v10535_v47 }
0x1415   : > { %9290 = vmatprep.subr.mxu1 %v12123_v35 }
0x1416   : > { %9291 = vmatpush3.msra.mxu1 %v10549_v54 }
0x1417   : > { %9292 = vmatprep.subr.mxu1 %v12123_v35 }
0x1418   : > { %9293 = vmatpush3.msra.mxu1 %v10558_v59 }
0x1419   : > { %9308 = vmatprep.subr.mxu1 %v12123_v35  ;;  %9295 = vmatmul.mubr.f32.vlgmr.msra.gmra.mxu1 %v11274_v1 }
0x141a   : > { %9309 = vmatpush3.msra.mxu1 %v10546_v52  ;;  %9316 = vmatprep.mubr.msk.f32.mxu1 %vm10053_vm0, %v12123_v35 }
0x141b   : > { %9310 = vmatprep.subr.mxu1 %v12123_v35 }
0x141c   : > { %9311 = vmatpush3.msra.mxu1 %v10555_v56 }
0x141d   : > { %9312 = vmatprep.subr.mxu1 %v12123_v35 }
0x141e   : > { %9313 = vmatpush3.msra.mxu1 %v10570_v62 }
0x141f   : > { %9314 = vmatprep.subr.mxu1 %v12123_v35 }
0x1420   : > { %9315 = vmatpush3.msra.mxu1 %v10580_v2 }
0x1421   : > { %9317 = vmatmul.mubr.f32.vlgmr.msra.gmra.mxu1 %v11268_v11  ;;  %9330 = vmatprep.subr.mxu1 %v12123_v35 }
0x1422   : > { %9331 = vmatpush3.msra.mxu1 %v11312_v29  ;;  %9338 = vmatprep.mubr.msk.f32.mxu1 %vm10053_vm0, %v12123_v35 }
0x1423   : > { %9332 = vmatprep.subr.mxu1 %v12123_v35 }
0x1424   : > { %9333 = vmatpush3.msra.mxu1 %v11318_v39  ;;  %v11447_v39 = vld [vmem:[%s10345_s14 + $0x1c] sm:$0xf] }
0x1425   : > { %9334 = vmatprep.subr.mxu1 %v12123_v35  ;;  %12169 = vst [vmem:[#allocation48_spill] sm:$0xff] %v11447_v39 }
0x1426   : > { %9335 = vmatpush3.msra.mxu1 %v11322_v57 }
0x1427   : > { %9336 = vmatprep.subr.mxu1 %v12123_v35 }
0x1428   : > { %9337 = vmatpush3.msra.mxu1 %v11326_v58  ;;  %v11437_v58 = vld [vmem:[%s10345_s14 + $0x14] sm:$0xf] }
0x1429   : > { %9346 = vmatprep.subr.mxu1 %v12123_v35  ;;  %12165 = vst [vmem:[#allocation44_spill] sm:$0xff] %v11437_v58 }
0x14b0   : > { %v4319_v32 = vpop.f32.mrf.mxu1 }
0x14b1   : > { %9196 = vmatmul.mubr.msk.f32.vlgmr.msra.gmra.mxu0 %vm12159_vm5, %v4319_v32 }
0x14b2   : > { %9210 = vmatpush3.msra.mxu0 %v12128_v15  ;;  %v9186_v49 = vpop.f32.mrf.mxu1  ;;  %9217 = vmatprep.mubr.msk.f32.mxu0 %vm10053_vm0, %v12123_v35 }
0x14b3   : > { %9211 = vmatprep.subr.mxu0 %v12123_v35 }
0x14b4   : > { %9212 = vmatpush3.msra.mxu0 %v12129_v19  ;;  %v11432_v19 = vld [vmem:[%s10345_s14 + $0x10] sm:$0xf] }
0x14b5   : > { %9213 = vmatprep.subr.mxu0 %v12123_v35  ;;  %12164 = vst [vmem:[#allocation43_spill] sm:$0xff] %v11432_v19 }
0x14b6   : > { %9214 = vmatpush3.msra.mxu0 %v12130_v3 }
0x14b7   : > { %9215 = vmatprep.subr.mxu0 %v12123_v35 }
0x14b8   : > { %9216 = vmatpush3.msra.mxu0 %v12131_v25 }
0x14b9   : > { %9218 = vmatmul.mubr.f32.vlgmr.msra.gmra.mxu0 %v11200_v44  ;;  %9231 = vmatprep.subr.mxu0 %v12123_v35 }
0x14ba   : > { %9232 = vmatpush3.msra.mxu0 %v10361_v4  ;;  %9239 = vmatprep.mubr.msk.f32.mxu0 %vm10053_vm0, %v12123_v35 }
0x14bb   : > { %9233 = vmatprep.subr.mxu0 %v12123_v35 }
0x14bc   : > { %9234 = vmatpush3.msra.mxu0 %v10363_v5 }
0x14bd   : > { %9235 = vmatprep.subr.mxu0 %v12123_v35 }
0x14be   : > { %9236 = vmatpush3.msra.mxu0 %v10365_v6 }
0x14bf   : > { %9237 = vmatprep.subr.mxu0 %v12123_v35 }
0x14c0   : > { %9238 = vmatpush3.msra.mxu0 %v10370_v9 }
0x14c1   : > { %9240 = vmatmul.mubr.f32.vlgmr.msra.gmra.mxu0 %v4549_v61  ;;  %9253 = vmatprep.subr.mxu0 %v12123_v35 }
0x14c2   : > { %9254 = vmatpush3.msra.mxu0 %v10361_v4  ;;  %9261 = vmatprep.mubr.msk.f32.mxu0 %vm10053_vm0, %v12123_v35 }
0x14c3   : > { %9255 = vmatprep.subr.mxu0 %v12123_v35 }
0x14c4   : > { %9256 = vmatpush3.msra.mxu0 %v10363_v5 }
0x14c5   : > { %9257 = vmatprep.subr.mxu0 %v12123_v35 }
0x14c6   : > { %9258 = vmatpush3.msra.mxu0 %v10365_v6 }
0x14c7   : > { %9259 = vmatprep.subr.mxu0 %v12123_v35 }
0x14c8   : > { %9260 = vmatpush3.msra.mxu0 %v10370_v9 }
0x14c9   : > { %9262 = vmatmul.mubr.f32.vlgmr.msra.gmra.mxu0 %v11200_v44  ;;  %9275 = vmatprep.subr.mxu0 %v12123_v35  ;;  %v11401_v44 = vpop.f32.mrf.mxu1 }
0x14ca   : > { %9276 = vmatpush3.msra.mxu0 %v12132_v16  ;;  %9283 = vmatprep.mubr.msk.f32.mxu0 %vm10053_vm0, %v12123_v35  ;;  %v11418_v16 = vld [vmem:[%s10345_s14 + $0x4] sm:$0xf] }
0x14cb   : > { %9277 = vmatprep.subr.mxu0 %v12123_v35  ;;  %v9208_v0 = vpop.f32.mrf.mxu1  ;;  %12161 = vst [vmem:[#allocation36_spill] sm:$0xff] %v11418_v16 }
0x14cc   : > { %9278 = vmatpush3.msra.mxu0 %v12133_v17  ;;  %v11414_v0 = vld [vmem:[%s10345_s14] sm:$0xf] }
0x14cd   : > { %9279 = vmatprep.subr.mxu0 %v12123_v35  ;;  %v11403_v61 = vpop.f32.mrf.mxu1  ;;  %12160 = vst [vmem:[#allocation37_spill] sm:$0xff] %v11414_v0 }
0x14ce   : > { %9280 = vmatpush3.msra.mxu0 %v12134_v28 }
0x14cf   : > { %9281 = vmatprep.subr.mxu0 %v12123_v35  ;;  %v9230_v1 = vpop.f32.mrf.mxu1 }
0x14d0   : > { %9282 = vmatpush3.msra.mxu0 %v12135_v26  ;;  %v5464_v1 = vrot.slane %v11414_v0, 2  ;;  %v5470_v0 = vrot.slane %v11432_v19, 6 }
0x14d1   : > { %9284 = vmatmul.mubr.f32.vlgmr.msra.gmra.mxu0 %v11268_v11  ;;  %9297 = vmatprep.subr.mxu0 %v12123_v35 }
0x14d2   : > { %9298 = vmatpush3.msra.mxu0 %v10513_v33  ;;  %9305 = vmatprep.mubr.msk.f32.mxu0 %vm10053_vm0, %v12123_v35 }
0x14d3   : > { %9299 = vmatprep.subr.mxu0 %v12123_v35 }
0x14d4   : > { %9300 = vmatpush3.msra.mxu0 %v10518_v36 }
0x14d5   : > { %9301 = vmatprep.subr.mxu0 %v12123_v35 }
0x14d6   : > { %9302 = vmatpush3.msra.mxu0 %v10528_v42 }
0x14d7   : > { %9303 = vmatprep.subr.mxu0 %v12123_v35 }
0x14d8   : > { %9304 = vmatpush3.msra.mxu0 %v10537_v48 }
0x14d9   : > { %9306 = vmatmul.mubr.f32.vlgmr.msra.gmra.mxu0 %v5050_v46  ;;  %9319 = vmatprep.subr.mxu0 %v12123_v35  ;;  %v11405_v46 = vpop.f32.mrf.mxu1 }
0x14da   : > { %9320 = vmatpush3.msra.mxu0 %v10513_v33  ;;  %9327 = vmatprep.mubr.msk.f32.mxu0 %vm10053_vm0, %v12123_v35 }
0x14db   : > { %9321 = vmatprep.subr.mxu0 %v12123_v35  ;;  %v9252_v31 = vpop.f32.mrf.mxu1 }
0x14dc   : > { %9322 = vmatpush3.msra.mxu0 %v10518_v36  ;;  %v5465_v31 = vrot.slane %v11418_v16, 1  ;;  %v5472_v16 = vrot.slane %v11437_v58, 5 }
0x14dd   : > { %9323 = vmatprep.subr.mxu0 %v12123_v35  ;;  %v11407_v32 = vpop.f32.mrf.mxu1 }
0x14de   : > { %9324 = vmatpush3.msra.mxu0 %v10528_v42  ;;  %v5466_v25 = vsel %vm624_vm1, %v5465_v31, %v5464_v1  ;;  %v11442_v31 = vld [vmem:[%s10345_s14 + $0x18] sm:$0xf] }
0x14df   : > { %9325 = vmatprep.subr.mxu0 %v12123_v35  ;;  %12167 = vst [vmem:[#allocation47_spill] sm:$0xff] %v11442_v31 }
0x14e0   : > { %9326 = vmatpush3.msra.mxu0 %v10537_v48 }
0x14e1   : > { %9328 = vmatmul.mubr.f32.vlgmr.msra.gmra.mxu0 %v11268_v11  ;;  %9341 = vmatprep.subr.mxu0 %v12123_v35  ;;  %v9274_v11 = vpop.f32.mrf.mxu1 }
0x14e2   : > { %9343 = vmatprep.mubr.msk.f32.mxu0 %vm10053_vm0, %v12123_v35  ;;  %v11423_v11 = vld [vmem:[%s10345_s14 + $0xc] sm:$0xf] }
0x14e3   : > { %v11409_v49 = vpop.f32.mrf.mxu1  ;;  %12162 = vst [vmem:[#allocation40_spill] sm:$0xff] %v11423_v11  ;;  %v5468_v3 = vrot.slane %v11423_v11, 7  ;;  %v5474_v11 = vrot.slane %v11442_v31, 4 }
0x14e5   : > { %v9296_v26 = vpop.f32.mrf.mxu1 }
0x14e6   : > { %v11427_v26 = vld [vmem:[%s10345_s14 + $0x8] sm:$0xf] }
0x14e7   : > { %v11411_v28 = vpop.f32.mrf.mxu1  ;;  %12163 = vst [vmem:[#allocation41_spill] sm:$0xff] %v11427_v26 }
0x14e9   : > { %v9318_v17 = vpop.f32.mrf.mxu1 }
0x14ea   : > { %v5467_v17 = vsel %vm12057_vm2, %v11427_v26, %v5466_v25  ;;  %v5476_v25 = vrot.slane %v11447_v39, 3 }
0x14eb   : > { %v5469_v15 = vsel %vm12056_vm3, %v5468_v3, %v5467_v17 }
0x14ec   : > { %v5471_v1 = vsel %vm12166_vm8, %v5470_v0, %v5469_v15  ;;  %vm12173_vm8 = vcmask 253952  }
0x14ed   : > { %v5473_v57 = vsel %vm12168_vm6, %v5472_v16, %v5471_v1  ;;  %v12172_v1 = vld [vmem:[#allocation38_spill] sm:$0xff]  ;;  %vm12174_vm6 = vmmov %vm12173_vm8 }
0x14ee   : > { %v5475_v19 = vsel %vm12170_vm7, %v5474_v11, %v5473_v57  ;;  %vm12175_vm7 = vmmov %vm12174_vm6 }
0x14ef   : > { %v5477_v3 = vsel %vm12171_vm4, %v5476_v25, %v5475_v19  ;;  %vm12176_vm4 = vmmov %vm12174_vm6 }
0x14f0   : > { %9339 = vmatmul.mubr.msk.f32.vlgmr.msra.gmra.mxu1 %vm12159_vm5, %v5477_v3  ;;  %vm12177_vm5 = vmmov %vm12176_vm4 }
0x14f1   : > { %9348 = vmatprep.mubr.msk.f32.mxu1 %vm10053_vm0, %v12123_v35  ;;  %vm12178_vm3 = vmmov %vm12176_vm4 }
0x14f2   : > { %vm12179_vm2 = vmmov %vm12178_vm3 }
0x1571   : > { %v4392_v15 = vpop.f32.mrf.mxu0 }
0x1572   : > { %v4393_v0 = vadd.f32 %v11050_v8, %v4392_v15 }
0x1573   : > { %v9197_v17 = vpop.f32.mrf.mxu0 }
0x1574   : > { %v4397_v16 = vcombine.high %v4393_v0, %v4393_v0  ;;  %v4404_v39 = vrot.slane %v4393_v0, %v12172_v1 }
0x1576   : > { %v4411_v57 = vrot.slane %v4397_v16, %v12172_v1  ;;  %v4412_v11 = vcombine.high %v4404_v39, %v4404_v39  ;;  %v4420_v19 = vrot.slane %v4404_v39, %v12172_v1 }
0x1578   : > { %v4413_v25 = vcombine.high %v4411_v57, %v4411_v57  ;;  %v4427_v3 = vrot.slane %v4411_v57, %v12172_v1  ;;  %v4434_v8 = vrot.slane %v4412_v11, %v12172_v1  ;;  %v4442_v15 = vcombine.high %v4420_v19, %v4420_v19  ;;  %4454 = vst.msk [vmem:[%s11061_s25 + $0x1] sm:$0x1] %vm12173_vm8, %v4420_v19  ;;  %vm12180_vm8 = vmmov %vm12179_vm2  ;;  %v11481_v57 = vld [vmem:[%s11966_s4] ss:$0 sm:$0xff] }
0x1579   : > { %v4644_v17 = vpop.f32.mrf.mxu0  ;;  %12181 = vst [vmem:[#allocation49_spill] sm:$0xff] %v11481_v57  ;;  %v4554_v11 = vadd.f32 %v11481_v57, %v11401_v44 }
0x157a   : > { %v4441_v0 = vrot.slane %v4413_v25, %v12172_v1  ;;  %v4443_v31 = vcombine.high %v4427_v3, %v4427_v3  ;;  %v4444_v16 = vcombine.high %v4434_v8, %v4434_v8  ;;  %4455 = vst.msk [vmem:[%s11061_s25 + $0x5] sm:$0x1] %vm12174_vm6, %v4434_v8  ;;  %v11490_v1 = vld [vmem:[%s11968_s6] ss:$0 sm:$0xff]  ;;  %vm12187_vm6 = vcmask 48128  }
0x157b   : > { %4456 = vst.msk [vmem:[%s11061_s25 + $0x9] sm:$0x1] %vm12175_vm7, %v4442_v15  ;;  %v9219_v39 = vpop.f32.mrf.mxu0  ;;  %12182 = vst [vmem:[#allocation50_spill] sm:$0xff] %v11490_v1  ;;  %v5055_v44 = vadd.f32 %v11490_v1, %v11407_v32  ;;  %vm12188_vm7 = vcmask 56320  }
0x157c   : > { %4458 = vst.msk [vmem:[%s11061_s25 + $0x11] sm:$0x1] %vm12176_vm4, %v4427_v3  ;;  %v4445_v58 = vcombine.high %v4441_v0, %v4441_v0  ;;  %v4645_v3 = vadd.f32 %v4644_v17, %v4554_v11 }
0x157d   : > { %4457 = vst.msk [vmem:[%s11061_s25 + $0xd] sm:$0x1] %vm12177_vm5, %v4444_v16 }
0x157e   : > { %4459 = vst.msk [vmem:[%s11061_s25 + $0x15] sm:$0x1] %vm12178_vm3, %v4441_v0  ;;  %v4725_v8 = vadd.f32 %v11403_v61, %v4645_v3 }
0x157f   : > { %4460 = vst.msk [vmem:[%s11061_s25 + $0x19] sm:$0x1] %vm12179_vm2, %v4443_v31  ;;  %vm12183_vm2 = vcmask 261120  }
0x1580   : > { %4461 = vst.msk [vmem:[%s11061_s25 + $0x1d] sm:$0x1] %vm12180_vm8, %v4445_v58  ;;  %vm12184_vm3 = vmmov %vm12183_vm2 }
0x1581   : > { %v4801_v19 = vpop.f32.mrf.mxu0 }
0x1582   : > { %v4802_v16 = vadd.f32 %v4801_v19, %v4725_v8 }
0x1583   : > { %v9241_v25 = vpop.f32.mrf.mxu0 }
0x1584   : > { %v4885_v31 = vadd.f32 %v11405_v46, %v4802_v16 }
0x1589   : > { %v4959_v15 = vpop.f32.mrf.mxu0 }
0x158a   : > { %v4960_v39 = vadd.f32 %v4959_v15, %v4885_v31 }
0x158b   : > { %v9263_v0 = vpop.f32.mrf.mxu0 }
0x158c   : > { %v5551_v17 = vsel %vm12183_vm2, %v4960_v39, 0 }
0x158d   : > { %v5622_v61 = vand.u32 4294901760, %v5551_v17 }
0x158f   : > { %v5623_v46 = vsub.f32 %v5551_v17, %v5622_v61 }
0x1591   : > { %v5145_v58 = vpop.f32.mrf.mxu0  ;;  %v5624_v15 = vand.u32 4294901760, %v5623_v46 }
0x1592   : > { %v5146_v11 = vadd.f32 %v5145_v58, %v5055_v44  ;;  %v11528_v44 = vld [vmem:[#allocation13] sm:$0xff] }
0x1593   : > { %v9285_v57 = vpop.f32.mrf.mxu0  ;;  %v5625_v32 = vsub.f32 %v5623_v46, %v5624_v15  ;;  %12185 = vst [vmem:[#allocation51_spill] sm:$0xff] %v11528_v44 }
0x1594   : > { %v5226_v19 = vadd.f32 %v11409_v49, %v5146_v11  ;;  %v11535_v11 = vld [vmem:[%s11970_s8] ss:$0 sm:$0xff] }
0x1595   : > { %v5626_v39 = vand.u32 4294901760, %v5625_v32  ;;  %12186 = vst [vmem:[#allocation52_spill] sm:$0xff] %v11535_v11 }
0x1599   : > { %v5302_v25 = vpop.f32.mrf.mxu0 }
0x159a   : > { %v5303_v8 = vadd.f32 %v5302_v25, %v5226_v19 }
0x159b   : > { %v9307_v3 = vpop.f32.mrf.mxu0 }
0x159c   : > { %v5386_v16 = vadd.f32 %v11411_v28, %v5303_v8 }
0x15a1   : > { %v5460_v0 = vpop.f32.mrf.mxu0 }
0x15a2   : > { %v5461_v31 = vadd.f32 %v5460_v0, %v5386_v16 }
0x15a3   : > { %v9329_v26 = vpop.f32.mrf.mxu0 }
0x15a4   : > { %v5554_v29 = vsel %vm12184_vm3, %v5461_v31, 0  ;;  %v11520_v26 = vld [vmem:[#allocation13 + $0x10] sm:$0xff] }
0x15a5   : > { %v5587_v57 = vand.u32 4294901760, %v5554_v29 }
0x15a7   : > { %v5664_v1 = vsub.f32 %v5554_v29, %v5587_v57  ;;  %9342 = vmatpush3.xpose.msra.mxu0 %v5587_v57  ;;  %v11514_v29 = vld [vmem:[#allocation13 + $0x18] sm:$0xff] }
0x15a8   : > { %9351 = vmatprep.subr.mxu0 %v12123_v35 }
0x15a9   : > { %v5665_v58 = vand.u32 4294901760, %v5664_v1 }
0x15aa   : > { %9344 = vmatmul.mubr.f32.vlgmr.msra.gmra.mxu0 %v5626_v39 }
0x15ab   : > { %9352 = vmatpush3.xpose.msra.mxu0 %v5664_v1  ;;  %9353 = vmatprep.mubr.msk.f32.mxu0 %vm10053_vm0, %v12123_v35  ;;  %v5666_v49 = vsub.f32 %v5664_v1, %v5665_v58  ;;  %v11524_v1 = vld [vmem:[#allocation13 + $0x8] sm:$0xff] }
0x15ac   : > { %9361 = vmatprep.subr.mxu0 %v12123_v35 }
0x15ad   : > { %v5667_v28 = vand.u32 4294901760, %v5666_v49 }
0x15ae   : > { %9354 = vmatmul.mubr.f32.vlgmr.msra.gmra.mxu0 %v5623_v46 }
0x15af   : > { %9347 = vmatpush3.xpose.msra.mxu1 %v5667_v28  ;;  %9362 = vmatpush3.xpose.msra.mxu0 %v5665_v58 }
0x15b0   : > { %9363 = vmatprep.mubr.msk.f32.mxu0 %vm10053_vm0, %v12123_v35  ;;  %9356 = vmatprep.subr.mxu1 %v12123_v35  ;;  %v5546_v17 = vpop.f32.mrf.mxu1 }
0x15b1   : > { %9371 = vmatprep.subr.mxu0 %v12123_v35 }
0x15b2   : > { %9349 = vmatmul.mubr.f32.vlgmr.msra.gmra.mxu1 %v5622_v61  ;;  %9364 = vmatmul.mubr.f32.vlgmr.msra.gmra.mxu0 %v5622_v61  ;;  %v9340_v25 = vpop.f32.mrf.mxu1 }
0x15b3   : > { %9357 = vmatpush3.xpose.msra.mxu1 %v5587_v57  ;;  %9358 = vmatprep.mubr.msk.f32.mxu1 %vm10053_vm0, %v12123_v35 }
0x15b4   : > { %9366 = vmatprep.subr.mxu1 %v12123_v35  ;;  %9373 = vmatprep.mubr.msk.f32.mxu0 %vm10053_vm0, %v12123_v35 }
0x15b6   : > { %9359 = vmatmul.mubr.f32.vlgmr.msra.gmra.mxu1 %v5624_v15 }
0x15b7   : > { %9367 = vmatpush3.xpose.msra.mxu1 %v5587_v57  ;;  %9368 = vmatprep.mubr.msk.f32.mxu1 %vm10053_vm0, %v12123_v35 }
0x15b8   : > { %9376 = vmatprep.subr.mxu1 %v12123_v35 }
0x15ba   : > { %9369 = vmatmul.mubr.f32.vlgmr.msra.gmra.mxu1 %v5622_v61  ;;  %v5547_v61 = vadd.f32 %v11535_v11, %v5546_v17 }
0x15bb   : > { %9377 = vmatpush3.msra.mxu1 %v11514_v29  ;;  %9384 = vmatprep.mubr.msk.f32.mxu1 %vm10053_vm0, %v12123_v35 }
0x15bc   : > { %9378 = vmatprep.subr.mxu1 %v12123_v35  ;;  %9372 = vmatpush3.msra.mxu0 %v5547_v61 }
0x15bd   : > { %9379 = vmatpush3.msra.mxu1 %v11520_v26  ;;  %9387 = vmatprep.subr.mxu0 %v12123_v35 }
0x15be   : > { %9380 = vmatprep.subr.mxu1 %v12123_v35 }
0x15bf   : > { %9381 = vmatpush3.msra.mxu1 %v11524_v1 }
0x15c0   : > { %9382 = vmatprep.subr.mxu1 %v12123_v35 }
0x15c1   : > { %9383 = vmatpush3.msra.mxu1 %v11528_v44 }
0x15c2   : > { %9398 = vmatprep.subr.mxu1 %v12123_v35 }
0x166a   : > { %v5628_v19 = vpop.f32.mrf.mxu0 }
0x166c   : > { %v9345_v3 = vpop.f32.mrf.mxu0 }
0x166e   : > { %v5778_v46 = vpop.f32.mrf.mxu0 }
0x1670   : > { %v9355_v8 = vpop.f32.mrf.mxu0 }
0x1672   : > { %v5704_v15 = vpop.f32.mrf.mxu1  ;;  %v5926_v16 = vpop.f32.mrf.mxu0 }
0x1673   : > { %v5705_v0 = vadd.f32 %v5704_v15, %v5628_v19 }
0x1674   : > { %v9350_v31 = vpop.f32.mrf.mxu1  ;;  %v9365_v32 = vpop.f32.mrf.mxu0 }
0x1675   : > { %v5779_v57 = vadd.f32 %v5778_v46, %v5705_v0 }
0x1676   : > { %v5852_v39 = vpop.f32.mrf.mxu1 }
0x1677   : > { %v5853_v58 = vadd.f32 %v5852_v39, %v5779_v57 }
0x1678   : > { %v9360_v49 = vpop.f32.mrf.mxu1 }
0x1679   : > { %v5927_v28 = vadd.f32 %v5926_v16, %v5853_v58 }
0x167a   : > { %v5998_v44 = vpop.f32.mrf.mxu1 }
0x167b   : > { %v5999_v17 = vadd.f32 %v5998_v44, %v5927_v28 }
0x167c   : > { %v9370_v25 = vpop.f32.mrf.mxu1 }
0x167d   : > { %6006 = vrot.lane.b32.xlu1 %v5999_v17, %s10055_s29  ;;  %6003 = vrot.lane.b32.xlu0 %v5999_v17, %s10054_s26 }
0x16ef   : > { %v6007_v61 = vpop.permute.xlu1 %6006  ;;  %v6004_v3 = vpop.permute.xlu0 %6003 }
0x16f0   : > { %v6009_v8 = vsel %vm2206_vm9, %v6004_v3, %v6007_v61 }
0x16f1   : > { %v6011_v11 = vrot.slane %v6009_v8, 4 }
0x16f3   : > { %v6013_v19 = vadd.f32 %v6011_v11, %v5999_v17 }
0x16f5   : > { %6018 = vrot.lane.b32.xlu1 %v6013_v19, %s10057_s17  ;;  %6015 = vrot.lane.b32.xlu0 %v6013_v19, %s10056_s12 }
0x1767   : > { %v6019_v46 = vpop.permute.xlu1 %6018  ;;  %v6016_v15 = vpop.permute.xlu0 %6015 }
0x1768   : > { %v6021_v16 = vsel %vm12187_vm6, %v6016_v15, %v6019_v46 }
0x1769   : > { %v6023_v44 = vrot.slane %v6021_v16, 2 }
0x176b   : > { %v6025_v0 = vadd.f32 %v6023_v44, %v6013_v19 }
0x176d   : > { %6030 = vrot.lane.b32.xlu1 %v6025_v0, %s10058_s30  ;;  %6027 = vrot.lane.b32.xlu0 %v6025_v0, %s10059_s24 }
0x17df   : > { %v6031_v31 = vpop.permute.xlu1 %6030  ;;  %v6028_v32 = vpop.permute.xlu0 %6027 }
0x17e0   : > { %v6033_v57 = vsel %vm12188_vm7, %v6028_v32, %v6031_v31 }
0x17e1   : > { %v6035_v39 = vrot.slane %v6033_v57, 1 }
0x17e3   : > { %v6037_v11 = vadd.f32 %v6035_v39, %v6025_v0 }
0x17e5   : > { %v6038_v58 = vmul.f32 0.03125, %v6037_v11 }
0x17e7   : > { %v6039_v49 = vsel %vm2239_vm12, %v6038_v58, -inf }
0x17e8   : > { %6040 = vmax.xlane.f32.xlu0 %v6039_v49 }
0x1871   : > { %v6041_v28 = vpop.xlane.xlu0 %6040 }
0x1872   : > { %vm6042_vm4 = vcmp.eq.f32.partialorder %v6038_v58, %v6041_v28 }
0x1873   : > { %v6043_v17 = vsel %vm6042_vm4, %v10782_v53, 8 }
0x1874   : > { %v6044_v25 = vsel %vm2239_vm12, %v6043_v17, 2147483647 }
0x1875   : > { %v6046_v61 = vshra.s32 %v6044_v25, 16  ;;  %v6045_v8 = vand.u32 65535, %v6044_v25 }
0x1877   : > { %v6048_v3 = vcvt.s32.f32 %v6046_v61  ;;  %v6047_v46 = vcvt.s32.f32 %v6045_v8 }
0x1879   : > { %6049 = vmin.xlane.f32.xlu1 %v6048_v3 }
0x1902   : > { %v6050_v19 = vpop.xlane.xlu1 %6049 }
0x1903   : > { %vm6051_vm5 = vcmp.eq.f32.partialorder %v6048_v3, %v6050_v19  ;;  %v6056_v16 = vcvt.f32.s32 %v6050_v19 }
0x1904   : > { %v6052_v15 = vsel %vm6051_vm5, %v6047_v46, inf }
0x1905   : > { %6053 = vmin.xlane.f32.xlu0 %v6052_v15  ;;  %v6057_v0 = vshll.u32 %v6056_v16, 16 }
0x198e   : > { %v6054_v44 = vpop.xlane.xlu0 %6053 }
0x198f   : > { %v6055_v31 = vcvt.f32.s32 %v6054_v44 }
0x1991   : > { %v6058_v32 = vadd.s32 %v6057_v0, %v6055_v31 }
0x1993   : > { %vm6059_vm8 = vcmp.eq.s32.totalorder %v10782_v53, %v6058_v32  ;;  %vm6060_vm6 = vcmp.eq.s32.totalorder %v6058_v32, 0 }
0x1994   : > { %v6066_v57 = vsel %vm6059_vm8, -1e+30, %v6038_v58  ;;  %v6061_v58 = vsub.s32 8, %v6058_v32 }
0x1995   : > { %v6067_v39 = vsel %vm2239_vm12, %v6066_v57, -inf }
0x1996   : > { %6068 = vmax.xlane.f32.xlu0 %v6067_v39 }
0x1a1f   : > { %v6069_v11 = vpop.xlane.xlu0 %6068 }
0x1a20   : > { %vm6070_vm2 = vcmp.eq.f32.partialorder %v6066_v57, %v6069_v11  ;;  %v6062_v57 = vsel %vm6060_vm6, 0, %v6061_v58  ;;  %vm12191_vm6 = vcmask 1043459  }
0x1a21   : > { %v6071_v49 = vsel %vm6070_vm2, %v10782_v53, 8  ;;  %vm6063_vm4 = vcmp.eq.s32.totalorder %v10782_v53, %v6062_v57  ;;  %vm12189_vm2 = vcmask 15360  }
0x1a22   : > { %v6072_v17 = vsel %vm2239_vm12, %v6071_v49, 2147483647 }
0x1a23   : > { %v6074_v25 = vshra.s32 %v6072_v17, 16  ;;  %v6073_v3 = vand.u32 65535, %v6072_v17  ;;  %v6064_v17 = vsel %vm6063_vm4, %v6041_v28, 0.0 }
0x1a25   : > { %v6076_v61 = vcvt.s32.f32 %v6074_v25  ;;  %v6075_v19 = vcvt.s32.f32 %v6073_v3 }
0x1a27   : > { %6077 = vmin.xlane.f32.xlu1 %v6076_v61 }
0x1ab0   : > { %v6078_v8 = vpop.xlane.xlu1 %6077 }
0x1ab1   : > { %vm6079_vm3 = vcmp.eq.f32.partialorder %v6076_v61, %v6078_v8  ;;  %v6084_v15 = vcvt.f32.s32 %v6078_v8 }
0x1ab2   : > { %v6080_v46 = vsel %vm6079_vm3, %v6075_v19, inf  ;;  %vm12190_vm3 = vcmask 1042434  }
0x1ab3   : > { %6081 = vmin.xlane.f32.xlu0 %v6080_v46  ;;  %v6085_v44 = vshll.u32 %v6084_v15, 16 }
0x1b3c   : > { %v6082_v16 = vpop.xlane.xlu0 %6081 }
0x1b3d   : > { %v6083_v0 = vcvt.f32.s32 %v6082_v16 }
0x1b3f   : > { %v6086_v31 = vadd.s32 %v6085_v44, %v6083_v0 }
0x1b41   : > { %vm6087_vm7 = vcmp.eq.s32.totalorder %v6086_v31, 0  ;;  %v6088_v39 = vsub.s32 8, %v6086_v31 }
0x1b43   : > { %v6089_v49 = vsel %vm6087_vm7, 0, %v6088_v39  ;;  %vm12192_vm7 = vcmask 1044484  }
0x1b44   : > { %vm6090_vm5 = vcmp.eq.s32.totalorder %v10782_v53, %v6089_v49 }
0x1b45   : > { %v6092_v25 = vsel %vm6090_vm5, %v6069_v11, 0.0  ;;  %vm6091_vm8 = vmor %vm6063_vm4, %vm6090_vm5  ;;  %vm12193_vm4 = vcmask 1045509   ;;  %vm12194_vm5 = vcmask 1046534  }
0x1b46   : > { %v6093_v61 = vadd.f32 %v6092_v25, %v6064_v17 }
0x1b48   : > { %v6094_v3 = vsel %vm6091_vm8, %v6093_v61, -1e+30 }
0x1b49   : > { %v6095_v8 = vsel %vm2239_vm12, %v6094_v3, -inf }
0x1b4a   : > { %6096 = vmax.xlane.f32.xlu1 %v6095_v8 }
0x1bd3   : > { %v6097_v32 = vpop.xlane.xlu1 %6096 }
0x1bd4   : > { %v6098_v19 = vsub.f32 %v6094_v3, %v6097_v32 }
0x1bd6   : > { %v6099_v46 = vmul.f32 1.442695, %v6098_v19 }
0x1bd8   : > { %9715 = vpow2.f32 %v6099_v46 }
0x1be5   : > { %v9716_v15 = vpop.eup %9715 }
0x1be6   : > { %v6101_v58 = vsel %vm6091_vm8, %v9716_v15, 0.0  ;;  %vm12195_vm8 = vcmask 1047559  }
0x1be7   : > { %v6102_v16 = vsel %vm2239_vm12, %v6101_v58, 0.0 }
0x1be8   : > { %6103 = vadd.xlane.f32.xlu0 %v6102_v16  ;;  %v6355_v16 = vrot.slane %v11161_v43, 3 }
0x1c71   : > { %v6104_v44 = vpop.xlane.xlu0 %6103 }
0x1c72   : > { %9717 = vrcp.f32 %v6104_v44  ;;  %v6356_v44 = vrot.slane %v11165_v50, 2  ;;  %v6367_v50 = vrot.slane %v11194_v20, 4  ;;  %v6856_v20 = vrot.slane %v11216_v60, 3 }
0x1c7f   : > { %v9718_v0 = vpop.eup %9717 }
0x1c80   : > { %v6106_v28 = vmul.f32 %v9718_v0, %v6101_v58  ;;  %v6358_v0 = vrot.slane %v11174_v55, 1 }
0x1c82   : > { %6111 = vrot.lane.b32.xlu0 %v6106_v28, %s10060_s20  ;;  %6108 = vrot.lane.b32.xlu1 %v6106_v28, %s10061_s13 }
0x1cf4   : > { %v6112_v11 = vpop.permute.xlu0 %6111  ;;  %v6109_v31 = vpop.permute.xlu1 %6108 }
0x1cf5   : > { %v6114_v57 = vsel %vm2315_vm10, %v6109_v31, %v6112_v11  ;;  %v6361_v31 = vrot.slane %v11179_v21, 7 }
0x1cf6   : > { %v6116_v39 = vrot.slane %v6114_v57, 7 }
0x1cf8   : > { %v6118_v49 = vsel %vm2320_vm11, %v6106_v28, %v6116_v39  ;;  %v6357_v28 = vsel %vm624_vm1, %v6356_v44, %v6355_v16  ;;  %v6363_v39 = vrot.slane %v11184_v51, 6 }
0x1cf9   : > { %6120 = vrot.lane.b32.xlu1 %v6118_v49, %s10062_s28  ;;  %v6359_v11 = vsel %vm12190_vm3, %v6358_v0, %v6357_v28 }
0x1cfa   : > { %v6360_v57 = vsel %vm12191_vm6, %v11170_v7, %v6359_v11 }
0x1cfd   : > { %6123 = vrot.lane.b32.xlu1 %v6118_v49, %s10063_s5 }
0x1d6b   : > { %v6121_v17 = vpop.permute.xlu1 %6120 }
0x1d6f   : > { %v6124_v25 = vpop.permute.xlu1 %6123 }
0x1d70   : > { %v6126_v61 = vsel %vm12189_vm2, %v6121_v17, %v6124_v25  ;;  %v6365_v17 = vrot.slane %v11189_v30, 5  ;;  %vm12196_vm2 = vcmask 261120  }
0x1d71   : > { %v6128_v3 = vrot.slane %v6126_v61, 6 }
0x1d73   : > { %v6130_v8 = vsel %vm2334_vm13, %v6118_v49, %v6128_v3  ;;  %v6362_v49 = vsel %vm12192_vm7, %v6361_v31, %v6360_v57 }
0x1d74   : > { %6135 = vrot.lane.b32.xlu1 %v6130_v8, %s10055_s29  ;;  %6132 = vrot.lane.b32.xlu0 %v6130_v8, %s10054_s26  ;;  %v6364_v43 = vsel %vm12193_vm4, %v6363_v39, %v6362_v49  ;;  %v12210_v39 = vld [vmem:[#allocation37_spill] sm:$0xff] }
0x1d75   : > { %v6366_v55 = vsel %vm12194_vm5, %v6365_v17, %v6364_v43  ;;  %v7357_v49 = vrot.slane %v12210_v39, 3  ;;  %v12211_v17 = vld [vmem:[#allocation36_spill] sm:$0xff] }
0x1d76   : > { %v6368_v25 = vsel %vm12195_vm8, %v6367_v50, %v6366_v55  ;;  %v7358_v43 = vrot.slane %v12211_v17, 2  ;;  %v12212_v50 = vld [vmem:[#allocation41_spill] sm:$0xff] }
0x1d77   : > { %v6369_v61 = vsel %vm12196_vm2, %v6368_v25, 0  ;;  %v7360_v55 = vrot.slane %v12212_v50, 1 }
0x1d78   : > { %v11598_v21 = vand.u32 4294901760, %v6369_v61  ;;  %v7359_v25 = vsel %vm624_vm1, %v7358_v43, %v7357_v49  ;;  %v12234_v49 = vld [vmem:[#allocation50_spill] sm:$0xff] }
0x1d7a   : > { %v11601_v7 = vsub.f32 %v6369_v61, %v11598_v21 }
0x1d7c   : > { %v6442_v51 = vand.u32 4294901760, %v11601_v7 }
0x1d7e   : > { %v6443_v30 = vsub.f32 %v11601_v7, %v6442_v51 }
0x1d80   : > { %v6444_v3 = vand.u32 4294901760, %v6443_v30 }
0x1de6   : > { %v6136_v32 = vpop.permute.xlu1 %6135  ;;  %v6133_v19 = vpop.permute.xlu0 %6132 }
0x1de7   : > { %v6138_v46 = vsel %vm2206_vm9, %v6133_v19, %v6136_v32  ;;  %v6859_v32 = vrot.slane %v11232_v37, 1 }
0x1de8   : > { %v6140_v15 = vrot.slane %v6138_v46, 4  ;;  %v12204_v46 = vld [vmem:[#allocation30_spill] sm:$0xff] }
0x1dea   : > { %v6142_v58 = vsel %vm2347_vm14, %v6130_v8, %v6140_v15  ;;  %v6857_v8 = vrot.slane %v11220_v45, 2  ;;  %v6866_v45 = vrot.slane %v11252_v10, 5  ;;  %v12205_v15 = vld [vmem:[#allocation31_spill] sm:$0xff] }
0x1deb   : > { %9374 = vmatmul.mubr.msk.f32.vlgmr.msra.gmra.mxu0 %vm2349_vm15, %v6142_v58 }
0x1dec   : > { %9388 = vmatpush3.msra.mxu0 %v10361_v4  ;;  %9395 = vmatprep.mubr.msk.f32.mxu0 %vm10053_vm0, %v12123_v35 }
0x1ded   : > { %9389 = vmatprep.subr.mxu0 %v12123_v35 }
0x1dee   : > { %9390 = vmatpush3.msra.mxu0 %v10363_v5 }
0x1def   : > { %9391 = vmatprep.subr.mxu0 %v12123_v35 }
0x1df0   : > { %9392 = vmatpush3.msra.mxu0 %v10365_v6 }
0x1df1   : > { %9393 = vmatprep.subr.mxu0 %v12123_v35 }
0x1df2   : > { %9394 = vmatpush3.msra.mxu0 %v10370_v9 }
0x1df3   : > { %9409 = vmatprep.subr.mxu0 %v12123_v35  ;;  %9396 = vmatmul.mubr.f32.vlgmr.msra.gmra.mxu0 %v6444_v3  ;;  %v12217_v3 = vld [vmem:[#allocation44_spill] sm:$0xff] }
0x1df4   : > { %9410 = vmatpush3.msra.mxu0 %v10380_v12  ;;  %9417 = vmatprep.mubr.msk.f32.mxu0 %vm10053_vm0, %v12123_v35  ;;  %v6858_v12 = vsel %vm624_vm1, %v6857_v8, %v6856_v20  ;;  %v7365_v20 = vrot.slane %v12217_v3, 6  ;;  %vm12223_vm1 = vcmask 1047559  }
0x1df5   : > { %9411 = vmatprep.subr.mxu0 %v12123_v35  ;;  %v6860_v19 = vsel %vm12190_vm3, %v6859_v32, %v6858_v12  ;;  %vm12201_vm3 = vmmov %vm12196_vm2  ;;  %v12219_v32 = vld [vmem:[#allocation47_spill] sm:$0xff] }
0x1df6   : > { %9412 = vmatpush3.msra.mxu0 %v10383_v13  ;;  %v6862_v13 = vrot.slane %v11237_v63, 7  ;;  %v6861_v60 = vsel %vm12191_vm6, %v11227_v38, %v6860_v19  ;;  %v6868_v63 = vrot.slane %v11258_v40, 4  ;;  %vm12213_vm6 = vcmask 1042434  }
0x1df7   : > { %9413 = vmatprep.subr.mxu0 %v12123_v35  ;;  %v7361_v61 = vsel %vm12213_vm6, %v7360_v55, %v7359_v25  ;;  %v7367_v12 = vrot.slane %v12219_v32, 5 }
0x1df8   : > { %9414 = vmatpush3.msra.mxu0 %v10386_v14  ;;  %v6864_v14 = vrot.slane %v11244_v34, 6 }
0x1df9   : > { %9415 = vmatprep.subr.mxu0 %v12123_v35 }
0x1dfa   : > { %9416 = vmatpush3.msra.mxu0 %v10399_v18  ;;  %v6863_v18 = vsel %vm12192_vm7, %v6862_v13, %v6861_v60  ;;  %vm12216_vm7 = vcmask 1043459   ;;  %v12221_v13 = vld [vmem:[#allocation48_spill] sm:$0xff] }
0x1dfb   : > { %9431 = vmatprep.subr.mxu0 %v12123_v35  ;;  %9418 = vmatmul.mubr.f32.vlgmr.msra.gmra.mxu0 %v11601_v7  ;;  %v6865_v37 = vsel %vm12193_vm4, %v6864_v14, %v6863_v18  ;;  %vm12218_vm4 = vcmask 1044484   ;;  %v7369_v60 = vrot.slane %v12221_v13, 4 }
0x1dfc   : > { %9432 = vmatpush3.msra.mxu0 %v10407_v22  ;;  %9439 = vmatprep.mubr.msk.f32.mxu0 %vm10053_vm0, %v12123_v35  ;;  %v6867_v38 = vsel %vm12194_vm5, %v6866_v45, %v6865_v37  ;;  %vm12220_vm5 = vcmask 1045509   ;;  %v11792_v37 = vld [vmem:[%s11972_s10] ss:$0 sm:$0xff] }
0x1dfd   : > { %9433 = vmatprep.subr.mxu0 %v12123_v35  ;;  %v6869_v22 = vsel %vm12195_vm8, %v6868_v63, %v6867_v38  ;;  %vm12222_vm8 = vcmask 1046534  }
0x1dfe   : > { %9434 = vmatpush3.msra.mxu0 %v10411_v23  ;;  %v6870_v34 = vsel %vm12196_vm2, %v6869_v22, 0 }
0x1dff   : > { %9435 = vmatprep.subr.mxu0 %v12123_v35  ;;  %v11642_v10 = vand.u32 4294901760, %v6870_v34 }
0x1e00   : > { %9436 = vmatpush3.msra.mxu0 %v10414_v24 }
0x1e01   : > { %9437 = vmatprep.subr.mxu0 %v12123_v35  ;;  %v11648_v23 = vsub.f32 %v6870_v34, %v11642_v10  ;;  %v12224_v34 = vld [vmem:[#allocation38_spill] sm:$0xff] }
0x1e02   : > { %9438 = vmatpush3.msra.mxu0 %v10422_v27 }
0x1e03   : > { %9440 = vmatmul.mubr.f32.vlgmr.msra.gmra.mxu0 %v11598_v21  ;;  %9453 = vmatprep.subr.mxu0 %v12123_v35  ;;  %v6943_v24 = vand.u32 4294901760, %v11648_v23 }
0x1e04   : > { %9454 = vmatpush3.msra.mxu0 %v10513_v33  ;;  %9461 = vmatprep.mubr.msk.f32.mxu0 %vm10053_vm0, %v12123_v35 }
0x1e05   : > { %9455 = vmatprep.subr.mxu0 %v12123_v35  ;;  %v6944_v27 = vsub.f32 %v11648_v23, %v6943_v24 }
0x1e06   : > { %9456 = vmatpush3.msra.mxu0 %v10518_v36 }
0x1e07   : > { %9457 = vmatprep.subr.mxu0 %v12123_v35  ;;  %v6945_v40 = vand.u32 4294901760, %v6944_v27 }
0x1e08   : > { %9458 = vmatpush3.msra.mxu0 %v10528_v42 }
0x1e09   : > { %9459 = vmatprep.subr.mxu0 %v12123_v35 }
0x1e0a   : > { %9460 = vmatpush3.msra.mxu0 %v10537_v48 }
0x1e0b   : > { %9475 = vmatprep.subr.mxu0 %v12123_v35  ;;  %9462 = vmatmul.mubr.f32.vlgmr.msra.gmra.mxu0 %v6945_v40 }
0x1e0c   : > { %9476 = vmatpush3.msra.mxu0 %v10526_v41  ;;  %9483 = vmatprep.mubr.msk.f32.mxu0 %vm10053_vm0, %v12123_v35  ;;  %v12197_v41 = vld [vmem:[#allocation42_spill] sm:$0xff] }
0x1e0d   : > { %9477 = vmatprep.subr.mxu0 %v12123_v35 }
0x1e0e   : > { %9478 = vmatpush3.msra.mxu0 %v10535_v47  ;;  %v12198_v47 = vld [vmem:[#allocation45_spill] sm:$0xff] }
0x1e0f   : > { %9479 = vmatprep.subr.mxu0 %v12123_v35 }
0x1e10   : > { %9480 = vmatpush3.msra.mxu0 %v10549_v54  ;;  %v12200_v54 = vld [vmem:[#allocation39_spill] sm:$0xff] }
0x1e11   : > { %9481 = vmatprep.subr.mxu0 %v12123_v35 }
0x1e12   : > { %9482 = vmatpush3.msra.mxu0 %v10558_v59  ;;  %v12202_v59 = vld [vmem:[#allocation28_spill] sm:$0xff] }
0x1e13   : > { %9497 = vmatprep.subr.mxu0 %v12123_v35  ;;  %9484 = vmatmul.mubr.f32.vlgmr.msra.gmra.mxu0 %v11648_v23 }
0x1e14   : > { %9498 = vmatpush3.msra.mxu0 %v10546_v52  ;;  %9505 = vmatprep.mubr.msk.f32.mxu0 %vm10053_vm0, %v12123_v35  ;;  %v12199_v52 = vld [vmem:[#allocation46_spill] sm:$0xff] }
0x1e15   : > { %9499 = vmatprep.subr.mxu0 %v12123_v35 }
0x1e16   : > { %9500 = vmatpush3.msra.mxu0 %v10555_v56 }
0x1e17   : > { %9501 = vmatprep.subr.mxu0 %v12123_v35 }
0x1e18   : > { %9502 = vmatpush3.msra.mxu0 %v10570_v62 }
0x1e19   : > { %9503 = vmatprep.subr.mxu0 %v12123_v35 }
0x1e1a   : > { %9504 = vmatpush3.msra.mxu0 %v10580_v2  ;;  %v12203_v2 = vld [vmem:[#allocation29_spill] sm:$0xff] }
0x1e1b   : > { %9506 = vmatmul.mubr.f32.vlgmr.msra.gmra.mxu0 %v11642_v10  ;;  %9519 = vmatprep.subr.mxu0 %v12123_v35 }
0x1e1c   : > { %9520 = vmatpush3.msra.mxu0 %v12197_v41  ;;  %9527 = vmatprep.mubr.msk.f32.mxu0 %vm10053_vm0, %v12123_v35 }
0x1e1d   : > { %9521 = vmatprep.subr.mxu0 %v12123_v35 }
0x1e1e   : > { %9522 = vmatpush3.msra.mxu0 %v12198_v47 }
0x1e1f   : > { %9523 = vmatprep.subr.mxu0 %v12123_v35 }
0x1e20   : > { %9524 = vmatpush3.msra.mxu0 %v12199_v52 }
0x1e21   : > { %9525 = vmatprep.subr.mxu0 %v12123_v35 }
0x1e22   : > { %9526 = vmatpush3.msra.mxu0 %v12200_v54 }
0x1e23   : > { %9535 = vmatprep.subr.mxu0 %v12123_v35 }
0x1eab   : > { %v6212_v56 = vpop.f32.mrf.mxu0 }
0x1eac   : > { %9385 = vmatmul.mubr.msk.f32.vlgmr.msra.gmra.mxu1 %vm12201_vm3, %v6212_v56  ;;  %vm12225_vm3 = vcmask 253952  }
0x1ead   : > { %9399 = vmatpush3.msra.mxu1 %v12202_v59  ;;  %v9375_v62 = vpop.f32.mrf.mxu0  ;;  %9406 = vmatprep.mubr.msk.f32.mxu1 %vm10053_vm0, %v12123_v35  ;;  %vm12226_vm6 = vmmov %vm12225_vm3 }
0x1eae   : > { %9400 = vmatprep.subr.mxu1 %v12123_v35 }
0x1eaf   : > { %9401 = vmatpush3.msra.mxu1 %v12203_v2 }
0x1eb0   : > { %9402 = vmatprep.subr.mxu1 %v12123_v35 }
0x1eb1   : > { %9403 = vmatpush3.msra.mxu1 %v12204_v46 }
0x1eb2   : > { %9404 = vmatprep.subr.mxu1 %v12123_v35 }
0x1eb3   : > { %9405 = vmatpush3.msra.mxu1 %v12205_v15  ;;  %v12233_v15 = vld [vmem:[#allocation49_spill] sm:$0xff] }
0x1eb4   : > { %9407 = vmatmul.mubr.f32.vlgmr.msra.gmra.mxu1 %v11598_v21  ;;  %9420 = vmatprep.subr.mxu1 %v12123_v35 }
0x1eb5   : > { %9421 = vmatpush3.msra.mxu1 %v10361_v4  ;;  %9428 = vmatprep.mubr.msk.f32.mxu1 %vm10053_vm0, %v12123_v35 }
0x1eb6   : > { %9422 = vmatprep.subr.mxu1 %v12123_v35 }
0x1eb7   : > { %9423 = vmatpush3.msra.mxu1 %v10363_v5 }
0x1eb8   : > { %9424 = vmatprep.subr.mxu1 %v12123_v35 }
0x1eb9   : > { %9425 = vmatpush3.msra.mxu1 %v10365_v6 }
0x1eba   : > { %9426 = vmatprep.subr.mxu1 %v12123_v35 }
0x1ebb   : > { %9427 = vmatpush3.msra.mxu1 %v10370_v9 }
0x1ebc   : > { %9429 = vmatmul.mubr.f32.vlgmr.msra.gmra.mxu1 %v6442_v51  ;;  %9442 = vmatprep.subr.mxu1 %v12123_v35  ;;  %v12215_v51 = vld [vmem:[#allocation40_spill] sm:$0xff] }
0x1ebd   : > { %9443 = vmatpush3.msra.mxu1 %v10361_v4  ;;  %9450 = vmatprep.mubr.msk.f32.mxu1 %vm10053_vm0, %v12123_v35  ;;  %v12206_v4 = vld [vmem:[#allocation32_spill] sm:$0xff]  ;;  %v7362_v30 = vsel %vm12216_vm7, %v12215_v51, %v7361_v61  ;;  %vm12227_vm7 = vmmov %vm12225_vm3 }
0x1ebe   : > { %9444 = vmatprep.subr.mxu1 %v12123_v35 }
0x1ebf   : > { %9445 = vmatpush3.msra.mxu1 %v10363_v5  ;;  %v12207_v5 = vld [vmem:[#allocation33_spill] sm:$0xff] }
0x1ec0   : > { %9446 = vmatprep.subr.mxu1 %v12123_v35 }
0x1ec1   : > { %9447 = vmatpush3.msra.mxu1 %v10365_v6  ;;  %v12208_v6 = vld [vmem:[#allocation34_spill] sm:$0xff] }
0x1ec2   : > { %9448 = vmatprep.subr.mxu1 %v12123_v35 }
0x1ec3   : > { %9449 = vmatpush3.msra.mxu1 %v10370_v9  ;;  %v12209_v9 = vld [vmem:[#allocation35_spill] sm:$0xff] }
0x1ec4   : > { %9451 = vmatmul.mubr.f32.vlgmr.msra.gmra.mxu1 %v11598_v21  ;;  %9464 = vmatprep.subr.mxu1 %v12123_v35  ;;  %v12214_v21 = vld [vmem:[#allocation43_spill] sm:$0xff] }
0x1ec5   : > { %9465 = vmatpush3.msra.mxu1 %v12206_v4  ;;  %9472 = vmatprep.mubr.msk.f32.mxu1 %vm10053_vm0, %v12123_v35  ;;  %v7363_v7 = vrot.slane %v12214_v21, 7 }
0x1ec6   : > { %9466 = vmatprep.subr.mxu1 %v12123_v35 }
0x1ec7   : > { %9467 = vmatpush3.msra.mxu1 %v12207_v5  ;;  %v7364_v8 = vsel %vm12218_vm4, %v7363_v7, %v7362_v30  ;;  %vm12228_vm4 = vmmov %vm12225_vm3 }
0x1ec8   : > { %9468 = vmatprep.subr.mxu1 %v12123_v35  ;;  %v7366_v19 = vsel %vm12220_vm5, %v7365_v20, %v7364_v8  ;;  %vm12229_vm5 = vmmov %vm12225_vm3 }
0x1ec9   : > { %9469 = vmatpush3.msra.mxu1 %v12208_v6  ;;  %v7368_v14 = vsel %vm12222_vm8, %v7367_v12, %v7366_v19  ;;  %vm12230_vm8 = vmmov %vm12225_vm3 }
0x1eca   : > { %9470 = vmatprep.subr.mxu1 %v12123_v35  ;;  %v7370_v18 = vsel %vm12223_vm1, %v7369_v60, %v7368_v14  ;;  %vm12231_vm1 = vmmov %vm12225_vm3  ;;  %v12237_v60 = vld [vmem:[#allocation51_spill] sm:$0xff] }
0x1ecb   : > { %9471 = vmatpush3.msra.mxu1 %v12209_v9  ;;  %9528 = vmatmul.mubr.msk.f32.vlgmr.msra.gmra.mxu0 %vm12196_vm2, %v7370_v18  ;;  %vm12232_vm2 = vmmov %vm12231_vm1  ;;  %v12238_v18 = vld [vmem:[#allocation52_spill] sm:$0xff] }
0x1ecc   : > { %9473 = vmatmul.mubr.f32.vlgmr.msra.gmra.mxu1 %v11642_v10  ;;  %9486 = vmatprep.subr.mxu1 %v12123_v35 }
0x1ecd   : > { %9487 = vmatpush3.msra.mxu1 %v10513_v33  ;;  %9494 = vmatprep.mubr.msk.f32.mxu1 %vm10053_vm0, %v12123_v35 }
0x1ece   : > { %9488 = vmatprep.subr.mxu1 %v12123_v35  ;;  %9537 = vmatprep.mubr.msk.f32.mxu0 %vm10053_vm0, %v12123_v35 }
0x1ecf   : > { %9489 = vmatpush3.msra.mxu1 %v10518_v36 }
0x1ed0   : > { %9490 = vmatprep.subr.mxu1 %v12123_v35 }
0x1ed1   : > { %9491 = vmatpush3.msra.mxu1 %v10528_v42 }
0x1ed2   : > { %9492 = vmatprep.subr.mxu1 %v12123_v35 }
0x1ed3   : > { %9493 = vmatpush3.msra.mxu1 %v10537_v48 }
0x1ed4   : > { %9495 = vmatmul.mubr.f32.vlgmr.msra.gmra.mxu1 %v6943_v24  ;;  %9508 = vmatprep.subr.mxu1 %v12123_v35 }
0x1ed5   : > { %9509 = vmatpush3.msra.mxu1 %v10513_v33  ;;  %9516 = vmatprep.mubr.msk.f32.mxu1 %vm10053_vm0, %v12123_v35  ;;  %v6446_v33 = vpop.f32.mrf.mxu0 }
0x1ed6   : > { %9510 = vmatprep.subr.mxu1 %v12123_v35  ;;  %v6447_v4 = vadd.f32 %v12233_v15, %v6446_v33 }
0x1ed7   : > { %9511 = vmatpush3.msra.mxu1 %v10518_v36  ;;  %v9397_v58 = vpop.f32.mrf.mxu0 }
0x1ed8   : > { %9512 = vmatprep.subr.mxu1 %v12123_v35 }
0x1ed9   : > { %9513 = vmatpush3.msra.mxu1 %v10528_v42  ;;  %v6617_v16 = vpop.f32.mrf.mxu0 }
0x1eda   : > { %9514 = vmatprep.subr.mxu1 %v12123_v35 }
0x1edb   : > { %9515 = vmatpush3.msra.mxu1 %v10537_v48  ;;  %v9419_v44 = vpop.f32.mrf.mxu0 }
0x1edc   : > { %9517 = vmatmul.mubr.f32.vlgmr.msra.gmra.mxu1 %v11642_v10  ;;  %9530 = vmatprep.subr.mxu1 %v12123_v35 }
0x1edd   : > { %9532 = vmatprep.mubr.msk.f32.mxu1 %vm10053_vm0, %v12123_v35  ;;  %v6777_v36 = vpop.f32.mrf.mxu0 }
0x1edf   : > { %v9441_v0 = vpop.f32.mrf.mxu0 }
0x1ee1   : > { %v6947_v28 = vpop.f32.mrf.mxu0 }
0x1ee2   : > { %v6948_v17 = vadd.f32 %v12234_v49, %v6947_v28 }
0x1ee3   : > { %v9463_v11 = vpop.f32.mrf.mxu0 }
0x1ee5   : > { %v11767_v42 = vpop.f32.mrf.mxu0 }
0x1ee7   : > { %v9485_v31 = vpop.f32.mrf.mxu0 }
0x1ee9   : > { %v11769_v57 = vpop.f32.mrf.mxu0 }
0x1eeb   : > { %v9507_v48 = vpop.f32.mrf.mxu0 }
0x1f6c   : > { %v6285_v45 = vpop.f32.mrf.mxu1 }
0x1f6d   : > { %v6286_v63 = vadd.f32 %v11792_v37, %v6285_v45 }
0x1f6e   : > { %v9386_v38 = vpop.f32.mrf.mxu1 }
0x1f6f   : > { %v6290_v22 = vcombine.high %v6286_v63, %v6286_v63  ;;  %v6297_v10 = vrot.slane %v6286_v63, %v12224_v34 }
0x1f71   : > { %v6304_v23 = vrot.slane %v6290_v22, %v12224_v34  ;;  %v6305_v24 = vcombine.high %v6297_v10, %v6297_v10  ;;  %v6313_v27 = vrot.slane %v6297_v10, %v12224_v34 }
0x1f73   : > { %v6306_v40 = vcombine.high %v6304_v23, %v6304_v23  ;;  %v6320_v41 = vrot.slane %v6304_v23, %v12224_v34  ;;  %v6327_v47 = vrot.slane %v6305_v24, %v12224_v34  ;;  %v6335_v52 = vcombine.high %v6313_v27, %v6313_v27  ;;  %6347 = vst.msk [vmem:[%s11061_s25 + $0x2] sm:$0x1] %vm12225_vm3, %v6313_v27 }
0x1f74   : > { %v6537_v54 = vpop.f32.mrf.mxu1  ;;  %vm12235_vm3 = vcmask 261120  }
0x1f75   : > { %v6334_v56 = vrot.slane %v6306_v40, %v12224_v34  ;;  %v6336_v59 = vcombine.high %v6320_v41, %v6320_v41  ;;  %v6337_v62 = vcombine.high %v6327_v47, %v6327_v47  ;;  %6348 = vst.msk [vmem:[%s11061_s25 + $0x6] sm:$0x1] %vm12226_vm6, %v6327_v47  ;;  %v6538_v9 = vadd.f32 %v6537_v54, %v6447_v4  ;;  %vm12236_vm6 = vmmov %vm12235_vm3 }
0x1f76   : > { %6349 = vst.msk [vmem:[%s11061_s25 + $0xa] sm:$0x1] %vm12227_vm7, %v6335_v52  ;;  %v9408_v2 = vpop.f32.mrf.mxu1  ;;  %vm12240_vm7 = vcmask 56320  }
0x1f77   : > { %6351 = vst.msk [vmem:[%s11061_s25 + $0x12] sm:$0x1] %vm12228_vm4, %v6320_v41  ;;  %v6338_v46 = vcombine.high %v6334_v56, %v6334_v56  ;;  %v6618_v58 = vadd.f32 %v6617_v16, %v6538_v9 }
0x1f78   : > { %6350 = vst.msk [vmem:[%s11061_s25 + $0xe] sm:$0x1] %vm12229_vm5, %v6337_v62 }
0x1f79   : > { %6352 = vst.msk [vmem:[%s11061_s25 + $0x16] sm:$0x1] %vm12230_vm8, %v6334_v56 }
0x1f7a   : > { %6353 = vst.msk [vmem:[%s11061_s25 + $0x1a] sm:$0x1] %vm12231_vm1, %v6336_v59 }
0x1f7b   : > { %6354 = vst.msk [vmem:[%s11061_s25 + $0x1e] sm:$0x1] %vm12232_vm2, %v6338_v46 }
0x1f7c   : > { %v6694_v5 = vpop.f32.mrf.mxu1 }
0x1f7d   : > { %v6695_v0 = vadd.f32 %v6694_v5, %v6618_v58 }
0x1f7e   : > { %v9430_v6 = vpop.f32.mrf.mxu1 }
0x1f7f   : > { %v6778_v31 = vadd.f32 %v6777_v36, %v6695_v0 }
0x1f84   : > { %v6852_v44 = vpop.f32.mrf.mxu1 }
0x1f85   : > { %v6853_v48 = vadd.f32 %v6852_v44, %v6778_v31 }
0x1f86   : > { %v9452_v11 = vpop.f32.mrf.mxu1 }
0x1f87   : > { %v7444_v50 = vsel %vm12235_vm3, %v6853_v48, 0 }
0x1f88   : > { %v7515_v25 = vand.u32 4294901760, %v7444_v50 }
0x1f8a   : > { %v7516_v7 = vsub.f32 %v7444_v50, %v7515_v25 }
0x1f8b   : > { %v7439_v14 = vpop.f32.mrf.mxu0 }
0x1f8c   : > { %v7038_v39 = vpop.f32.mrf.mxu1  ;;  %v7517_v16 = vand.u32 4294901760, %v7516_v7  ;;  %v7440_v45 = vadd.f32 %v12238_v18, %v7439_v14 }
0x1f8d   : > { %v7039_v55 = vadd.f32 %v7038_v39, %v6948_v17  ;;  %v9529_v63 = vpop.f32.mrf.mxu0 }
0x1f8e   : > { %v9474_v43 = vpop.f32.mrf.mxu1  ;;  %v7518_v28 = vsub.f32 %v7516_v7, %v7517_v16 }
0x1f8f   : > { %v7119_v33 = vadd.f32 %v11767_v42, %v7039_v55 }
0x1f90   : > { %v7519_v19 = vand.u32 4294901760, %v7518_v28 }
0x1f94   : > { %v7195_v61 = vpop.f32.mrf.mxu1 }
0x1f95   : > { %v7196_v51 = vadd.f32 %v7195_v61, %v7119_v33 }
0x1f96   : > { %v9496_v21 = vpop.f32.mrf.mxu1 }
0x1f97   : > { %v7279_v30 = vadd.f32 %v11769_v57, %v7196_v51 }
0x1f9c   : > { %v7353_v3 = vpop.f32.mrf.mxu1 }
0x1f9d   : > { %v7354_v36 = vadd.f32 %v7353_v3, %v7279_v30 }
0x1f9e   : > { %v9518_v20 = vpop.f32.mrf.mxu1 }
0x1f9f   : > { %v7447_v8 = vsel %vm12236_vm6, %v7354_v36, 0 }
0x1fa0   : > { %v7480_v32 = vand.u32 4294901760, %v7447_v8 }
0x1fa2   : > { %v7557_v12 = vsub.f32 %v7447_v8, %v7480_v32  ;;  %9531 = vmatpush3.xpose.msra.mxu1 %v7480_v32 }
0x1fa3   : > { %9540 = vmatprep.subr.mxu1 %v12123_v35 }
0x1fa4   : > { %v7558_v13 = vand.u32 4294901760, %v7557_v12 }
0x1fa5   : > { %9533 = vmatmul.mubr.f32.vlgmr.msra.gmra.mxu1 %v7519_v19 }
0x1fa6   : > { %9541 = vmatpush3.xpose.msra.mxu1 %v7557_v12  ;;  %9542 = vmatprep.mubr.msk.f32.mxu1 %vm10053_vm0, %v12123_v35  ;;  %v7559_v42 = vsub.f32 %v7557_v12, %v7558_v13 }
0x1fa7   : > { %9550 = vmatprep.subr.mxu1 %v12123_v35 }
0x1fa8   : > { %v7560_v57 = vand.u32 4294901760, %v7559_v42 }
0x1fa9   : > { %9543 = vmatmul.mubr.f32.vlgmr.msra.gmra.mxu1 %v7516_v7 }
0x1faa   : > { %9536 = vmatpush3.xpose.msra.mxu0 %v7560_v57  ;;  %9551 = vmatpush3.xpose.msra.mxu1 %v7558_v13 }
0x1fab   : > { %9552 = vmatprep.mubr.msk.f32.mxu1 %vm10053_vm0, %v12123_v35  ;;  %9545 = vmatprep.subr.mxu0 %v12123_v35 }
0x1fac   : > { %9560 = vmatprep.subr.mxu1 %v12123_v35 }
0x1fad   : > { %9538 = vmatmul.mubr.f32.vlgmr.msra.gmra.mxu0 %v7515_v25  ;;  %9553 = vmatmul.mubr.f32.vlgmr.msra.gmra.mxu1 %v7515_v25 }
0x1fae   : > { %9546 = vmatpush3.xpose.msra.mxu0 %v7480_v32  ;;  %9547 = vmatprep.mubr.msk.f32.mxu0 %vm10053_vm0, %v12123_v35 }
0x1faf   : > { %9555 = vmatprep.subr.mxu0 %v12123_v35  ;;  %9562 = vmatprep.mubr.msk.f32.mxu1 %vm10053_vm0, %v12123_v35 }
0x1fb0   : > { %9561 = vmatpush3.msra.mxu1 %v7440_v45 }
0x1fb1   : > { %9548 = vmatmul.mubr.f32.vlgmr.msra.gmra.mxu0 %v7517_v16 }
0x1fb2   : > { %9556 = vmatpush3.xpose.msra.mxu0 %v7480_v32  ;;  %9557 = vmatprep.mubr.msk.f32.mxu0 %vm10053_vm0, %v12123_v35 }
0x1fb3   : > { %9565 = vmatprep.subr.mxu0 %v12123_v35 }
0x1fb5   : > { %9558 = vmatmul.mubr.f32.vlgmr.msra.gmra.mxu0 %v7515_v25 }
0x1fb6   : > { %9566 = vmatpush3.msra.mxu0 %v11514_v29  ;;  %9573 = vmatprep.mubr.msk.f32.mxu0 %vm10053_vm0, %v12123_v35  ;;  %vm12239_vm0 = vcmask 48128  }
0x1fb7   : > { %9567 = vmatprep.subr.mxu0 %v12123_v35 }
0x1fb8   : > { %9568 = vmatpush3.msra.mxu0 %v11520_v26 }
0x1fb9   : > { %9569 = vmatprep.subr.mxu0 %v12123_v35 }
0x1fba   : > { %9570 = vmatpush3.msra.mxu0 %v11524_v1 }
0x1fbb   : > { %9571 = vmatprep.subr.mxu0 %v12123_v35 }
0x1fbc   : > { %9572 = vmatpush3.msra.mxu0 %v12237_v60 }
0x2065   : > { %v7521_v29 = vpop.f32.mrf.mxu1 }
0x2067   : > { %v9534_v38 = vpop.f32.mrf.mxu1 }
0x2069   : > { %v7671_v22 = vpop.f32.mrf.mxu1 }
0x206b   : > { %v9544_v10 = vpop.f32.mrf.mxu1 }
0x206d   : > { %v7597_v23 = vpop.f32.mrf.mxu0  ;;  %v7819_v24 = vpop.f32.mrf.mxu1 }
0x206e   : > { %v7598_v26 = vadd.f32 %v7597_v23, %v7521_v29 }
0x206f   : > { %v9539_v27 = vpop.f32.mrf.mxu0  ;;  %v9554_v40 = vpop.f32.mrf.mxu1 }
0x2070   : > { %v7672_v41 = vadd.f32 %v7671_v22, %v7598_v26 }
0x2071   : > { %v7745_v1 = vpop.f32.mrf.mxu0 }
0x2072   : > { %v7746_v47 = vadd.f32 %v7745_v1, %v7672_v41 }
0x2073   : > { %v9549_v35 = vpop.f32.mrf.mxu0 }
0x2074   : > { %v7820_v52 = vadd.f32 %v7819_v24, %v7746_v47 }
0x2075   : > { %v7891_v54 = vpop.f32.mrf.mxu0 }
0x2076   : > { %v7892_v56 = vadd.f32 %v7891_v54, %v7820_v52 }
0x2077   : > { %v9559_v59 = vpop.f32.mrf.mxu0 }
0x2078   : > { %7899 = vrot.lane.b32.xlu1 %v7892_v56, %s10055_s29  ;;  %7896 = vrot.lane.b32.xlu0 %v7892_v56, %s10054_s26 }
0x20ea   : > { %v7900_v62 = vpop.permute.xlu1 %7899  ;;  %v7897_v2 = vpop.permute.xlu0 %7896 }
0x20eb   : > { %v7902_v46 = vsel %vm2206_vm9, %v7897_v2, %v7900_v62 }
0x20ec   : > { %v7904_v15 = vrot.slane %v7902_v46, 4 }
0x20ee   : > { %v7906_v4 = vadd.f32 %v7904_v15, %v7892_v56 }
0x20f0   : > { %7911 = vrot.lane.b32.xlu1 %v7906_v4, %s10057_s17  ;;  %7908 = vrot.lane.b32.xlu0 %v7906_v4, %s10056_s12  ;;  %s12243_s12 = sld [smem:[#allocation21_spill]]  ;;  %s8263_s17 = sshll.u32 %s11061_s25, 4  ;;  %s11911_s17 = int_to_ptr.vmem [resolvable:$true] %s8263_s17 }
0x20f1   : > { %s9947_s11 = scalar_lea.vmem %s11911_s17, 512  ;;  %p9954_p6 = scmp.lt.s32.totalorder %s11911_s17, %s9952_s15 }
0x20f2   : > { %p9948_p4 = scmp.ne.s32.totalorder %s11911_s17, %s9947_s11  ;;  %p9955_p9 = scmp.lt.s32.totalorder %s9953_s1, %s9947_s11 }
0x20f4   : > { %p9949_p2 = pnand %p9948_p4, %p10224_p7  ;;  %p9956_p13 = por %p9955_p9, %p9954_p6 }
0x20f6   : > { %p9950_p3 = pneg %p9949_p2 }
0x20f8   : > { %p9957_p0 = pnand %p9956_p13, %p9950_p3 }
0x2162   : > { %v7912_v5 = vpop.permute.xlu1 %7911  ;;  %v7909_v6 = vpop.permute.xlu0 %7908 }
0x2163   : > { %v7914_v9 = vsel %vm12239_vm0, %v7909_v6, %v7912_v5 }
0x2164   : > { %v7916_v58 = vrot.slane %v7914_v9, 2 }
0x2166   : > { %v7918_v44 = vadd.f32 %v7916_v58, %v7906_v4 }
0x2168   : > { %7923 = vrot.lane.b32.xlu1 %v7918_v44, %s10058_s30  ;;  %7920 = vrot.lane.b32.xlu0 %v7918_v44, %s10059_s24 }
0x21da   : > { %v7924_v0 = vpop.permute.xlu1 %7923  ;;  %v7921_v11 = vpop.permute.xlu0 %7920 }
0x21db   : > { %v7926_v31 = vsel %vm12240_vm7, %v7921_v11, %v7924_v0 }
0x21dc   : > { %v7928_v48 = vrot.slane %v7926_v31, 1 }
0x21de   : > { %v7930_v39 = vadd.f32 %v7928_v48, %v7918_v44 }
0x21e0   : > { %v7931_v49 = vmul.f32 0.03125, %v7930_v39 }
0x21e2   : > { %v7932_v17 = vsel %vm2239_vm12, %v7931_v49, -inf }
0x21e3   : > { %7933 = vmax.xlane.f32.xlu0 %v7932_v17 }
0x226c   : > { %v7934_v43 = vpop.xlane.xlu0 %7933 }
0x226d   : > { %vm7935_vm4 = vcmp.eq.f32.partialorder %v7931_v49, %v7934_v43 }
0x226e   : > { %v7936_v50 = vsel %vm7935_vm4, %v10782_v53, 8 }
0x226f   : > { %v7937_v55 = vsel %vm2239_vm12, %v7936_v50, 2147483647 }
0x2270   : > { %v7939_v25 = vshra.s32 %v7937_v55, 16  ;;  %v7938_v33 = vand.u32 65535, %v7937_v55 }
0x2272   : > { %v7941_v61 = vcvt.s32.f32 %v7939_v25  ;;  %v7940_v7 = vcvt.s32.f32 %v7938_v33 }
0x2274   : > { %7942 = vmin.xlane.f32.xlu1 %v7941_v61 }
0x22fd   : > { %v7943_v21 = vpop.xlane.xlu1 %7942 }
0x22fe   : > { %vm7944_vm5 = vcmp.eq.f32.partialorder %v7941_v61, %v7943_v21  ;;  %v7949_v16 = vcvt.f32.s32 %v7943_v21 }
0x22ff   : > { %v7945_v51 = vsel %vm7944_vm5, %v7940_v7, inf }
0x2300   : > { %7946 = vmin.xlane.f32.xlu0 %v7945_v51  ;;  %v7950_v3 = vshll.u32 %v7949_v16, 16 }
0x2389   : > { %v7947_v30 = vpop.xlane.xlu0 %7946 }
0x238a   : > { %v7948_v36 = vcvt.f32.s32 %v7947_v30 }
0x238c   : > { %v7951_v20 = vadd.s32 %v7950_v3, %v7948_v36 }
0x238e   : > { %vm7952_vm8 = vcmp.eq.s32.totalorder %v10782_v53, %v7951_v20  ;;  %v7954_v63 = vsub.s32 8, %v7951_v20  ;;  %vm7953_vm3 = vcmp.eq.s32.totalorder %v7951_v20, 0 }
0x238f   : > { %v7959_v8 = vsel %vm7952_vm8, -1e+30, %v7931_v49 }
0x2390   : > { %v7960_v28 = vsel %vm2239_vm12, %v7959_v8, -inf  ;;  %v7955_v23 = vsel %vm7953_vm3, 0, %v7954_v63 }
0x2391   : > { %7961 = vmax.xlane.f32.xlu0 %v7960_v28  ;;  %vm7956_vm0 = vcmp.eq.s32.totalorder %v10782_v53, %v7955_v23 }
0x2392   : > { %v7957_v27 = vsel %vm7956_vm0, %v7934_v43, 0.0 }
0x241a   : > { %v7962_v32 = vpop.xlane.xlu0 %7961 }
0x241b   : > { %vm7963_vm1 = vcmp.eq.f32.partialorder %v7959_v8, %v7962_v32 }
0x241c   : > { %v7964_v12 = vsel %vm7963_vm1, %v10782_v53, 8 }
0x241d   : > { %v7965_v19 = vsel %vm2239_vm12, %v7964_v12, 2147483647 }
0x241e   : > { %v7967_v13 = vshra.s32 %v7965_v19, 16  ;;  %v7966_v57 = vand.u32 65535, %v7965_v19 }
0x2420   : > { %v7969_v42 = vcvt.s32.f32 %v7967_v13  ;;  %v7968_v14 = vcvt.s32.f32 %v7966_v57 }
0x2422   : > { %7970 = vmin.xlane.f32.xlu1 %v7969_v42 }
0x24ab   : > { %v7971_v60 = vpop.xlane.xlu1 %7970 }
0x24ac   : > { %vm7972_vm2 = vcmp.eq.f32.partialorder %v7969_v42, %v7971_v60  ;;  %v7977_v45 = vcvt.f32.s32 %v7971_v60 }
0x24ad   : > { %v7973_v18 = vsel %vm7972_vm2, %v7968_v14, inf }
0x24ae   : > { %7974 = vmin.xlane.f32.xlu0 %v7973_v18  ;;  %v7978_v38 = vshll.u32 %v7977_v45, 16 }
0x2537   : > { %v7975_v29 = vpop.xlane.xlu0 %7974 }
0x2538   : > { %v7976_v22 = vcvt.f32.s32 %v7975_v29 }
0x253a   : > { %v7979_v10 = vadd.s32 %v7978_v38, %v7976_v22 }
0x253c   : > { %vm7980_vm6 = vcmp.eq.s32.totalorder %v7979_v10, 0  ;;  %v7981_v24 = vsub.s32 8, %v7979_v10 }
0x253e   : > { %v7982_v26 = vsel %vm7980_vm6, 0, %v7981_v24 }
0x253f   : > { %vm7983_vm7 = vcmp.eq.s32.totalorder %v10782_v53, %v7982_v26 }
0x2540   : > { %v7985_v40 = vsel %vm7983_vm7, %v7962_v32, 0.0  ;;  %vm7984_vm4 = vmor %vm7956_vm0, %vm7983_vm7 }
0x2541   : > { %v7986_v41 = vadd.f32 %v7985_v40, %v7957_v27 }
0x2543   : > { %v7987_v1 = vsel %vm7984_vm4, %v7986_v41, -1e+30 }
0x2544   : > { %v7988_v47 = vsel %vm2239_vm12, %v7987_v1, -inf }
0x2545   : > { %7989 = vmax.xlane.f32.xlu1 %v7988_v47 }
0x25ce   : > { %v7990_v35 = vpop.xlane.xlu1 %7989 }
0x25cf   : > { %v7991_v52 = vsub.f32 %v7987_v1, %v7990_v35 }
0x25d1   : > { %v7992_v54 = vmul.f32 1.442695, %v7991_v52 }
0x25d3   : > { %9719 = vpow2.f32 %v7992_v54 }
0x25e0   : > { %v9720_v56 = vpop.eup %9719 }
0x25e1   : > { %v7994_v59 = vsel %vm7984_vm4, %v9720_v56, 0.0 }
0x25e2   : > { %v7995_v62 = vsel %vm2239_vm12, %v7994_v59, 0.0  ;;  %vm12241_vm12 = vcmask 15360  }
0x25e3   : > { %7996 = vadd.xlane.f32.xlu0 %v7995_v62 }
0x266c   : > { %v7997_v2 = vpop.xlane.xlu0 %7996 }
0x266d   : > { %9721 = vrcp.f32 %v7997_v2 }
0x267a   : > { %v9722_v53 = vpop.eup %9721 }
0x267b   : > { %v7999_v46 = vmul.f32 %v9722_v53, %v7994_v59 }
0x267d   : > { %8004 = vrot.lane.b32.xlu0 %v7999_v46, %s10060_s20  ;;  %8001 = vrot.lane.b32.xlu1 %v7999_v46, %s10061_s13  ;;  %s12249_s13 = sld [smem:[#allocation57_spill]] }
0x26ef   : > { %v8005_v15 = vpop.permute.xlu0 %8004  ;;  %v8002_v4 = vpop.permute.xlu1 %8001 }
0x26f0   : > { %v8007_v5 = vsel %vm2315_vm10, %v8002_v4, %v8005_v15  ;;  %vm12242_vm10 = vcmask 261120  }
0x26f1   : > { %v8009_v6 = vrot.slane %v8007_v5, 7 }
0x26f3   : > { %v8011_v9 = vsel %vm2320_vm11, %v7999_v46, %v8009_v6 }
0x26f4   : > { %8013 = vrot.lane.b32.xlu1 %v8011_v9, %s10062_s28 }
0x26f8   : > { %8016 = vrot.lane.b32.xlu1 %v8011_v9, %s10063_s5  ;;  %s8249_s5 = scalar_lea.sflag [#allocation4], %s10323_s7 }
0x2766   : > { %v8014_v58 = vpop.permute.xlu1 %8013 }
0x276a   : > { %v8017_v44 = vpop.permute.xlu1 %8016 }
0x276b   : > { %v8019_v0 = vsel %vm12241_vm12, %v8014_v58, %v8017_v44 }
0x276c   : > { %v8021_v11 = vrot.slane %v8019_v0, 6 }
0x276e   : > { %v8023_v31 = vsel %vm2334_vm13, %v8011_v9, %v8021_v11 }
0x276f   : > { %8028 = vrot.lane.b32.xlu1 %v8023_v31, %s10055_s29  ;;  %8025 = vrot.lane.b32.xlu0 %v8023_v31, %s10054_s26  ;;  %s8483_s26 = sshll.u32 %s12243_s12, 9 }
0x2770   : > { %s11903_s28 = scalar_lea.hbm %s12249_s13, %s8483_s26 }
0x27e1   : > { %v8029_v48 = vpop.permute.xlu1 %8028  ;;  %v8026_v39 = vpop.permute.xlu0 %8025 }
0x27e2   : > { %v8031_v49 = vsel %vm2206_vm9, %v8026_v39, %v8029_v48  ;;  %vm12244_vm9 = vcmask 253952  }
0x27e3   : > { %v8033_v17 = vrot.slane %v8031_v49, 4  ;;  %vm12246_vm11 = vmmov %vm12244_vm9 }
0x27e4   : > { %vm12248_vm13 = vmmov %vm12244_vm9 }
0x27e5   : > { %v8035_v43 = vsel %vm2347_vm14, %v8023_v31, %v8033_v17  ;;  %vm12250_vm14 = vmmov %vm12244_vm9 }
0x27e6   : > { %9563 = vmatmul.mubr.msk.f32.vlgmr.msra.gmra.mxu1 %vm2349_vm15, %v8035_v43  ;;  %vm12247_vm15 = vmmov %vm12244_vm9 }
0x27e7   : > { %vm12251_vm5 = vmmov %vm12244_vm9 }
0x27e8   : > { %vm12252_vm8 = vmmov %vm12251_vm5 }
0x27e9   : > { %vm12253_vm1 = vmmov %vm12251_vm5 }
0x28a6   : > { %v8105_v50 = vpop.f32.mrf.mxu1 }
0x28a7   : > { %9574 = vmatmul.mubr.msk.f32.vlgmr.msra.gmra.mxu0 %vm12242_vm10, %v8105_v50 }
0x28a8   : > { %v9564_v55 = vpop.f32.mrf.mxu1 }
0x2967   : > { %v8178_v25 = vpop.f32.mrf.mxu0 }
0x2968   : > { %v8179_v61 = vadd.f32 %v11792_v37, %v8178_v25 }
0x2969   : > { %v9575_v33 = vpop.f32.mrf.mxu0 }
0x296a   : > { %v8183_v21 = vcombine.high %v8179_v61, %v8179_v61  ;;  %v8190_v7 = vrot.slane %v8179_v61, %v12224_v34 }
0x296c   : > { %v8197_v51 = vrot.slane %v8183_v21, %v12224_v34  ;;  %v8198_v16 = vcombine.high %v8190_v7, %v8190_v7  ;;  %v8206_v30 = vrot.slane %v8190_v7, %v12224_v34 }
0x296e   : > { %v8199_v3 = vcombine.high %v8197_v51, %v8197_v51  ;;  %v8213_v36 = vrot.slane %v8197_v51, %v12224_v34  ;;  %v8220_v37 = vrot.slane %v8198_v16, %v12224_v34  ;;  %v8228_v20 = vcombine.high %v8206_v30, %v8206_v30  ;;  %8240 = vst.msk [vmem:[%s11061_s25 + $0x3] sm:$0x1] %vm12244_vm9, %v8206_v30 }
0x2970   : > { %v8227_v8 = vrot.slane %v8199_v3, %v12224_v34  ;;  %v8229_v28 = vcombine.high %v8213_v36, %v8213_v36  ;;  %v8230_v32 = vcombine.high %v8220_v37, %v8220_v37  ;;  %8241 = vst.msk [vmem:[%s11061_s25 + $0x7] sm:$0x1] %vm12246_vm11, %v8220_v37 }
0x2971   : > { %8242 = vst.msk [vmem:[%s11061_s25 + $0xb] sm:$0x1] %vm12247_vm15, %v8228_v20 }
0x2972   : > { %8244 = vst.msk [vmem:[%s11061_s25 + $0x13] sm:$0x1] %vm12248_vm13, %v8213_v36  ;;  %v8231_v12 = vcombine.high %v8227_v8, %v8227_v8 }
0x2973   : > { %8243 = vst.msk [vmem:[%s11061_s25 + $0xf] sm:$0x1] %vm12250_vm14, %v8230_v32 }
0x2974   : > { %8245 = vst.msk [vmem:[%s11061_s25 + $0x17] sm:$0x1] %vm12251_vm5, %v8227_v8 }
0x2975   : > { %8246 = vst.msk [vmem:[%s11061_s25 + $0x1b] sm:$0x1] %vm12252_vm8, %v8229_v28 }
0x2976   : > { %8247 = vst.msk [vmem:[%s11061_s25 + $0x1f] sm:$0x1] %vm12253_vm1, %v8231_v12 }
0x2977   : > { %9960 = shalt.err (!%p9957_p0)
}
0x2978   : > { %s9961_s25 = scalar_lea.hbm %s11903_s28, 512  ;;  %s9965_s21 = scalar_lea.hbm %s12249_s13, 1024 }
0x2979   : > { %p9962_p11 = scmp.ne.s32.totalorder %s11903_s28, %s9961_s25  ;;  %p9966_p8 = scmp.lt.s32.totalorder %s11903_s28, %s12249_s13 }
0x297a   : > { %p9967_p10 = scmp.lt.s32.totalorder %s9965_s21, %s9961_s25 }
0x297b   : > { %p9963_p12 = pnand %p9962_p11, %p10224_p7 }
0x297c   : > { %p9968_p5 = por %p9967_p10, %p9966_p8 }
0x297d   : > { %p9964_p1 = pneg %p9963_p12 }
0x297f   : > { %p9969_p4 = pnand %p9968_p5, %p9964_p1 }
0x2981   : > { %9972 = shalt.err (!%p9969_p4)
}
0x2982   : > { %s10066_s16 = smov 64  }
0x2983   : > { %9598 = dma.vmem_to_hbm [thread:$0]  (%p10224_p7), %s11911_s17, 512, %s11903_s28, %s8249_s5, %s10066_s16, %s10066_s16, %s10055_s29  }
0x2984 PF: > { %s12254_s12 = sld [smem:[#allocation20_spill]] }
0x2985   : > { %s12255_s26 = sld [smem:[#allocation24_spill]] }
0x2986   : > { %s12256_s24 = sld [smem:[#allocation23_spill]] }
0x298a   : > { %s8278_s20 = sand.u32 1, %s12254_s12  }
0x298b   : > { %p12257_p2 = scmp.ne.s32.totalorder %s12255_s26, 0  ;;  %s8279_s11 = scalar_lea.sflag [#allocation4], %s8278_s20 }
0x298c   : > { %p12258_p3 = scmp.ge.s32.totalorder %s12256_s24, 2 }
0x298e   : > { %p9624_p6 = pnand %p12258_p3, %p12257_p2 }
0x2990   : > { %p9625_p9 = pneg %p9624_p6 }
0x2992   : > { %10014 = dma.done.wait (%p9625_p9), %s8279_s11, 512  }
0x2993   : > { %10016 = vsyncadd (%p9625_p9), %s8279_s11, 4294966784  ;;  %s32_s22 = sadd.s32 1, %s12256_s24   ;;  %s12259_s7 = sld [smem:[#allocation27_spill]] }
0x2994   : > { %p29_p13 = scmp.ge.s32.totalorder %s32_s22, 4   ;;  %s12260_s20 = sld [smem:[#allocation22_spill]] }
0x2995   : > { %s12261_s21 = sld [smem:[#allocation25_spill]]  ;;  %s12262_s17 = smov %s10023_s18 }
0x2996   : > { %s12263_s18 = smov %s10027_s19  ;;  %31 = sbr.rel (!%p29_p13) target bundleno = 16 (0x10), region = 149 }
0x2999   : > { %s12264_s19 = smov %s12259_s7 }
0x299b   :  { %8284 = vsyncpa [#allocation3], 1 }
0x299c   :  { %8286 = vsyncpa [#allocation3 + $0x1], 1 }
0x299d   :  { %8287 = vsyncpa [#allocation6], 1 }
0x299e   :  { %8289 = vsyncpa [#allocation6 + $0x1], 1 }
0x299f   :  { %8290 = vsyncpa [#allocation9], 1 }
0x29a0   :  { %8291 = vsyncpa [#allocation12], 1 }
0x29a1   :  { %8292 = vsyncpa [#allocation4], 1 }
0x29a2   :  { %8294 = vsyncpa [#allocation4 + $0x1], 1 }

</bundles_post_ra>
